<compile_context>
chip_gen: v7x
topology: tpu7x:2x2x1
jax: 0.10.0
libtpu: 0.0.40
codegen_flags: <defaults>
</compile_context>

<pallas_src>
import jax
import jax.numpy as jnp
from jax.experimental import pallas as pl
from jax.experimental.pallas import tpu as pltpu


_NEG_SLOPE = 0.01  # torch.nn.LeakyReLU default negative_slope


def _leaky_relu(x):
    return jnp.where(x >= 0, x, _NEG_SLOPE * x)


def identity(x):
    # Per perf review: a true Identity should not launch a kernel at all.
    return x


# ---------------------------------------------------------------------------
# Kernel 1: fused GEMM + bias + LeakyReLU (conv layers via im2col).
# ---------------------------------------------------------------------------
def _gemm_bias_lrelu_kernel(a_ref, w_ref, b_ref, o_ref):
    acc = jnp.dot(a_ref[...], w_ref[...], preferred_element_type=jnp.float32)
    o_ref[...] = _leaky_relu(acc + b_ref[...]).astype(o_ref.dtype)


def _pick_tile_m(m, cap=512):
    """Largest row tile <= cap that is a multiple of 8 and divides m."""
    if m <= cap:
        return m
    t = cap - cap % 8
    while t >= 8:
        if m % t == 0:
            return t
        t -= 8
    return m


def _im2col(x, kh, kw, ph, pw):
    """(B,H,W,C) -> (B*Ho*Wo, kh*kw*C) patches. Pure data layout (XLA-side)."""
    b, h, w, c = x.shape
    ho = h + 2 * ph - kh + 1
    wo = w + 2 * pw - kw + 1
    xp = jnp.pad(x, ((0, 0), (ph, ph), (pw, pw), (0, 0)))
    cols = []
    for dy in range(kh):
        for dx in range(kw):
            cols.append(xp[:, dy:dy + ho, dx:dx + wo, :])
    patches = jnp.concatenate(cols, axis=-1)           # (B, Ho, Wo, kh*kw*C)
    return patches.reshape(b * ho * wo, kh * kw * c), ho, wo


def conv2d_lrelu(x, w, b, ph, pw):
    """Conv2d(stride=1, padding=(ph, pw)) + LeakyReLU.

    x: (B, H, W, Cin) NHWC.   w: (kh, kw, Cin, Cout).   b: (1, Cout).
    """
    kh, kw, _, cout = w.shape
    bsz = x.shape[0]
    patches, ho, wo = _im2col(x, kh, kw, ph, pw)
    m, kdim = patches.shape
    w_flat = w.reshape(kdim, cout)
    tm = _pick_tile_m(m)
    out = pl.pallas_call(
        _gemm_bias_lrelu_kernel,
        out_shape=jax.ShapeDtypeStruct((m, cout), x.dtype),
        grid=(m // tm,),
        in_specs=[
            pl.BlockSpec((tm, kdim), lambda i: (i, 0)),
            pl.BlockSpec((kdim, cout), lambda i: (0, 0)),
            pl.BlockSpec((1, cout), lambda i: (0, 0)),
        ],
        out_specs=pl.BlockSpec((tm, cout), lambda i: (i, 0)),
        compiler_params=pltpu.CompilerParams(dimension_semantics=("parallel",)),
    )(patches, w_flat, b)
    return out.reshape(bsz, ho, wo, cout)


# ---------------------------------------------------------------------------
# Kernel 2: fused 3-layer dense head, K-tiled over the 12800-wide input.
#   leaky(leaky(x @ w1 + b1) @ w2 + b2) @ w3 + b3
# ---------------------------------------------------------------------------
def _dense_head_kernel(x_ref, w1_ref, b1_ref, w2_ref, b2_ref, w3_ref, b3_ref,
                       o_ref, acc_ref):
    k = pl.program_id(0)

    @pl.when(k == 0)
    def _():
        acc_ref[...] = jnp.zeros_like(acc_ref)

    acc_ref[...] += jnp.dot(x_ref[...], w1_ref[...],
                            preferred_element_type=jnp.float32)

    @pl.when(k == pl.num_programs(0) - 1)
    def _():
        h1 = _leaky_relu(acc_ref[...] + b1_ref[...])
        h2 = _leaky_relu(
            jnp.dot(h1, w2_ref[...], preferred_element_type=jnp.float32)
            + b2_ref[...])
        out = (jnp.dot(h2, w3_ref[...], preferred_element_type=jnp.float32)
               + b3_ref[...])
        o_ref[...] = out.astype(o_ref.dtype)


def _pick_tile_k(k, cap=2048):
    """Largest K tile <= cap that is a multiple of 128 and divides k."""
    if k <= cap and k % 128 == 0:
        return k
    t = cap - cap % 128
    while t >= 128:
        if k % t == 0:
            return t
        t -= 128
    return k


def dense_head(x, w1, b1, w2, b2, w3, b3):
    bsz, kdim = x.shape
    hdim = w1.shape[1]
    tk = _pick_tile_k(kdim)
    return pl.pallas_call(
        _dense_head_kernel,
        out_shape=jax.ShapeDtypeStruct((bsz, 1), x.dtype),
        grid=(kdim // tk,),
        in_specs=[
            pl.BlockSpec((bsz, tk), lambda k: (0, k)),
            pl.BlockSpec((tk, hdim), lambda k: (k, 0)),
            pl.BlockSpec((1, hdim), lambda k: (0, 0)),
            pl.BlockSpec((hdim, hdim), lambda k: (0, 0)),
            pl.BlockSpec((1, hdim), lambda k: (0, 0)),
            pl.BlockSpec((hdim, 1), lambda k: (0, 0)),
            pl.BlockSpec((1, 1), lambda k: (0, 0)),
        ],
        out_specs=pl.BlockSpec((bsz, 1), lambda k: (0, 0)),
        scratch_shapes=[pltpu.VMEM((bsz, hdim), jnp.float32)],
        compiler_params=pltpu.CompilerParams(dimension_semantics=("arbitrary",)),
    )(x, w1, b1, w2, b2, w3, b3)


# ---------------------------------------------------------------------------
# Parameters (Kaiming-normal, leaky_relu gain, like the PyTorch module).
# ---------------------------------------------------------------------------
def init_params(key, n_filters=32, n_dense=128, dtype=jnp.float32):
    assert n_filters % 4 == 0 and n_dense % 2 == 0
    gain = (2.0 / (1.0 + _NEG_SLOPE ** 2)) ** 0.5
    keys = iter(jax.random.split(key, 16))

    def conv(kh, kw, cin, cout):
        std = gain / float(kh * kw * cin) ** 0.5
        return (std * jax.random.normal(next(keys), (kh, kw, cin, cout), dtype),
                jnp.zeros((1, cout), dtype))

    def linear(fin, fout):
        std = gain / float(fin) ** 0.5
        return (std * jax.random.normal(next(keys), (fin, fout), dtype),
                jnp.zeros((1, fout), dtype))

    feat = 20 * 20 * n_filters
    p = {}
    p["scan1_w"], p["scan1_b"] = conv(5, 5, 1, n_filters)
    for i in range(1, 6):
        p[f"conv{i}_w"], p[f"conv{i}_b"] = conv(3, 3, n_filters, n_filters)
    for head in ("phi", "theta"):
        p[f"{head}_w1"], p[f"{head}_b1"] = linear(feat, n_dense)
        p[f"{head}_w2"], p[f"{head}_b2"] = linear(n_dense, n_dense)
        p[f"{head}_w3"], p[f"{head}_b3"] = linear(n_dense, 1)
    return p


# ---------------------------------------------------------------------------
# Forward pass (mirrors Model_ImportanceAnalysis_Charge_Only.forward)
# ---------------------------------------------------------------------------
@jax.jit
def _forward_arrays(params, main):
    # Main[:, 1, :, :].unsqueeze(1): keep only the charge channel.
    x = main[:, 1:2, :, :]                    # (B, 1, 22, 20) NCHW
    x = jnp.transpose(x, (0, 2, 3, 1))        # -> NHWC
    x = conv2d_lrelu(x, params["scan1_w"], params["scan1_b"], ph=1, pw=2)
    for i in range(1, 6):
        x = conv2d_lrelu(x, params[f"conv{i}_w"], params[f"conv{i}_b"],
                         ph=1, pw=1)
    bsz = x.shape[0]
    # Match torch's .view flatten order on an NCHW tensor: (C, H, W).
    feat = jnp.transpose(x, (0, 3, 1, 2)).reshape(bsz, -1)   # (B, 12800)
    phi = dense_head(feat, params["phi_w1"], params["phi_b1"],
                     params["phi_w2"], params["phi_b2"],
                     params["phi_w3"], params["phi_b3"])
    theta = dense_head(feat, params["theta_w1"], params["theta_b1"],
                       params["theta_w2"], params["theta_b2"],
                       params["theta_w3"], params["theta_b3"])
    return identity(jnp.concatenate([phi, theta], axis=1))    # (B, 2)


def forward(params, main, norm_state_in="Net", norm_state_out="Net"):
    assert norm_state_in == "Net", "normStateIn must be Net"
    assert norm_state_out == "Net", "normStateOut must be Net"
    return _forward_arrays(params, main), norm_state_out


if __name__ == "__main__":
    key = jax.random.PRNGKey(0)
    kp, kx = jax.random.split(key)
    params = init_params(kp)
    # (B, C, H, W) = (2, 2, 22, 20): channel 1 is the charge plane; 22x20
    # gives the 20x20 post-Scan1 spatial size the dense layers expect.
    main = jax.random.normal(kx, (2, 2, 22, 20), dtype=jnp.float32)

    out, norm_state = forward(params, main)
    out = jax.block_until_ready(out)

    assert out.shape == (2, 2), out.shape
    assert norm_state == "Net"
    assert bool(jnp.all(jnp.isfinite(out)))
    print("KERNEL_OK")
</pallas_src>

<mosaic_0001>
module attributes {stable_mosaic.version = 11 : i64} {
  func.func @_gemm_bias_lrelu_kernel(%arg0: i32, %arg1: memref<400x25xf32, #tpu.memory_space<vmem>>, %arg2: memref<25x32xf32, #tpu.memory_space<vmem>>, %arg3: memref<1x32xf32, #tpu.memory_space<vmem>>, %arg4: memref<400x32xf32, #tpu.memory_space<vmem>>) attributes {dimension_semantics = [#tpu.dimension_semantics<parallel>], iteration_bounds = array<i64: 2>, scalar_prefetch = 0 : i64, scratch_operands = 0 : i64, tpu.core_type = #tpu.core_type<tc>, window_params = [{transform_indices = @transform_0, window_bounds = array<i64: 400, 25>}, {pipeline_mode = #tpu.pipeline_mode<synchronous>, transform_indices = @transform_1, window_bounds = array<i64: 25, 32>}, {pipeline_mode = #tpu.pipeline_mode<synchronous>, transform_indices = @transform_2, window_bounds = array<i64: 1, 32>}, {transform_indices = @transform_3, window_bounds = array<i64: 400, 32>}]} {
    %c0 = arith.constant 0 : index
    %c0_0 = arith.constant 0 : index
    %0 = vector.load %arg1[%c0, %c0_0] : memref<400x25xf32, #tpu.memory_space<vmem>>, vector<400x25xf32>
    %c0_1 = arith.constant 0 : index
    %c0_2 = arith.constant 0 : index
    %1 = vector.load %arg2[%c0_1, %c0_2] : memref<25x32xf32, #tpu.memory_space<vmem>>, vector<25x32xf32>
    %cst = arith.constant dense<0.000000e+00> : vector<400x32xf32>
    %2 = tpu.matmul %0, %1, %cst {dimension_numbers = #tpu.dot_dimension_numbers<[1], [0], [0], [1], [0, 0, 1, 1], [], []>} : vector<400x25xf32>, vector<25x32xf32>, vector<400x32xf32> -> vector<400x32xf32>
    %c0_3 = arith.constant 0 : index
    %c0_4 = arith.constant 0 : index
    %3 = vector.load %arg3[%c0_3, %c0_4] : memref<1x32xf32, #tpu.memory_space<vmem>>, vector<1x32xf32>
    %4 = vector.broadcast %3 : vector<1x32xf32> to vector<400x32xf32>
    %5 = arith.addf %2, %4 : vector<400x32xf32>
    %cst_5 = arith.constant 0.000000e+00 : f32
    %6 = vector.broadcast %cst_5 : f32 to vector<400x32xf32>
    %7 = arith.cmpf oge, %5, %6 : vector<400x32xf32>
    %cst_6 = arith.constant 0.00999999977 : f32
    %8 = vector.broadcast %cst_6 : f32 to vector<400x32xf32>
    %9 = arith.mulf %8, %5 : vector<400x32xf32>
    %10 = arith.select %7, %5, %9 : vector<400x32xi1>, vector<400x32xf32>
    %c0_7 = arith.constant 0 : index
    %c0_8 = arith.constant 0 : index
    %11 = vector.load %arg4[%c0_7, %c0_8] : memref<400x32xf32, #tpu.memory_space<vmem>>, vector<400x32xf32>
    tpu.vector_store %arg4[%c0_7, %c0_8], %10 {strides = array<i32>} : memref<400x32xf32, #tpu.memory_space<vmem>>, vector<400x32xf32>,
    return
  }
  func.func @transform_0(%arg0: i32) -> (i32, i32) {
    %c0_i32 = arith.constant 0 : i32
    %c0_i32_0 = arith.constant 0 : i32
    return %arg0, %c0_i32 : i32, i32
  }
  func.func @transform_1(%arg0: i32) -> (i32, i32) {
    %c0_i32 = arith.constant 0 : i32
    %c0_i32_0 = arith.constant 0 : i32
    %c0_i32_1 = arith.constant 0 : i32
    return %c0_i32, %c0_i32_0 : i32, i32
  }
  func.func @transform_2(%arg0: i32) -> (i32, i32) {
    %c0_i32 = arith.constant 0 : i32
    %c0_i32_0 = arith.constant 0 : i32
    %c0_i32_1 = arith.constant 0 : i32
    return %c0_i32, %c0_i32_0 : i32, i32
  }
  func.func @transform_3(%arg0: i32) -> (i32, i32) {
    %c0_i32 = arith.constant 0 : i32
    %c0_i32_0 = arith.constant 0 : i32
    return %arg0, %c0_i32 : i32, i32
  }
}

module attributes {stable_mosaic.version = 11 : i64} {
  func.func @_gemm_bias_lrelu_kernel(%arg0: i32, %arg1: memref<400x288xf32, #tpu.memory_space<vmem>>, %arg2: memref<288x32xf32, #tpu.memory_space<vmem>>, %arg3: memref<1x32xf32, #tpu.memory_space<vmem>>, %arg4: memref<400x32xf32, #tpu.memory_space<vmem>>) attributes {dimension_semantics = [#tpu.dimension_semantics<parallel>], iteration_bounds = array<i64: 2>, scalar_prefetch = 0 : i64, scratch_operands = 0 : i64, tpu.core_type = #tpu.core_type<tc>, window_params = [{transform_indices = @transform_0, window_bounds = array<i64: 400, 288>}, {pipeline_mode = #tpu.pipeline_mode<synchronous>, transform_indices = @transform_1, window_bounds = array<i64: 288, 32>}, {pipeline_mode = #tpu.pipeline_mode<synchronous>, transform_indices = @transform_2, window_bounds = array<i64: 1, 32>}, {transform_indices = @transform_3, window_bounds = array<i64: 400, 32>}]} {
    %c0 = arith.constant 0 : index
    %c0_0 = arith.constant 0 : index
    %0 = vector.load %arg1[%c0, %c0_0] : memref<400x288xf32, #tpu.memory_space<vmem>>, vector<400x288xf32>
    %c0_1 = arith.constant 0 : index
    %c0_2 = arith.constant 0 : index
    %1 = vector.load %arg2[%c0_1, %c0_2] : memref<288x32xf32, #tpu.memory_space<vmem>>, vector<288x32xf32>
    %cst = arith.constant dense<0.000000e+00> : vector<400x32xf32>
    %2 = tpu.matmul %0, %1, %cst {dimension_numbers = #tpu.dot_dimension_numbers<[1], [0], [0], [1], [0, 0, 1, 1], [], []>} : vector<400x288xf32>, vector<288x32xf32>, vector<400x32xf32> -> vector<400x32xf32>
    %c0_3 = arith.constant 0 : index
    %c0_4 = arith.constant 0 : index
    %3 = vector.load %arg3[%c0_3, %c0_4] : memref<1x32xf32, #tpu.memory_space<vmem>>, vector<1x32xf32>
    %4 = vector.broadcast %3 : vector<1x32xf32> to vector<400x32xf32>
    %5 = arith.addf %2, %4 : vector<400x32xf32>
    %cst_5 = arith.constant 0.000000e+00 : f32
    %6 = vector.broadcast %cst_5 : f32 to vector<400x32xf32>
    %7 = arith.cmpf oge, %5, %6 : vector<400x32xf32>
    %cst_6 = arith.constant 0.00999999977 : f32
    %8 = vector.broadcast %cst_6 : f32 to vector<400x32xf32>
    %9 = arith.mulf %8, %5 : vector<400x32xf32>
    %10 = arith.select %7, %5, %9 : vector<400x32xi1>, vector<400x32xf32>
    %c0_7 = arith.constant 0 : index
    %c0_8 = arith.constant 0 : index
    %11 = vector.load %arg4[%c0_7, %c0_8] : memref<400x32xf32, #tpu.memory_space<vmem>>, vector<400x32xf32>
    tpu.vector_store %arg4[%c0_7, %c0_8], %10 {strides = array<i32>} : memref<400x32xf32, #tpu.memory_space<vmem>>, vector<400x32xf32>,
    return
  }
  func.func @transform_0(%arg0: i32) -> (i32, i32) {
    %c0_i32 = arith.constant 0 : i32
    %c0_i32_0 = arith.constant 0 : i32
    return %arg0, %c0_i32 : i32, i32
  }
  func.func @transform_1(%arg0: i32) -> (i32, i32) {
    %c0_i32 = arith.constant 0 : i32
    %c0_i32_0 = arith.constant 0 : i32
    %c0_i32_1 = arith.constant 0 : i32
    return %c0_i32, %c0_i32_0 : i32, i32
  }
  func.func @transform_2(%arg0: i32) -> (i32, i32) {
    %c0_i32 = arith.constant 0 : i32
    %c0_i32_0 = arith.constant 0 : i32
    %c0_i32_1 = arith.constant 0 : i32
    return %c0_i32, %c0_i32_0 : i32, i32
  }
  func.func @transform_3(%arg0: i32) -> (i32, i32) {
    %c0_i32 = arith.constant 0 : i32
    %c0_i32_0 = arith.constant 0 : i32
    return %arg0, %c0_i32 : i32, i32
  }
}

module attributes {stable_mosaic.version = 11 : i64} {
  func.func @_dense_head_kernel(%arg0: i32, %arg1: memref<2x1280xf32, #tpu.memory_space<vmem>>, %arg2: memref<1280x128xf32, #tpu.memory_space<vmem>>, %arg3: memref<1x128xf32, #tpu.memory_space<vmem>>, %arg4: memref<128x128xf32, #tpu.memory_space<vmem>>, %arg5: memref<1x128xf32, #tpu.memory_space<vmem>>, %arg6: memref<128x1xf32, #tpu.memory_space<vmem>>, %arg7: memref<1x1xf32, #tpu.memory_space<vmem>>, %arg8: memref<2x1xf32, #tpu.memory_space<vmem>>, %arg9: memref<2x128xf32, #tpu.memory_space<vmem>>) attributes {dimension_semantics = [#tpu.dimension_semantics<arbitrary>], iteration_bounds = array<i64: 10>, scalar_prefetch = 0 : i64, scratch_operands = 1 : i64, tpu.core_type = #tpu.core_type<tc>, window_params = [{transform_indices = @transform_0, window_bounds = array<i64: 2, 1280>}, {transform_indices = @transform_1, window_bounds = array<i64: 1280, 128>}, {pipeline_mode = #tpu.pipeline_mode<synchronous>, transform_indices = @transform_2, window_bounds = array<i64: 1, 128>}, {pipeline_mode = #tpu.pipeline_mode<synchronous>, transform_indices = @transform_3, window_bounds = array<i64: 128, 128>}, {pipeline_mode = #tpu.pipeline_mode<synchronous>, transform_indices = @transform_4, window_bounds = array<i64: 1, 128>}, {pipeline_mode = #tpu.pipeline_mode<synchronous>, transform_indices = @transform_5, window_bounds = array<i64: 128, 1>}, {pipeline_mode = #tpu.pipeline_mode<synchronous>, transform_indices = @transform_6, window_bounds = array<i64: 1, 1>}, {pipeline_mode = #tpu.pipeline_mode<synchronous>, transform_indices = @transform_7, window_bounds = array<i64: 2, 1>}]} {
    %c0_i32 = arith.constant 0 : i32
    %0 = arith.cmpi eq, %arg0, %c0_i32 : i32
    %1 = arith.extui %0 : i1 to i32
    %c0_i32_0 = arith.constant 0 : i32
    %2 = arith.cmpi ne, %1, %c0_i32_0 : i32
    scf.if %2 {
      %cst_9 = arith.constant 0.000000e+00 : f32
      %12 = vector.broadcast %cst_9 : f32 to vector<2x128xf32>
      %c0_10 = arith.constant 0 : index
      %c0_11 = arith.constant 0 : index
      %13 = vector.load %arg9[%c0_10, %c0_11] : memref<2x128xf32, #tpu.memory_space<vmem>>, vector<2x128xf32>
      tpu.vector_store %arg9[%c0_10, %c0_11], %12 {strides = array<i32>} : memref<2x128xf32, #tpu.memory_space<vmem>>, vector<2x128xf32>,
    } else {
    }
    %c0 = arith.constant 0 : index
    %c0_1 = arith.constant 0 : index
    %3 = vector.load %arg9[%c0, %c0_1] : memref<2x128xf32, #tpu.memory_space<vmem>>, vector<2x128xf32>
    %c0_2 = arith.constant 0 : index
    %c0_3 = arith.constant 0 : index
    %4 = vector.load %arg1[%c0_2, %c0_3] : memref<2x1280xf32, #tpu.memory_space<vmem>>, vector<2x1280xf32>
    %c0_4 = arith.constant 0 : index
    %c0_5 = arith.constant 0 : index
    %5 = vector.load %arg2[%c0_4, %c0_5] : memref<1280x128xf32, #tpu.memory_space<vmem>>, vector<1280x128xf32>
    %cst = arith.constant dense<0.000000e+00> : vector<2x128xf32>
    %6 = tpu.matmul %4, %5, %cst {dimension_numbers = #tpu.dot_dimension_numbers<[1], [0], [0], [1], [0, 0, 1, 1], [], []>} : vector<2x1280xf32>, vector<1280x128xf32>, vector<2x128xf32> -> vector<2x128xf32>
    %7 = arith.addf %3, %6 : vector<2x128xf32>
    %c0_6 = arith.constant 0 : index
    %c0_7 = arith.constant 0 : index
    %8 = vector.load %arg9[%c0_6, %c0_7] : memref<2x128xf32, #tpu.memory_space<vmem>>, vector<2x128xf32>
    tpu.vector_store %arg9[%c0_6, %c0_7], %7 {strides = array<i32>} : memref<2x128xf32, #tpu.memory_space<vmem>>, vector<2x128xf32>,
    %c9_i32 = arith.constant 9 : i32
    %9 = arith.cmpi eq, %arg0, %c9_i32 : i32
    %10 = arith.extui %9 : i1 to i32
    %c0_i32_8 = arith.constant 0 : i32
    %11 = arith.cmpi ne, %10, %c0_i32_8 : i32
    scf.if %11 {
      %c0_9 = arith.constant 0 : index
      %c0_10 = arith.constant 0 : index
      %12 = vector.load %arg9[%c0_9, %c0_10] : memref<2x128xf32, #tpu.memory_space<vmem>>, vector<2x128xf32>
      %c0_11 = arith.constant 0 : index
      %c0_12 = arith.constant 0 : index
      %13 = vector.load %arg3[%c0_11, %c0_12] : memref<1x128xf32, #tpu.memory_space<vmem>>, vector<1x128xf32>
      %14 = vector.broadcast %13 : vector<1x128xf32> to vector<2x128xf32>
      %15 = arith.addf %12, %14 : vector<2x128xf32>
      %cst_13 = arith.constant 0.000000e+00 : f32
      %16 = vector.broadcast %cst_13 : f32 to vector<2x128xf32>
      %17 = arith.cmpf oge, %15, %16 : vector<2x128xf32>
      %cst_14 = arith.constant 0.00999999977 : f32
      %18 = vector.broadcast %cst_14 : f32 to vector<2x128xf32>
      %19 = arith.mulf %18, %15 : vector<2x128xf32>
      %20 = arith.select %17, %15, %19 : vector<2x128xi1>, vector<2x128xf32>
      %c0_15 = arith.constant 0 : index
      %c0_16 = arith.constant 0 : index
      %21 = vector.load %arg4[%c0_15, %c0_16] : memref<128x128xf32, #tpu.memory_space<vmem>>, vector<128x128xf32>
      %cst_17 = arith.constant dense<0.000000e+00> : vector<2x128xf32>
      %22 = tpu.matmul %20, %21, %cst_17 {dimension_numbers = #tpu.dot_dimension_numbers<[1], [0], [0], [1], [0, 0, 1, 1], [], []>} : vector<2x128xf32>, vector<128x128xf32>, vector<2x128xf32> -> vector<2x128xf32>
      %c0_18 = arith.constant 0 : index
      %c0_19 = arith.constant 0 : index
      %23 = vector.load %arg5[%c0_18, %c0_19] : memref<1x128xf32, #tpu.memory_space<vmem>>, vector<1x128xf32>
      %24 = vector.broadcast %23 : vector<1x128xf32> to vector<2x128xf32>
      %25 = arith.addf %22, %24 : vector<2x128xf32>
      %cst_20 = arith.constant 0.000000e+00 : f32
      %26 = vector.broadcast %cst_20 : f32 to vector<2x128xf32>
      %27 = arith.cmpf oge, %25, %26 : vector<2x128xf32>
      %cst_21 = arith.constant 0.00999999977 : f32
      %28 = vector.broadcast %cst_21 : f32 to vector<2x128xf32>
      %29 = arith.mulf %28, %25 : vector<2x128xf32>
      %30 = arith.select %27, %25, %29 : vector<2x128xi1>, vector<2x128xf32>
      %c0_22 = arith.constant 0 : index
      %c0_23 = arith.constant 0 : index
      %31 = vector.load %arg6[%c0_22, %c0_23] : memref<128x1xf32, #tpu.memory_space<vmem>>, vector<128x1xf32>
      %cst_24 = arith.constant dense<0.000000e+00> : vector<2x1xf32>
      %32 = tpu.matmul %30, %31, %cst_24 {dimension_numbers = #tpu.dot_dimension_numbers<[1], [0], [0], [1], [0, 0, 1, 1], [], []>} : vector<2x128xf32>, vector<128x1xf32>, vector<2x1xf32> -> vector<2x1xf32>
      %c0_25 = arith.constant 0 : index
      %c0_26 = arith.constant 0 : index
      %33 = vector.load %arg7[%c0_25, %c0_26] : memref<1x1xf32, #tpu.memory_space<vmem>>, vector<1x1xf32>
      %34 = vector.broadcast %33 : vector<1x1xf32> to vector<2x1xf32>
      %35 = arith.addf %32, %34 : vector<2x1xf32>
      %c0_27 = arith.constant 0 : index
      %c0_28 = arith.constant 0 : index
      %36 = vector.load %arg8[%c0_27, %c0_28] : memref<2x1xf32, #tpu.memory_space<vmem>>, vector<2x1xf32>
      tpu.vector_store %arg8[%c0_27, %c0_28], %35 {strides = array<i32>} : memref<2x1xf32, #tpu.memory_space<vmem>>, vector<2x1xf32>,
    } else {
    }
    return
  }
  func.func @transform_0(%arg0: i32) -> (i32, i32) {
    %c0_i32 = arith.constant 0 : i32
    %c0_i32_0 = arith.constant 0 : i32
    return %c0_i32, %arg0 : i32, i32
  }
  func.func @transform_1(%arg0: i32) -> (i32, i32) {
    %c0_i32 = arith.constant 0 : i32
    %c0_i32_0 = arith.constant 0 : i32
    return %arg0, %c0_i32 : i32, i32
  }
  func.func @transform_2(%arg0: i32) -> (i32, i32) {
    %c0_i32 = arith.constant 0 : i32
    %c0_i32_0 = arith.constant 0 : i32
    %c0_i32_1 = arith.constant 0 : i32
    return %c0_i32, %c0_i32_0 : i32, i32
  }
  func.func @transform_3(%arg0: i32) -> (i32, i32) {
    %c0_i32 = arith.constant 0 : i32
    %c0_i32_0 = arith.constant 0 : i32
    %c0_i32_1 = arith.constant 0 : i32
    return %c0_i32, %c0_i32_0 : i32, i32
  }
  func.func @transform_4(%arg0: i32) -> (i32, i32) {
    %c0_i32 = arith.constant 0 : i32
    %c0_i32_0 = arith.constant 0 : i32
    %c0_i32_1 = arith.constant 0 : i32
    return %c0_i32, %c0_i32_0 : i32, i32
  }
  func.func @transform_5(%arg0: i32) -> (i32, i32) {
    %c0_i32 = arith.constant 0 : i32
    %c0_i32_0 = arith.constant 0 : i32
    %c0_i32_1 = arith.constant 0 : i32
    return %c0_i32, %c0_i32_0 : i32, i32
  }
  func.func @transform_6(%arg0: i32) -> (i32, i32) {
    %c0_i32 = arith.constant 0 : i32
    %c0_i32_0 = arith.constant 0 : i32
    %c0_i32_1 = arith.constant 0 : i32
    return %c0_i32, %c0_i32_0 : i32, i32
  }
  func.func @transform_7(%arg0: i32) -> (i32, i32) {
    %c0_i32 = arith.constant 0 : i32
    %c0_i32_0 = arith.constant 0 : i32
    %c0_i32_1 = arith.constant 0 : i32
    return %c0_i32, %c0_i32_0 : i32, i32
  }
}

</mosaic_0001>

<bundles_post_ra>
// kernel: _forward_arrays.8
= control target key start
LH: loop header
LB: loop body
LE: loop exit
PB: predicated region body
PF: predicated region fallthrough
CT: control target
= control target key end

     0   :  { %s1212_s12 = smov 0   ;;  %s1507_s0 = inlined_call_operand.vmem [shape: f32[800,25], index: 0, kind: input, shape index: {}]   ;;  %s1508_s1 = inlined_call_operand.vmem [shape: f32[25,32], index: 1, kind: input, shape index: {}]   ;;  %s1509_s2 = inlined_call_operand.vmem [shape: f32[1,32], index: 2, kind: input, shape index: {}]   ;;  %s1510_s3 = inlined_call_operand.vmem [shape: f32[800,32], index: 3, kind: output, shape index: {}]  }
   0x1 LB: > { %s962_s13 = sadd.s32 4294967295, %s1189_s12   ;;  %p966_p0 = scmp.ge.s32.totalorder %s1189_s12, 1  ;;  %s1189_s12 = sphi %s1212_s12, %s13_s12  }
   0x2   : > { %p138_p1 = scmp.lt.s32.totalorder %s1189_s12, 3 }
   0x4   : > { %p139_p2 = pnand %p966_p0, %p138_p1 }
   0x5   : > { %v224_v0 = vld [vmem:[%s1508_s1] sm:$0xff] (!%p139_p2)  ;;  %v225_v1 = vld [vmem:[%s1508_s1 + $0x8] sm:$0xff] (!%p139_p2)  ;;  %v226_v2 = vld [vmem:[%s1508_s1 + $0x10] sm:$0xff] (!%p139_p2)  ;;  %vm386_vm0 = vcmask (!%p139_p2), 1040384   ;;  %s162_s20 = smul.u32 (!%p139_p2), 50, %s962_s13  ;;  %vm1191_vm1 = vmmov (!%p139_p2), 1  }
   0x6   : > { %142 = sbr.rel (%p139_p2) target bundleno = 287 (0x11f), region = 32  ;;  %v1160_v3 = vpack.c.bf16 (!%p139_p2), %v225_v1, %v224_v0  ;;  %v227_v4 = vld [vmem:[%s1508_s1 + $0x18] sm:$0x1] (!%p139_p2)  ;;  %vm1165_vm2 = vmpackc.low (!%p139_p2), %vm386_vm0, %vm1191_vm1  ;;  %vm235_vm3 = vcmask (!%p139_p2), 203776   ;;  %v1345_v56 = vld [vmem:[%s1509_s2] ss:$0 sm:$0xff] (!%p139_p2) }
   0x7   : > { %v1164_v5 = vpack.c.bf16 (!%p139_p2), %v227_v4, %v226_v2  ;;  %p163_p3 = scmp.lt.s32.totalorder (!%p139_p2), %s162_s20, 99  ;;  %vm855_vm4 = vcmask (!%p139_p2), 261120  }
   0x8   : > { %1161 = vmatprep.subr.bf16.mxu0 (!%p139_p2), %v1160_v3  ;;  %1170 = vmatprep.subr.bf16.mxu1 (!%p139_p2), %v1160_v3 }
   0x9   : > { %1163 = vmatpush3.bf16.msra.mxu0 (!%p139_p2), %v1160_v3  ;;  %1172 = vmatpush3.bf16.msra.mxu1 (!%p139_p2), %v1160_v3 }
   0xa   : > { %1166 = vmatprep.subr.msk.bf16.mxu0 (!%p139_p2), %vm1165_vm2, %v1164_v5  ;;  %1171 = vmatprep.subr.msk.bf16.mxu1 (!%p139_p2), %vm1165_vm2, %v1164_v5 }
   0xd   : > { %s1512_s20 = smov (!%p163_p3, %s162_s20), 99  ;;  %1169 = vmatpush3.bf16.msk.msra.mxu0 %vm1165_vm2, %v1164_v5  ;;  %1173 = vmatpush3.bf16.msk.msra.mxu1 %vm1165_vm2, %v1164_v5 }
   0xe   : > { %s967_s23 = sshll.u32 %s1512_s20, 3 }
   0xf   : > { %s1240_s26 = scalar_lea.vmem %s1507_s0, %s967_s23  ;;  %s1356_s4 = scalar_lea.vmem %s1510_s3, %s967_s23 }
  0x10   : > { %v174_v6 = vld [vmem:[%s1240_s26] sm:$0xff]  ;;  %v175_v7 = vld [vmem:[%s1240_s26 + $0x8] sm:$0xff]  ;;  %v200_v8 = vld [vmem:[%s1240_s26 + $0xd0] sm:$0xff] }
  0x11   : > { %1085 = vmatprep.mubr.msk.f32.mxu0 %vm235_vm3, %v174_v6  ;;  %1124 = vmatprep.mubr.msk.f32.mxu1 %vm235_vm3, %v200_v8  ;;  %v201_v9 = vld [vmem:[%s1240_s26 + $0xd8] sm:$0xff]  ;;  %v176_v10 = vld [vmem:[%s1240_s26 + $0x10] sm:$0xff]  ;;  %v202_v11 = vld [vmem:[%s1240_s26 + $0xe0] sm:$0xff] }
  0x12   : > { %1086 = vmatmul.mubr.msk.f32.vlgmr.msra.gmra.mrb[0].mxu0 %vm235_vm3, %v175_v7  ;;  %1125 = vmatmul.mubr.msk.f32.vlgmr.msra.gmra.mrb[0].mxu1 %vm235_vm3, %v201_v9  ;;  %v177_v12 = vld [vmem:[%s1240_s26 + $0x18] sm:$0xff]  ;;  %v203_v13 = vld [vmem:[%s1240_s26 + $0xe8] sm:$0xff]  ;;  %v178_v14 = vld [vmem:[%s1240_s26 + $0x20] sm:$0xff] }
  0x13   : > { %1088 = vmatprep.mubr.msk.f32.mxu0 %vm235_vm3, %v176_v10  ;;  %1127 = vmatprep.mubr.msk.f32.mxu1 %vm235_vm3, %v202_v11  ;;  %v204_v15 = vld [vmem:[%s1240_s26 + $0xf0] sm:$0xff]  ;;  %v179_v16 = vld [vmem:[%s1240_s26 + $0x28] sm:$0xff]  ;;  %v205_v17 = vld [vmem:[%s1240_s26 + $0xf8] sm:$0xff] }
  0x14   : > { %v180_v18 = vld [vmem:[%s1240_s26 + $0x30] sm:$0xff]  ;;  %v206_v19 = vld [vmem:[%s1240_s26 + $0x100] sm:$0xff]  ;;  %v181_v20 = vld [vmem:[%s1240_s26 + $0x38] sm:$0xff] }
  0x15   : > { %v207_v21 = vld [vmem:[%s1240_s26 + $0x108] sm:$0xff]  ;;  %v182_v22 = vld [vmem:[%s1240_s26 + $0x40] sm:$0xff]  ;;  %v208_v23 = vld [vmem:[%s1240_s26 + $0x110] sm:$0xff] }
  0x16   : > { %1089 = vmatmul.mubr.msk.f32.gmra.mrb[2].mxu0 %vm235_vm3, %v177_v12  ;;  %1128 = vmatmul.mubr.msk.f32.gmra.mrb[2].mxu1 %vm235_vm3, %v203_v13  ;;  %v183_v24 = vld [vmem:[%s1240_s26 + $0x48] sm:$0xff]  ;;  %v209_v25 = vld [vmem:[%s1240_s26 + $0x118] sm:$0xff]  ;;  %v184_v26 = vld [vmem:[%s1240_s26 + $0x50] sm:$0xff] }
  0x17   : > { %1091 = vmatprep.mubr.msk.f32.mxu0 %vm235_vm3, %v178_v14  ;;  %1130 = vmatprep.mubr.msk.f32.mxu1 %vm235_vm3, %v204_v15  ;;  %v210_v27 = vld [vmem:[%s1240_s26 + $0x120] sm:$0xff]  ;;  %v185_v28 = vld [vmem:[%s1240_s26 + $0x58] sm:$0xff]  ;;  %v211_v29 = vld [vmem:[%s1240_s26 + $0x128] sm:$0xff] }
  0x18   : > { %v186_v30 = vld [vmem:[%s1240_s26 + $0x60] sm:$0xff]  ;;  %v212_v31 = vld [vmem:[%s1240_s26 + $0x130] sm:$0xff]  ;;  %v187_v32 = vld [vmem:[%s1240_s26 + $0x68] sm:$0xff] }
  0x19   : > { %v213_v33 = vld [vmem:[%s1240_s26 + $0x138] sm:$0xff]  ;;  %v188_v34 = vld [vmem:[%s1240_s26 + $0x70] sm:$0xff]  ;;  %v214_v35 = vld [vmem:[%s1240_s26 + $0x140] sm:$0xff] }
  0x1a   : > { %1092 = vmatmul.mubr.msk.f32.gmra.mrb[4].mxu0 %vm235_vm3, %v179_v16  ;;  %1131 = vmatmul.mubr.msk.f32.gmra.mrb[4].mxu1 %vm235_vm3, %v205_v17  ;;  %v189_v36 = vld [vmem:[%s1240_s26 + $0x78] sm:$0xff]  ;;  %v215_v37 = vld [vmem:[%s1240_s26 + $0x148] sm:$0xff]  ;;  %v190_v38 = vld [vmem:[%s1240_s26 + $0x80] sm:$0xff] }
  0x1b   : > { %1094 = vmatprep.mubr.msk.f32.mxu0 %vm235_vm3, %v180_v18  ;;  %1133 = vmatprep.mubr.msk.f32.mxu1 %vm235_vm3, %v206_v19  ;;  %v216_v39 = vld [vmem:[%s1240_s26 + $0x150] sm:$0xff]  ;;  %v191_v40 = vld [vmem:[%s1240_s26 + $0x88] sm:$0xff]  ;;  %v217_v41 = vld [vmem:[%s1240_s26 + $0x158] sm:$0xff] }
  0x1c   : > { %v192_v42 = vld [vmem:[%s1240_s26 + $0x90] sm:$0xff]  ;;  %v218_v43 = vld [vmem:[%s1240_s26 + $0x160] sm:$0xff]  ;;  %v193_v44 = vld [vmem:[%s1240_s26 + $0x98] sm:$0xff] }
  0x1d   : > { %v219_v45 = vld [vmem:[%s1240_s26 + $0x168] sm:$0xff]  ;;  %v194_v46 = vld [vmem:[%s1240_s26 + $0xa0] sm:$0xff]  ;;  %v220_v47 = vld [vmem:[%s1240_s26 + $0x170] sm:$0xff] }
  0x1e   : > { %1095 = vmatmul.mubr.msk.f32.gmra.mrb[6].mxu0 %vm235_vm3, %v181_v20  ;;  %1134 = vmatmul.mubr.msk.f32.gmra.mrb[6].mxu1 %vm235_vm3, %v207_v21  ;;  %v195_v48 = vld [vmem:[%s1240_s26 + $0xa8] sm:$0xff]  ;;  %v221_v49 = vld [vmem:[%s1240_s26 + $0x178] sm:$0xff]  ;;  %v196_v50 = vld [vmem:[%s1240_s26 + $0xb0] sm:$0xff] }
  0x1f   : > { %1097 = vmatprep.mubr.msk.f32.mxu0 %vm235_vm3, %v182_v22  ;;  %1136 = vmatprep.mubr.msk.f32.mxu1 %vm235_vm3, %v208_v23  ;;  %v222_v51 = vld [vmem:[%s1240_s26 + $0x180] sm:$0xff]  ;;  %v197_v52 = vld [vmem:[%s1240_s26 + $0xb8] sm:$0xff]  ;;  %v223_v53 = vld [vmem:[%s1240_s26 + $0x188] sm:$0xff] }
  0x20   : > { %v198_v54 = vld [vmem:[%s1240_s26 + $0xc0] sm:$0xff]  ;;  %v199_v55 = vld [vmem:[%s1240_s26 + $0xc8] sm:$0xff] }
  0x22   : > { %1098 = vmatmul.mubr.msk.f32.gmra.mrb[8].mxu0 %vm235_vm3, %v183_v24  ;;  %1137 = vmatmul.mubr.msk.f32.gmra.mrb[8].mxu1 %vm235_vm3, %v209_v25 }
  0x23   : > { %1100 = vmatprep.mubr.msk.f32.mxu0 %vm235_vm3, %v184_v26  ;;  %1139 = vmatprep.mubr.msk.f32.mxu1 %vm235_vm3, %v210_v27 }
  0x26   : > { %1101 = vmatmul.mubr.msk.f32.gmra.mrb[10].mxu0 %vm235_vm3, %v185_v28  ;;  %1140 = vmatmul.mubr.msk.f32.gmra.mrb[10].mxu1 %vm235_vm3, %v211_v29 }
  0x27   : > { %1103 = vmatprep.mubr.msk.f32.mxu0 %vm235_vm3, %v186_v30  ;;  %1142 = vmatprep.mubr.msk.f32.mxu1 %vm235_vm3, %v212_v31 }
  0x2a   : > { %1104 = vmatmul.mubr.msk.f32.gmra.mrb[12].mxu0 %vm235_vm3, %v187_v32  ;;  %1143 = vmatmul.mubr.msk.f32.gmra.mrb[12].mxu1 %vm235_vm3, %v213_v33 }
  0x2b   : > { %1106 = vmatprep.mubr.msk.f32.mxu0 %vm235_vm3, %v188_v34  ;;  %1145 = vmatprep.mubr.msk.f32.mxu1 %vm235_vm3, %v214_v35 }
  0x2e   : > { %1107 = vmatmul.mubr.msk.f32.gmra.mrb[14].mxu0 %vm235_vm3, %v189_v36  ;;  %1146 = vmatmul.mubr.msk.f32.gmra.mrb[14].mxu1 %vm235_vm3, %v215_v37 }
  0x2f   : > { %1109 = vmatprep.mubr.msk.f32.mxu0 %vm235_vm3, %v190_v38  ;;  %1148 = vmatprep.mubr.msk.f32.mxu1 %vm235_vm3, %v216_v39 }
  0x32   : > { %1110 = vmatmul.mubr.msk.f32.gmra.mrb[16].mxu0 %vm235_vm3, %v191_v40  ;;  %1149 = vmatmul.mubr.msk.f32.gmra.mrb[16].mxu1 %vm235_vm3, %v217_v41 }
  0x33   : > { %1112 = vmatprep.mubr.msk.f32.mxu0 %vm235_vm3, %v192_v42  ;;  %1151 = vmatprep.mubr.msk.f32.mxu1 %vm235_vm3, %v218_v43 }
  0x36   : > { %1113 = vmatmul.mubr.msk.f32.gmra.mrb[18].mxu0 %vm235_vm3, %v193_v44  ;;  %1152 = vmatmul.mubr.msk.f32.gmra.mrb[18].mxu1 %vm235_vm3, %v219_v45 }
  0x37   : > { %1115 = vmatprep.mubr.msk.f32.mxu0 %vm235_vm3, %v194_v46  ;;  %1154 = vmatprep.mubr.msk.f32.mxu1 %vm235_vm3, %v220_v47 }
  0x3a   : > { %1116 = vmatmul.mubr.msk.f32.gmra.mrb[20].mxu0 %vm235_vm3, %v195_v48  ;;  %1155 = vmatmul.mubr.msk.f32.gmra.mrb[20].mxu1 %vm235_vm3, %v221_v49 }
  0x3b   : > { %1118 = vmatprep.mubr.msk.f32.mxu0 %vm235_vm3, %v196_v50  ;;  %1157 = vmatprep.mubr.msk.f32.mxu1 %vm235_vm3, %v222_v51 }
  0x3e   : > { %1119 = vmatmul.mubr.msk.f32.gmra.mrb[22].mxu0 %vm235_vm3, %v197_v52  ;;  %1158 = vmatmul.mubr.msk.f32.gmra.mrb[22].mxu1 %vm235_vm3, %v223_v53 }
  0x3f   : > { %1121 = vmatprep.mubr.msk.f32.mxu0 %vm235_vm3, %v198_v54 }
  0x42   : > { %1122 = vmatmul.mubr.msk.f32.gmra.mrb[24].mxu0 %vm235_vm3, %v199_v55 }
  0xe5   : > { %v1087_v57 = vpop.f32.mrb[0].mxu0  ;;  %v1126_v58 = vpop.f32.mrb[0].mxu1 }
  0xe6   : > { %v462_v59 = vadd.f32 %v1087_v57, %v1345_v56  ;;  %v456_v60 = vpop.f32.mrb[1].mxu0  ;;  %v592_v61 = vadd.f32 %v1126_v58, %v1345_v56  ;;  %v586_v62 = vpop.f32.mrb[1].mxu1 }
  0xe7   : > { %v457_v63 = vadd.f32 %v1345_v56, %v456_v60  ;;  %v587_v0 = vadd.f32 %v1345_v56, %v586_v62 }
  0xe8   : > { %vm706_vm5 = vcmp.ge.f32.partialorder %v462_v59, 0.0  ;;  %v756_v1 = vmul.f32 0.01, %v462_v59  ;;  %vm732_vm6 = vcmp.ge.f32.partialorder %v592_v61, 0.0  ;;  %v782_v2 = vmul.f32 0.01, %v592_v61 }
  0xe9   : > { %vm705_vm7 = vcmp.ge.f32.partialorder %v457_v63, 0.0  ;;  %v755_v3 = vmul.f32 0.01, %v457_v63  ;;  %vm731_vm8 = vcmp.ge.f32.partialorder %v587_v0, 0.0  ;;  %v781_v4 = vmul.f32 0.01, %v587_v0 }
  0xea   : > { %v806_v5 = vsel %vm706_vm5, %v462_v59, %v756_v1  ;;  %v832_v6 = vsel %vm732_vm6, %v592_v61, %v782_v2  ;;  %v1090_v7 = vpop.f32.mrb[2].mxu0  ;;  %v1129_v8 = vpop.f32.mrb[2].mxu1 }
  0xeb   : > { %857 = vst.msk [vmem:[%s1356_s4 + $0x8] sm:$0xff] %vm855_vm4, %v806_v5  ;;  %v805_v9 = vsel %vm705_vm7, %v457_v63, %v755_v3  ;;  %883 = vst.msk [vmem:[%s1356_s4 + $0xd8] sm:$0xff] %vm855_vm4, %v832_v6  ;;  %v831_v10 = vsel %vm731_vm8, %v587_v0, %v781_v4  ;;  %v472_v11 = vadd.f32 %v1090_v7, %v1345_v56  ;;  %v466_v12 = vpop.f32.mrb[3].mxu0  ;;  %v596_v14 = vpop.f32.mrb[3].mxu1 }
  0xec   : > { %v602_v13 = vadd.f32 %v1129_v8, %v1345_v56  ;;  %856 = vst.msk [vmem:[%s1356_s4] sm:$0xff] %vm855_vm4, %v805_v9  ;;  %882 = vst.msk [vmem:[%s1356_s4 + $0xd0] sm:$0xff] %vm855_vm4, %v831_v10  ;;  %v467_v15 = vadd.f32 %v1345_v56, %v466_v12  ;;  %v597_v16 = vadd.f32 %v1345_v56, %v596_v14 }
  0xed   : > { %vm708_vm9 = vcmp.ge.f32.partialorder %v472_v11, 0.0  ;;  %v758_v17 = vmul.f32 0.01, %v472_v11  ;;  %v1093_v23 = vpop.f32.mrb[4].mxu0  ;;  %v1132_v24 = vpop.f32.mrb[4].mxu1 }
  0xee   : > { %vm734_vm10 = vcmp.ge.f32.partialorder %v602_v13, 0.0  ;;  %v784_v18 = vmul.f32 0.01, %v602_v13  ;;  %vm707_vm11 = vcmp.ge.f32.partialorder %v467_v15, 0.0  ;;  %v757_v19 = vmul.f32 0.01, %v467_v15 }
  0xef   : > { %vm733_vm12 = vcmp.ge.f32.partialorder %v597_v16, 0.0  ;;  %v783_v20 = vmul.f32 0.01, %v597_v16  ;;  %v808_v21 = vsel %vm708_vm9, %v472_v11, %v758_v17  ;;  %v482_v27 = vadd.f32 %v1093_v23, %v1345_v56  ;;  %v476_v28 = vpop.f32.mrb[5].mxu0  ;;  %v606_v30 = vpop.f32.mrb[5].mxu1 }
  0xf0   : > { %v834_v22 = vsel %vm734_vm10, %v602_v13, %v784_v18  ;;  %859 = vst.msk [vmem:[%s1356_s4 + $0x18] sm:$0xff] %vm855_vm4, %v808_v21  ;;  %v807_v25 = vsel %vm707_vm11, %v467_v15, %v757_v19  ;;  %v612_v29 = vadd.f32 %v1132_v24, %v1345_v56  ;;  %v477_v31 = vadd.f32 %v1345_v56, %v476_v28 }
  0xf1   : > { %885 = vst.msk [vmem:[%s1356_s4 + $0xe8] sm:$0xff] %vm855_vm4, %v834_v22  ;;  %v833_v26 = vsel %vm733_vm12, %v597_v16, %v783_v20  ;;  %858 = vst.msk [vmem:[%s1356_s4 + $0x10] sm:$0xff] %vm855_vm4, %v807_v25  ;;  %v607_v32 = vadd.f32 %v1345_v56, %v606_v30  ;;  %v1096_v33 = vpop.f32.mrb[6].mxu0  ;;  %v1135_v34 = vpop.f32.mrb[6].mxu1  ;;  %vm710_vm13 = vcmp.ge.f32.partialorder %v482_v27, 0.0 }
  0xf2   : > { %884 = vst.msk [vmem:[%s1356_s4 + $0xe0] sm:$0xff] %vm855_vm4, %v833_v26  ;;  %v760_v35 = vmul.f32 0.01, %v482_v27  ;;  %vm736_vm14 = vcmp.ge.f32.partialorder %v612_v29, 0.0  ;;  %v786_v36 = vmul.f32 0.01, %v612_v29  ;;  %v492_v41 = vadd.f32 %v1096_v33, %v1345_v56 }
  0xf3   : > { %vm709_vm15 = vcmp.ge.f32.partialorder %v477_v31, 0.0  ;;  %v759_v37 = vmul.f32 0.01, %v477_v31  ;;  %vm735_vm0 = vcmp.ge.f32.partialorder %v607_v32, 0.0  ;;  %v785_v38 = vmul.f32 0.01, %v607_v32 }
  0xf4   : > { %v810_v39 = vsel %vm710_vm13, %v482_v27, %v760_v35  ;;  %v836_v40 = vsel %vm736_vm14, %v612_v29, %v786_v36  ;;  %v486_v42 = vpop.f32.mrb[7].mxu0  ;;  %v622_v43 = vadd.f32 %v1135_v34, %v1345_v56  ;;  %v616_v44 = vpop.f32.mrb[7].mxu1  ;;  %vm712_vm1 = vcmp.ge.f32.partialorder %v492_v41, 0.0 }
  0xf5   : > { %861 = vst.msk [vmem:[%s1356_s4 + $0x28] sm:$0xff] %vm855_vm4, %v810_v39  ;;  %v809_v45 = vsel %vm709_vm15, %v477_v31, %v759_v37  ;;  %887 = vst.msk [vmem:[%s1356_s4 + $0xf8] sm:$0xff] %vm855_vm4, %v836_v40  ;;  %v835_v46 = vsel %vm735_vm0, %v607_v32, %v785_v38  ;;  %v487_v47 = vadd.f32 %v1345_v56, %v486_v42  ;;  %v1099_v49 = vpop.f32.mrb[8].mxu0  ;;  %v1138_v50 = vpop.f32.mrb[8].mxu1  ;;  %v762_v51 = vmul.f32 0.01, %v492_v41 }
  0xf6   : > { %v617_v48 = vadd.f32 %v1345_v56, %v616_v44  ;;  %860 = vst.msk [vmem:[%s1356_s4 + $0x20] sm:$0xff] %vm855_vm4, %v809_v45  ;;  %886 = vst.msk [vmem:[%s1356_s4 + $0xf0] sm:$0xff] %vm855_vm4, %v835_v46  ;;  %vm738_vm2 = vcmp.ge.f32.partialorder %v622_v43, 0.0  ;;  %v788_v52 = vmul.f32 0.01, %v622_v43  ;;  %v502_v58 = vadd.f32 %v1099_v49, %v1345_v56  ;;  %v496_v59 = vpop.f32.mrb[9].mxu0 }
  0xf7   : > { %vm711_vm3 = vcmp.ge.f32.partialorder %v487_v47, 0.0  ;;  %v761_v53 = vmul.f32 0.01, %v487_v47  ;;  %v812_v55 = vsel %vm712_vm1, %v492_v41, %v762_v51  ;;  %v632_v60 = vadd.f32 %v1138_v50, %v1345_v56  ;;  %v626_v61 = vpop.f32.mrb[9].mxu1 }
  0xf8   : > { %vm737_vm5 = vcmp.ge.f32.partialorder %v617_v48, 0.0  ;;  %v787_v54 = vmul.f32 0.01, %v617_v48  ;;  %v838_v57 = vsel %vm738_vm2, %v622_v43, %v788_v52  ;;  %863 = vst.msk [vmem:[%s1356_s4 + $0x38] sm:$0xff] %vm855_vm4, %v812_v55  ;;  %v497_v0 = vadd.f32 %v1345_v56, %v496_v59 }
  0xf9   : > { %v811_v62 = vsel %vm711_vm3, %v487_v47, %v761_v53  ;;  %889 = vst.msk [vmem:[%s1356_s4 + $0x108] sm:$0xff] %vm855_vm4, %v838_v57  ;;  %v627_v1 = vadd.f32 %v1345_v56, %v626_v61  ;;  %v1102_v2 = vpop.f32.mrb[10].mxu0  ;;  %v1141_v3 = vpop.f32.mrb[10].mxu1  ;;  %vm714_vm6 = vcmp.ge.f32.partialorder %v502_v58, 0.0  ;;  %v764_v4 = vmul.f32 0.01, %v502_v58 }
  0xfa   : > { %v837_v63 = vsel %vm737_vm5, %v617_v48, %v787_v54  ;;  %862 = vst.msk [vmem:[%s1356_s4 + $0x30] sm:$0xff] %vm855_vm4, %v811_v62  ;;  %vm740_vm7 = vcmp.ge.f32.partialorder %v632_v60, 0.0  ;;  %v790_v5 = vmul.f32 0.01, %v632_v60  ;;  %vm713_vm8 = vcmp.ge.f32.partialorder %v497_v0, 0.0  ;;  %v506_v11 = vpop.f32.mrb[11].mxu0 }
  0xfb   : > { %888 = vst.msk [vmem:[%s1356_s4 + $0x100] sm:$0xff] %vm855_vm4, %v837_v63  ;;  %v763_v6 = vmul.f32 0.01, %v497_v0  ;;  %vm739_vm9 = vcmp.ge.f32.partialorder %v627_v1, 0.0  ;;  %v789_v7 = vmul.f32 0.01, %v627_v1  ;;  %v814_v8 = vsel %vm714_vm6, %v502_v58, %v764_v4 }
  0xfc   : > { %v840_v9 = vsel %vm740_vm7, %v632_v60, %v790_v5  ;;  %v512_v10 = vadd.f32 %v1102_v2, %v1345_v56  ;;  %v642_v12 = vadd.f32 %v1141_v3, %v1345_v56  ;;  %v636_v13 = vpop.f32.mrb[11].mxu1  ;;  %865 = vst.msk [vmem:[%s1356_s4 + $0x48] sm:$0xff] %vm855_vm4, %v814_v8  ;;  %v507_v16 = vadd.f32 %v1345_v56, %v506_v11 }
  0xfd   : > { %v813_v14 = vsel %vm713_vm8, %v497_v0, %v763_v6  ;;  %891 = vst.msk [vmem:[%s1356_s4 + $0x118] sm:$0xff] %vm855_vm4, %v840_v9  ;;  %v839_v15 = vsel %vm739_vm9, %v627_v1, %v789_v7  ;;  %v637_v17 = vadd.f32 %v1345_v56, %v636_v13  ;;  %v1105_v18 = vpop.f32.mrb[12].mxu0  ;;  %v1144_v19 = vpop.f32.mrb[12].mxu1 }
  0xfe   : > { %864 = vst.msk [vmem:[%s1356_s4 + $0x40] sm:$0xff] %vm855_vm4, %v813_v14  ;;  %890 = vst.msk [vmem:[%s1356_s4 + $0x110] sm:$0xff] %vm855_vm4, %v839_v15  ;;  %vm716_vm10 = vcmp.ge.f32.partialorder %v512_v10, 0.0  ;;  %v766_v20 = vmul.f32 0.01, %v512_v10  ;;  %vm742_vm11 = vcmp.ge.f32.partialorder %v642_v12, 0.0  ;;  %v522_v26 = vadd.f32 %v1105_v18, %v1345_v56 }
  0xff   : > { %v792_v21 = vmul.f32 0.01, %v642_v12  ;;  %vm715_vm12 = vcmp.ge.f32.partialorder %v507_v16, 0.0  ;;  %v765_v22 = vmul.f32 0.01, %v507_v16  ;;  %vm741_vm13 = vcmp.ge.f32.partialorder %v637_v17, 0.0 }
 0x100   : > { %v791_v23 = vmul.f32 0.01, %v637_v17  ;;  %v816_v24 = vsel %vm716_vm10, %v512_v10, %v766_v20  ;;  %v516_v27 = vpop.f32.mrb[13].mxu0  ;;  %v652_v28 = vadd.f32 %v1144_v19, %v1345_v56  ;;  %v646_v29 = vpop.f32.mrb[13].mxu1  ;;  %vm718_vm14 = vcmp.ge.f32.partialorder %v522_v26, 0.0 }
 0x101   : > { %v842_v25 = vsel %vm742_vm11, %v642_v12, %v792_v21  ;;  %867 = vst.msk [vmem:[%s1356_s4 + $0x58] sm:$0xff] %vm855_vm4, %v816_v24  ;;  %v815_v30 = vsel %vm715_vm12, %v507_v16, %v765_v22  ;;  %v517_v32 = vadd.f32 %v1345_v56, %v516_v27  ;;  %v647_v33 = vadd.f32 %v1345_v56, %v646_v29  ;;  %v1108_v34 = vpop.f32.mrb[14].mxu0  ;;  %v1147_v35 = vpop.f32.mrb[14].mxu1 }
 0x102   : > { %893 = vst.msk [vmem:[%s1356_s4 + $0x128] sm:$0xff] %vm855_vm4, %v842_v25  ;;  %v841_v31 = vsel %vm741_vm13, %v637_v17, %v791_v23  ;;  %866 = vst.msk [vmem:[%s1356_s4 + $0x50] sm:$0xff] %vm855_vm4, %v815_v30  ;;  %v768_v36 = vmul.f32 0.01, %v522_v26  ;;  %vm744_vm15 = vcmp.ge.f32.partialorder %v652_v28, 0.0  ;;  %v532_v42 = vadd.f32 %v1108_v34, %v1345_v56  ;;  %v526_v43 = vpop.f32.mrb[15].mxu0 }
 0x103   : > { %892 = vst.msk [vmem:[%s1356_s4 + $0x120] sm:$0xff] %vm855_vm4, %v841_v31  ;;  %v794_v37 = vmul.f32 0.01, %v652_v28  ;;  %vm717_vm0 = vcmp.ge.f32.partialorder %v517_v32, 0.0  ;;  %v767_v38 = vmul.f32 0.01, %v517_v32  ;;  %v662_v44 = vadd.f32 %v1147_v35, %v1345_v56 }
 0x104   : > { %vm743_vm1 = vcmp.ge.f32.partialorder %v647_v33, 0.0  ;;  %v793_v39 = vmul.f32 0.01, %v647_v33  ;;  %v818_v40 = vsel %vm718_vm14, %v522_v26, %v768_v36  ;;  %v656_v45 = vpop.f32.mrb[15].mxu1  ;;  %v527_v48 = vadd.f32 %v1345_v56, %v526_v43 }
 0x105   : > { %v844_v41 = vsel %vm744_vm15, %v652_v28, %v794_v37  ;;  %869 = vst.msk [vmem:[%s1356_s4 + $0x68] sm:$0xff] %vm855_vm4, %v818_v40  ;;  %v817_v46 = vsel %vm717_vm0, %v517_v32, %v767_v38  ;;  %v657_v49 = vadd.f32 %v1345_v56, %v656_v45  ;;  %v1111_v50 = vpop.f32.mrb[16].mxu0  ;;  %v1150_v51 = vpop.f32.mrb[16].mxu1  ;;  %vm720_vm2 = vcmp.ge.f32.partialorder %v532_v42, 0.0 }
 0x106   : > { %895 = vst.msk [vmem:[%s1356_s4 + $0x138] sm:$0xff] %vm855_vm4, %v844_v41  ;;  %v843_v47 = vsel %vm743_vm1, %v647_v33, %v793_v39  ;;  %868 = vst.msk [vmem:[%s1356_s4 + $0x60] sm:$0xff] %vm855_vm4, %v817_v46  ;;  %v770_v52 = vmul.f32 0.01, %v532_v42  ;;  %vm746_vm3 = vcmp.ge.f32.partialorder %v662_v44, 0.0  ;;  %vm719_vm5 = vcmp.ge.f32.partialorder %v527_v48, 0.0 }
 0x107   : > { %894 = vst.msk [vmem:[%s1356_s4 + $0x130] sm:$0xff] %vm855_vm4, %v843_v47  ;;  %v796_v53 = vmul.f32 0.01, %v662_v44  ;;  %v769_v54 = vmul.f32 0.01, %v527_v48  ;;  %vm745_vm6 = vcmp.ge.f32.partialorder %v657_v49, 0.0  ;;  %v542_v59 = vadd.f32 %v1111_v50, %v1345_v56 }
 0x108   : > { %v795_v55 = vmul.f32 0.01, %v657_v49  ;;  %v820_v57 = vsel %vm720_vm2, %v532_v42, %v770_v52  ;;  %v536_v60 = vpop.f32.mrb[17].mxu0  ;;  %v672_v61 = vadd.f32 %v1150_v51, %v1345_v56  ;;  %v666_v62 = vpop.f32.mrb[17].mxu1 }
 0x109   : > { %v846_v58 = vsel %vm746_vm3, %v662_v44, %v796_v53  ;;  %871 = vst.msk [vmem:[%s1356_s4 + $0x78] sm:$0xff] %vm855_vm4, %v820_v57  ;;  %v819_v63 = vsel %vm719_vm5, %v527_v48, %v769_v54  ;;  %v537_v1 = vadd.f32 %v1345_v56, %v536_v60  ;;  %v667_v2 = vadd.f32 %v1345_v56, %v666_v62  ;;  %v1114_v3 = vpop.f32.mrb[18].mxu0  ;;  %v1153_v4 = vpop.f32.mrb[18].mxu1 }
 0x10a   : > { %897 = vst.msk [vmem:[%s1356_s4 + $0x148] sm:$0xff] %vm855_vm4, %v846_v58  ;;  %v845_v0 = vsel %vm745_vm6, %v657_v49, %v795_v55  ;;  %870 = vst.msk [vmem:[%s1356_s4 + $0x70] sm:$0xff] %vm855_vm4, %v819_v63  ;;  %vm722_vm7 = vcmp.ge.f32.partialorder %v542_v59, 0.0  ;;  %v772_v5 = vmul.f32 0.01, %v542_v59  ;;  %vm748_vm8 = vcmp.ge.f32.partialorder %v672_v61, 0.0 }
 0x10b   : > { %896 = vst.msk [vmem:[%s1356_s4 + $0x140] sm:$0xff] %vm855_vm4, %v845_v0  ;;  %v798_v6 = vmul.f32 0.01, %v672_v61  ;;  %vm721_vm9 = vcmp.ge.f32.partialorder %v537_v1, 0.0  ;;  %v771_v7 = vmul.f32 0.01, %v537_v1  ;;  %v552_v11 = vadd.f32 %v1114_v3, %v1345_v56 }
 0x10c   : > { %vm747_vm10 = vcmp.ge.f32.partialorder %v667_v2, 0.0  ;;  %v797_v8 = vmul.f32 0.01, %v667_v2  ;;  %v822_v9 = vsel %vm722_vm7, %v542_v59, %v772_v5  ;;  %v546_v12 = vpop.f32.mrb[19].mxu0  ;;  %v682_v13 = vadd.f32 %v1153_v4, %v1345_v56  ;;  %v676_v14 = vpop.f32.mrb[19].mxu1 }
 0x10d   : > { %v848_v10 = vsel %vm748_vm8, %v672_v61, %v798_v6  ;;  %873 = vst.msk [vmem:[%s1356_s4 + $0x88] sm:$0xff] %vm855_vm4, %v822_v9  ;;  %v821_v15 = vsel %vm721_vm9, %v537_v1, %v771_v7  ;;  %v547_v17 = vadd.f32 %v1345_v56, %v546_v12  ;;  %v677_v18 = vadd.f32 %v1345_v56, %v676_v14  ;;  %v1117_v19 = vpop.f32.mrb[20].mxu0  ;;  %v1156_v20 = vpop.f32.mrb[20].mxu1 }
 0x10e   : > { %899 = vst.msk [vmem:[%s1356_s4 + $0x158] sm:$0xff] %vm855_vm4, %v848_v10  ;;  %v847_v16 = vsel %vm747_vm10, %v667_v2, %v797_v8  ;;  %872 = vst.msk [vmem:[%s1356_s4 + $0x80] sm:$0xff] %vm855_vm4, %v821_v15  ;;  %vm724_vm11 = vcmp.ge.f32.partialorder %v552_v11, 0.0  ;;  %v774_v21 = vmul.f32 0.01, %v552_v11  ;;  %vm750_vm12 = vcmp.ge.f32.partialorder %v682_v13, 0.0 }
 0x10f   : > { %898 = vst.msk [vmem:[%s1356_s4 + $0x150] sm:$0xff] %vm855_vm4, %v847_v16  ;;  %v800_v22 = vmul.f32 0.01, %v682_v13  ;;  %vm723_vm13 = vcmp.ge.f32.partialorder %v547_v17, 0.0  ;;  %v773_v23 = vmul.f32 0.01, %v547_v17  ;;  %v562_v27 = vadd.f32 %v1117_v19, %v1345_v56 }
 0x110   : > { %vm749_vm14 = vcmp.ge.f32.partialorder %v677_v18, 0.0  ;;  %v799_v24 = vmul.f32 0.01, %v677_v18  ;;  %v824_v25 = vsel %vm724_vm11, %v552_v11, %v774_v21  ;;  %v556_v28 = vpop.f32.mrb[21].mxu0  ;;  %v692_v29 = vadd.f32 %v1156_v20, %v1345_v56  ;;  %v686_v30 = vpop.f32.mrb[21].mxu1 }
 0x111   : > { %v850_v26 = vsel %vm750_vm12, %v682_v13, %v800_v22  ;;  %875 = vst.msk [vmem:[%s1356_s4 + $0x98] sm:$0xff] %vm855_vm4, %v824_v25  ;;  %v823_v31 = vsel %vm723_vm13, %v547_v17, %v773_v23  ;;  %v557_v33 = vadd.f32 %v1345_v56, %v556_v28  ;;  %v687_v34 = vadd.f32 %v1345_v56, %v686_v30  ;;  %v1120_v35 = vpop.f32.mrb[22].mxu0  ;;  %v1159_v36 = vpop.f32.mrb[22].mxu1 }
 0x112   : > { %901 = vst.msk [vmem:[%s1356_s4 + $0x168] sm:$0xff] %vm855_vm4, %v850_v26  ;;  %v849_v32 = vsel %vm749_vm14, %v677_v18, %v799_v24  ;;  %874 = vst.msk [vmem:[%s1356_s4 + $0x90] sm:$0xff] %vm855_vm4, %v823_v31  ;;  %vm726_vm15 = vcmp.ge.f32.partialorder %v562_v27, 0.0  ;;  %v776_v37 = vmul.f32 0.01, %v562_v27  ;;  %vm752_vm0 = vcmp.ge.f32.partialorder %v692_v29, 0.0 }
 0x113   : > { %900 = vst.msk [vmem:[%s1356_s4 + $0x160] sm:$0xff] %vm855_vm4, %v849_v32  ;;  %v802_v38 = vmul.f32 0.01, %v692_v29  ;;  %vm725_vm1 = vcmp.ge.f32.partialorder %v557_v33, 0.0  ;;  %v775_v39 = vmul.f32 0.01, %v557_v33  ;;  %v572_v43 = vadd.f32 %v1120_v35, %v1345_v56 }
 0x114   : > { %vm751_vm2 = vcmp.ge.f32.partialorder %v687_v34, 0.0  ;;  %v801_v40 = vmul.f32 0.01, %v687_v34  ;;  %v826_v41 = vsel %vm726_vm15, %v562_v27, %v776_v37  ;;  %v566_v44 = vpop.f32.mrb[23].mxu0  ;;  %v702_v45 = vadd.f32 %v1159_v36, %v1345_v56  ;;  %v696_v46 = vpop.f32.mrb[23].mxu1 }
 0x115   : > { %v852_v42 = vsel %vm752_vm0, %v692_v29, %v802_v38  ;;  %877 = vst.msk [vmem:[%s1356_s4 + $0xa8] sm:$0xff] %vm855_vm4, %v826_v41  ;;  %v825_v47 = vsel %vm725_vm1, %v557_v33, %v775_v39  ;;  %v567_v49 = vadd.f32 %v1345_v56, %v566_v44  ;;  %v697_v50 = vadd.f32 %v1345_v56, %v696_v46  ;;  %v1123_v51 = vpop.f32.mrb[24].mxu0 }
 0x116   : > { %903 = vst.msk [vmem:[%s1356_s4 + $0x178] sm:$0xff] %vm855_vm4, %v852_v42  ;;  %v851_v48 = vsel %vm751_vm2, %v687_v34, %v801_v40  ;;  %876 = vst.msk [vmem:[%s1356_s4 + $0xa0] sm:$0xff] %vm855_vm4, %v825_v47  ;;  %vm728_vm3 = vcmp.ge.f32.partialorder %v572_v43, 0.0  ;;  %v778_v52 = vmul.f32 0.01, %v572_v43  ;;  %vm754_vm5 = vcmp.ge.f32.partialorder %v702_v45, 0.0 }
 0x117   : > { %902 = vst.msk [vmem:[%s1356_s4 + $0x170] sm:$0xff] %vm855_vm4, %v851_v48  ;;  %v804_v53 = vmul.f32 0.01, %v702_v45  ;;  %vm727_vm6 = vcmp.ge.f32.partialorder %v567_v49, 0.0  ;;  %v777_v54 = vmul.f32 0.01, %v567_v49  ;;  %v582_v59 = vadd.f32 %v1123_v51, %v1345_v56 }
 0x118   : > { %vm753_vm7 = vcmp.ge.f32.partialorder %v697_v50, 0.0  ;;  %v803_v55 = vmul.f32 0.01, %v697_v50  ;;  %v828_v57 = vsel %vm728_vm3, %v572_v43, %v778_v52  ;;  %v576_v60 = vpop.f32.mrb[25].mxu0 }
 0x119   : > { %v854_v58 = vsel %vm754_vm5, %v702_v45, %v804_v53  ;;  %879 = vst.msk [vmem:[%s1356_s4 + $0xb8] sm:$0xff] %vm855_vm4, %v828_v57  ;;  %v827_v61 = vsel %vm727_vm6, %v567_v49, %v777_v54  ;;  %v577_v63 = vadd.f32 %v1345_v56, %v576_v60  ;;  %vm730_vm8 = vcmp.ge.f32.partialorder %v582_v59, 0.0 }
 0x11a   : > { %905 = vst.msk [vmem:[%s1356_s4 + $0x188] sm:$0xff] %vm855_vm4, %v854_v58  ;;  %v853_v62 = vsel %vm753_vm7, %v697_v50, %v803_v55  ;;  %878 = vst.msk [vmem:[%s1356_s4 + $0xb0] sm:$0xff] %vm855_vm4, %v827_v61  ;;  %v780_v0 = vmul.f32 0.01, %v582_v59 }
 0x11b   : > { %904 = vst.msk [vmem:[%s1356_s4 + $0x180] sm:$0xff] %vm855_vm4, %v853_v62  ;;  %vm729_vm9 = vcmp.ge.f32.partialorder %v577_v63, 0.0  ;;  %v779_v1 = vmul.f32 0.01, %v577_v63 }
 0x11c   : > { %v830_v2 = vsel %vm730_vm8, %v582_v59, %v780_v0 }
 0x11d   : > { %881 = vst.msk [vmem:[%s1356_s4 + $0xc8] sm:$0xff] %vm855_vm4, %v830_v2  ;;  %v829_v3 = vsel %vm729_vm9, %v577_v63, %v779_v1 }
 0x11e   : > { %880 = vst.msk [vmem:[%s1356_s4 + $0xc0] sm:$0xff] %vm855_vm4, %v829_v3 }
 0x11f PF: > { %s13_s12 = sadd.s32 1, %s1189_s12  }
 0x120   : > { %p10_p4 = scmp.ge.s32.totalorder %s13_s12, 4  }
 0x122   :  { %12 = sbr.rel (!%p10_p4) target bundleno = 1 (0x1), region = 62 }

// kernel: _forward_arrays.9
= control target key start
LH: loop header
LB: loop body
LE: loop exit
PB: predicated region body
PF: predicated region fallthrough
CT: control target
= control target key end

     0   :  { %s1731_s12 = smov 0   ;;  %s2326_s0 = inlined_call_operand.vmem [shape: f32[800,288], index: 0, kind: input, shape index: {}]   ;;  %s2327_s1 = inlined_call_operand.vmem [shape: f32[288,32], index: 1, kind: input, shape index: {}]   ;;  %s2328_s2 = inlined_call_operand.vmem [shape: f32[1,32], index: 2, kind: input, shape index: {}]   ;;  %s2329_s3 = inlined_call_operand.vmem [shape: f32[800,32], index: 3, kind: output, shape index: {}]  }
   0x1 LB: > { %s1407_s13 = sadd.s32 4294967295, %s1708_s12   ;;  %p1411_p0 = scmp.ge.s32.totalorder %s1708_s12, 1  ;;  %s1708_s12 = sphi %s1731_s12, %s13_s12  }
   0x2   : > { %p139_p1 = scmp.lt.s32.totalorder %s1708_s12, 3 }
   0x4   : > { %p140_p2 = pnand %p1411_p0, %p139_p1 }
   0x5   : > { %v327_v0 = vld [vmem:[%s2327_s1] sm:$0xff] (!%p140_p2)  ;;  %v328_v1 = vld [vmem:[%s2327_s1 + $0x8] sm:$0xff] (!%p140_p2)  ;;  %v329_v2 = vld [vmem:[%s2327_s1 + $0x10] sm:$0xff] (!%p140_p2)  ;;  %s164_s20 = smul.u32 (!%p140_p2), 50, %s1407_s13  ;;  %v1710_v3 = vmov (!%p140_p2), 0.0|0.0   ;;  %vm370_vm0 = vcmask (!%p140_p2), 261120  }
   0x6   : > { %143 = sbr.rel (%p140_p2) target bundleno = 439 (0x1b7), region = 32  ;;  %1604 = vmatprep.subr.bf16.mxu0 (!%p140_p2), %v1710_v3  ;;  %1660 = vmatprep.subr.bf16.mxu1 (!%p140_p2), %v1710_v3  ;;  %v1605_v4 = vpack.c.bf16 (!%p140_p2), %v328_v1, %v327_v0  ;;  %v330_v5 = vld [vmem:[%s2327_s1 + $0x18] sm:$0xff] (!%p140_p2)  ;;  %v331_v7 = vld [vmem:[%s2327_s1 + $0x20] sm:$0xff] (!%p140_p2)  ;;  %v332_v8 = vld [vmem:[%s2327_s1 + $0x28] sm:$0xff] (!%p140_p2) }
   0x7   : > { %p165_p3 = scmp.lt.s32.totalorder (!%p140_p2), %s164_s20, 99  ;;  %v1608_v6 = vpack.c.bf16 (!%p140_p2), %v330_v5, %v329_v2  ;;  %v1611_v9 = vpack.c.bf16 (!%p140_p2), %v332_v8, %v331_v7  ;;  %v333_v10 = vld [vmem:[%s2327_s1 + $0x30] sm:$0xff] (!%p140_p2)  ;;  %v334_v11 = vld [vmem:[%s2327_s1 + $0x38] sm:$0xff] (!%p140_p2)  ;;  %v335_v15 = vld [vmem:[%s2327_s1 + $0x40] sm:$0xff] (!%p140_p2) }
   0x8   : > { %1606 = vmatpush1.bf16.msra.mxu0 (!%p140_p2), %v1605_v4  ;;  %1676 = vmatpush1.bf16.msra.mxu1 (!%p140_p2), %v1605_v4  ;;  %v1614_v13 = vpack.c.bf16 (!%p140_p2), %v334_v11, %v333_v10  ;;  %v336_v16 = vld [vmem:[%s2327_s1 + $0x48] sm:$0xff] (!%p140_p2)  ;;  %v337_v18 = vld [vmem:[%s2327_s1 + $0x50] sm:$0xff] (!%p140_p2)  ;;  %v338_v19 = vld [vmem:[%s2327_s1 + $0x58] sm:$0xff] (!%p140_p2) }
   0x9   : > { %1607 = vmatprep.subr.bf16.mxu0 (!%p140_p2), %v1710_v3  ;;  %1661 = vmatprep.subr.bf16.mxu1 (!%p140_p2), %v1710_v3  ;;  %v1617_v17 = vpack.c.bf16 (!%p140_p2), %v336_v16, %v335_v15  ;;  %v1620_v20 = vpack.c.bf16 (!%p140_p2), %v338_v19, %v337_v18  ;;  %v339_v21 = vld [vmem:[%s2327_s1 + $0x60] sm:$0xff] (!%p140_p2)  ;;  %v340_v22 = vld [vmem:[%s2327_s1 + $0x68] sm:$0xff] (!%p140_p2)  ;;  %v341_v24 = vld [vmem:[%s2327_s1 + $0x70] sm:$0xff] (!%p140_p2) }
   0xa   : > { %v1623_v23 = vpack.c.bf16 (!%p140_p2), %v340_v22, %v339_v21  ;;  %v342_v25 = vld [vmem:[%s2327_s1 + $0x78] sm:$0xff] (!%p140_p2)  ;;  %v343_v27 = vld [vmem:[%s2327_s1 + $0x80] sm:$0xff] (!%p140_p2)  ;;  %v344_v28 = vld [vmem:[%s2327_s1 + $0x88] sm:$0xff] (!%p140_p2) }
   0xb   : > { %v1626_v26 = vpack.c.bf16 (!%p140_p2), %v342_v25, %v341_v24  ;;  %v1629_v29 = vpack.c.bf16 (!%p140_p2), %v344_v28, %v343_v27  ;;  %v345_v30 = vld [vmem:[%s2327_s1 + $0x90] sm:$0xff] (!%p140_p2)  ;;  %v346_v31 = vld [vmem:[%s2327_s1 + $0x98] sm:$0xff] (!%p140_p2)  ;;  %v347_v33 = vld [vmem:[%s2327_s1 + $0xa0] sm:$0xff] (!%p140_p2) }
   0xc   : > { %1609 = vmatpush1.bf16.msra.mxu0 (!%p140_p2), %v1608_v6  ;;  %1677 = vmatpush1.bf16.msra.mxu1 (!%p140_p2), %v1608_v6  ;;  %v1632_v32 = vpack.c.bf16 (!%p140_p2), %v346_v31, %v345_v30  ;;  %v348_v34 = vld [vmem:[%s2327_s1 + $0xa8] sm:$0xff] (!%p140_p2)  ;;  %v349_v36 = vld [vmem:[%s2327_s1 + $0xb0] sm:$0xff] (!%p140_p2)  ;;  %v350_v37 = vld [vmem:[%s2327_s1 + $0xb8] sm:$0xff] (!%p140_p2) }
   0xd   : > { %s2331_s20 = smov (!%p165_p3, %s164_s20), 99  ;;  %1610 = vmatprep.subr.bf16.mxu0 %v1710_v3  ;;  %1662 = vmatprep.subr.bf16.mxu1 %v1710_v3  ;;  %v1635_v35 = vpack.c.bf16 %v348_v34, %v347_v33  ;;  %v1638_v38 = vpack.c.bf16 %v350_v37, %v349_v36  ;;  %v351_v39 = vld [vmem:[%s2327_s1 + $0xc0] sm:$0xff]  ;;  %v352_v40 = vld [vmem:[%s2327_s1 + $0xc8] sm:$0xff]  ;;  %v353_v42 = vld [vmem:[%s2327_s1 + $0xd0] sm:$0xff] }
   0xe   : > { %s1692_s27 = smul.u32 24, %s2331_s20  ;;  %v1641_v41 = vpack.c.bf16 %v352_v40, %v351_v39  ;;  %v354_v43 = vld [vmem:[%s2327_s1 + $0xd8] sm:$0xff]  ;;  %v355_v45 = vld [vmem:[%s2327_s1 + $0xe0] sm:$0xff]  ;;  %v356_v46 = vld [vmem:[%s2327_s1 + $0xe8] sm:$0xff]  ;;  %s1413_s18 = sshll.u32 %s2331_s20, 3 }
   0xf   : > { %v1644_v44 = vpack.c.bf16 %v354_v43, %v353_v42  ;;  %v1647_v47 = vpack.c.bf16 %v356_v46, %v355_v45  ;;  %v357_v48 = vld [vmem:[%s2327_s1 + $0xf0] sm:$0xff]  ;;  %v358_v49 = vld [vmem:[%s2327_s1 + $0xf8] sm:$0xff]  ;;  %v359_v50 = vld [vmem:[%s2327_s1 + $0x100] sm:$0xff]  ;;  %s2135_s22 = scalar_lea.vmem %s2329_s3, %s1413_s18 }
  0x10   : > { %s1775_s7 = scalar_lea.vmem %s2326_s0, %s1692_s27  ;;  %1612 = vmatpush1.bf16.msra.mxu0 %v1611_v9  ;;  %1678 = vmatpush1.bf16.msra.mxu1 %v1611_v9  ;;  %v360_v51 = vld [vmem:[%s2327_s1 + $0x108] sm:$0xff]  ;;  %v1650_v52 = vpack.c.bf16 %v358_v49, %v357_v48  ;;  %v361_v54 = vld [vmem:[%s2327_s1 + $0x110] sm:$0xff]  ;;  %v362_v55 = vld [vmem:[%s2327_s1 + $0x118] sm:$0xff] }
  0x11   : > { %v178_v12 = vld [vmem:[%s1775_s7 + $0x8] sm:$0xff]  ;;  %v292_v14 = vld [vmem:[%s1775_s7 + $0x398] sm:$0xff]  ;;  %1613 = vmatprep.subr.bf16.mxu0 %v1710_v3  ;;  %1663 = vmatprep.subr.bf16.mxu1 %v1710_v3  ;;  %v1652_v53 = vpack.c.bf16 %v360_v51, %v359_v50  ;;  %v177_v56 = vld [vmem:[%s1775_s7] sm:$0xff]  ;;  %v1656_v60 = vpack.c.bf16 %v362_v55, %v361_v54 }
  0x12   : > { %585 = vmatprep.mubr.f32.mxu0 %v178_v12  ;;  %775 = vmatprep.mubr.f32.mxu1 %v292_v14  ;;  %v291_v57 = vld [vmem:[%s1775_s7 + $0x390] sm:$0xff]  ;;  %v181_v58 = vld [vmem:[%s1775_s7 + $0x20] sm:$0xff]  ;;  %v180_v61 = vld [vmem:[%s1775_s7 + $0x18] sm:$0xff] }
  0x13   : > { %v295_v59 = vld [vmem:[%s1775_s7 + $0x3b0] sm:$0xff]  ;;  %v294_v62 = vld [vmem:[%s1775_s7 + $0x3a8] sm:$0xff]  ;;  %v184_v63 = vld [vmem:[%s1775_s7 + $0x38] sm:$0xff] }
  0x14   : > { %1615 = vmatpush1.bf16.msra.mxu0 %v1614_v13  ;;  %1679 = vmatpush1.bf16.msra.mxu1 %v1614_v13  ;;  %v298_v0 = vld [vmem:[%s1775_s7 + $0x3c8] sm:$0xff]  ;;  %v183_v1 = vld [vmem:[%s1775_s7 + $0x30] sm:$0xff]  ;;  %v297_v2 = vld [vmem:[%s1775_s7 + $0x3c0] sm:$0xff] }
  0x15   : > { %1616 = vmatprep.subr.bf16.mxu0 %v1710_v3  ;;  %1664 = vmatprep.subr.bf16.mxu1 %v1710_v3  ;;  %v301_v4 = vld [vmem:[%s1775_s7 + $0x3e0] sm:$0xff]  ;;  %v186_v5 = vld [vmem:[%s1775_s7 + $0x48] sm:$0xff]  ;;  %v300_v6 = vld [vmem:[%s1775_s7 + $0x3d8] sm:$0xff] }
  0x16   : > { %v190_v7 = vld [vmem:[%s1775_s7 + $0x68] sm:$0xff]  ;;  %v304_v8 = vld [vmem:[%s1775_s7 + $0x3f8] sm:$0xff]  ;;  %v189_v9 = vld [vmem:[%s1775_s7 + $0x60] sm:$0xff] }
  0x17   : > { %v303_v10 = vld [vmem:[%s1775_s7 + $0x3f0] sm:$0xff]  ;;  %v193_v11 = vld [vmem:[%s1775_s7 + $0x80] sm:$0xff]  ;;  %v192_v13 = vld [vmem:[%s1775_s7 + $0x78] sm:$0xff] }
  0x18   : > { %1618 = vmatpush1.bf16.msra.mxu0 %v1617_v17  ;;  %1680 = vmatpush1.bf16.msra.mxu1 %v1617_v17  ;;  %v307_v12 = vld [vmem:[%s1775_s7 + $0x410] sm:$0xff]  ;;  %v306_v14 = vld [vmem:[%s1775_s7 + $0x408] sm:$0xff]  ;;  %v196_v15 = vld [vmem:[%s1775_s7 + $0x98] sm:$0xff] }
  0x19   : > { %1619 = vmatprep.subr.bf16.mxu0 %v1710_v3  ;;  %1665 = vmatprep.subr.bf16.mxu1 %v1710_v3  ;;  %v310_v16 = vld [vmem:[%s1775_s7 + $0x428] sm:$0xff]  ;;  %v195_v17 = vld [vmem:[%s1775_s7 + $0x90] sm:$0xff]  ;;  %v309_v18 = vld [vmem:[%s1775_s7 + $0x420] sm:$0xff] }
  0x1a   : > { %v199_v19 = vld [vmem:[%s1775_s7 + $0xb0] sm:$0xff]  ;;  %v198_v21 = vld [vmem:[%s1775_s7 + $0xa8] sm:$0xff]  ;;  %v312_v22 = vld [vmem:[%s1775_s7 + $0x438] sm:$0xff] }
  0x1b   : > { %v316_v24 = vld [vmem:[%s1775_s7 + $0x458] sm:$0xff]  ;;  %v201_v25 = vld [vmem:[%s1775_s7 + $0xc0] sm:$0xff]  ;;  %v319_v28 = vld [vmem:[%s1775_s7 + $0x470] sm:$0xff] }
  0x1c   : > { %1621 = vmatpush1.bf16.msra.mxu0 %v1620_v20  ;;  %1681 = vmatpush1.bf16.msra.mxu1 %v1620_v20  ;;  %v313_v20 = vld [vmem:[%s1775_s7 + $0x440] sm:$0xff]  ;;  %v318_v30 = vld [vmem:[%s1775_s7 + $0x468] sm:$0xff]  ;;  %v208_v31 = vld [vmem:[%s1775_s7 + $0xf8] sm:$0xff] }
  0x1d   : > { %1622 = vmatprep.subr.bf16.mxu0 %v1710_v3  ;;  %1666 = vmatprep.subr.bf16.mxu1 %v1710_v3  ;;  %v205_v27 = vld [vmem:[%s1775_s7 + $0xe0] sm:$0xff]  ;;  %v207_v33 = vld [vmem:[%s1775_s7 + $0xf0] sm:$0xff]  ;;  %v210_v37 = vld [vmem:[%s1775_s7 + $0x108] sm:$0xff] }
  0x1e   : > { %v321_v34 = vld [vmem:[%s1775_s7 + $0x480] sm:$0xff]  ;;  %v214_v39 = vld [vmem:[%s1775_s7 + $0x128] sm:$0xff]  ;;  %v179_v40 = vld [vmem:[%s1775_s7 + $0x10] sm:$0xff] }
  0x1f   : > { %v325_v36 = vld [vmem:[%s1775_s7 + $0x4a0] sm:$0xff]  ;;  %v182_v42 = vld [vmem:[%s1775_s7 + $0x28] sm:$0xff]  ;;  %v216_v45 = vld [vmem:[%s1775_s7 + $0x138] sm:$0xff] }
  0x20   : > { %1624 = vmatpush1.bf16.msra.mxu0 %v1623_v23  ;;  %1682 = vmatpush1.bf16.msra.mxu1 %v1623_v23  ;;  %v202_v23 = vld [vmem:[%s1775_s7 + $0xc8] sm:$0xff]  ;;  %v217_v43 = vld [vmem:[%s1775_s7 + $0x140] sm:$0xff]  ;;  %v188_v46 = vld [vmem:[%s1775_s7 + $0x58] sm:$0xff] }
  0x21   : > { %1625 = vmatprep.subr.bf16.mxu0 %v1710_v3  ;;  %1667 = vmatprep.subr.bf16.mxu1 %v1710_v3  ;;  %v191_v48 = vld [vmem:[%s1775_s7 + $0x70] sm:$0xff]  ;;  %v194_v50 = vld [vmem:[%s1775_s7 + $0x88] sm:$0xff]  ;;  %v200_v54 = vld [vmem:[%s1775_s7 + $0xb8] sm:$0xff] }
  0x22   : > { %v219_v49 = vld [vmem:[%s1775_s7 + $0x150] sm:$0xff]  ;;  %v226_v55 = vld [vmem:[%s1775_s7 + $0x188] sm:$0xff] }
  0x23   : > { %v223_v51 = vld [vmem:[%s1775_s7 + $0x170] sm:$0xff] }
  0x24   : > { %1627 = vmatpush1.bf16.msra.mxu0 %v1626_v26  ;;  %1683 = vmatpush1.bf16.msra.mxu1 %v1626_v26  ;;  %v315_v26 = vld [vmem:[%s1775_s7 + $0x450] sm:$0xff] }
  0x25   : > { %1628 = vmatprep.subr.bf16.mxu0 %v1710_v3  ;;  %1668 = vmatprep.subr.bf16.mxu1 %v1710_v3 }
  0x28   : > { %1630 = vmatpush1.bf16.msra.mxu0 %v1629_v29  ;;  %1684 = vmatpush1.bf16.msra.mxu1 %v1629_v29  ;;  %v204_v29 = vld [vmem:[%s1775_s7 + $0xd8] sm:$0xff] }
  0x29   : > { %1631 = vmatprep.subr.bf16.mxu0 %v1710_v3  ;;  %1669 = vmatprep.subr.bf16.mxu1 %v1710_v3 }
  0x2c   : > { %1633 = vmatpush1.bf16.msra.mxu0 %v1632_v32  ;;  %1685 = vmatpush1.bf16.msra.mxu1 %v1632_v32  ;;  %v322_v32 = vld [vmem:[%s1775_s7 + $0x488] sm:$0xff] }
  0x2d   : > { %1634 = vmatprep.subr.bf16.mxu0 %v1710_v3  ;;  %1670 = vmatprep.subr.bf16.mxu1 %v1710_v3 }
  0x30   : > { %1636 = vmatpush1.bf16.msra.mxu0 %v1635_v35  ;;  %1686 = vmatpush1.bf16.msra.mxu1 %v1635_v35  ;;  %v211_v35 = vld [vmem:[%s1775_s7 + $0x110] sm:$0xff] }
  0x31   : > { %1637 = vmatprep.subr.bf16.mxu0 %v1710_v3  ;;  %1671 = vmatprep.subr.bf16.mxu1 %v1710_v3 }
  0x34   : > { %1639 = vmatpush1.bf16.msra.mxu0 %v1638_v38  ;;  %1687 = vmatpush1.bf16.msra.mxu1 %v1638_v38  ;;  %v324_v38 = vld [vmem:[%s1775_s7 + $0x498] sm:$0xff] }
  0x35   : > { %1640 = vmatprep.subr.bf16.mxu0 %v1710_v3  ;;  %1672 = vmatprep.subr.bf16.mxu1 %v1710_v3 }
  0x38   : > { %1642 = vmatpush1.bf16.msra.mxu0 %v1641_v41  ;;  %1688 = vmatpush1.bf16.msra.mxu1 %v1641_v41  ;;  %v213_v41 = vld [vmem:[%s1775_s7 + $0x120] sm:$0xff] }
  0x39   : > { %1643 = vmatprep.subr.bf16.mxu0 %v1710_v3  ;;  %1673 = vmatprep.subr.bf16.mxu1 %v1710_v3 }
  0x3c   : > { %1645 = vmatpush1.bf16.msra.mxu0 %v1644_v44  ;;  %1689 = vmatpush1.bf16.msra.mxu1 %v1644_v44  ;;  %v185_v44 = vld [vmem:[%s1775_s7 + $0x40] sm:$0xff] }
  0x3d   : > { %1646 = vmatprep.subr.bf16.mxu0 %v1710_v3  ;;  %1674 = vmatprep.subr.bf16.mxu1 %v1710_v3 }
  0x40   : > { %1648 = vmatpush1.bf16.msra.mxu0 %v1647_v47  ;;  %1690 = vmatpush1.bf16.msra.mxu1 %v1647_v47  ;;  %v220_v47 = vld [vmem:[%s1775_s7 + $0x158] sm:$0xff] }
  0x41   : > { %1649 = vmatprep.subr.bf16.mxu0 %v1710_v3  ;;  %1675 = vmatprep.subr.bf16.mxu1 %v1710_v3  ;;  %v187_v3 = vld [vmem:[%s1775_s7 + $0x50] sm:$0xff] }
  0x44   : > { %1651 = vmatpush1.bf16.msra.mxu0 %v1650_v52  ;;  %1691 = vmatpush1.bf16.msra.mxu1 %v1650_v52  ;;  %v197_v52 = vld [vmem:[%s1775_s7 + $0xa0] sm:$0xff] }
  0x45   : > { %1653 = vmatprep.subr.bf16.mxu1 %v1652_v53 }
  0x47   : > { %586 = vmatmul.mubr.f32.vlgmr.msra.gmra.mrb[0].mxu0 %v177_v56  ;;  %776 = vmatmul.mubr.f32.vlgmr.msra.gmra.mrb[0].mxu1 %v291_v57  ;;  %v203_v56 = vld [vmem:[%s1775_s7 + $0xd0] sm:$0xff]  ;;  %v225_v57 = vld [vmem:[%s1775_s7 + $0x180] sm:$0xff] }
  0x48   : > { %590 = vmatprep.mubr.f32.mxu0 %v181_v58  ;;  %780 = vmatprep.mubr.f32.mxu1 %v295_v59  ;;  %v206_v58 = vld [vmem:[%s1775_s7 + $0xe8] sm:$0xff]  ;;  %v229_v59 = vld [vmem:[%s1775_s7 + $0x1a0] sm:$0xff] }
  0x49   : > { %1655 = vmatpush3.bf16.msra.mxu1 %v1652_v53  ;;  %v222_v53 = vld [vmem:[%s1775_s7 + $0x168] sm:$0xff] }
  0x4a   : > { %1657 = vmatprep.subr.bf16.mxu1 %v1656_v60 }
  0x4b   : > { %591 = vmatmul.mubr.f32.gmra.mrb[2].mxu0 %v180_v61  ;;  %781 = vmatmul.mubr.f32.gmra.mrb[2].mxu1 %v294_v62  ;;  %v228_v61 = vld [vmem:[%s1775_s7 + $0x198] sm:$0xff] }
  0x4c   : > { %595 = vmatprep.mubr.f32.mxu0 %v184_v63  ;;  %785 = vmatprep.mubr.f32.mxu1 %v298_v0  ;;  %v212_v62 = vld [vmem:[%s1775_s7 + $0x118] sm:$0xff]  ;;  %v215_v0 = vld [vmem:[%s1775_s7 + $0x130] sm:$0xff] }
  0x4d   : > { %1659 = vmatpush3.bf16.msra.mxu1 %v1656_v60  ;;  %v209_v60 = vld [vmem:[%s1775_s7 + $0x100] sm:$0xff]  ;;  %v232_v63 = vld [vmem:[%s1775_s7 + $0x1b8] sm:$0xff] }
  0x4f   : > { %596 = vmatmul.mubr.f32.gmra.mrb[4].mxu0 %v183_v1  ;;  %786 = vmatmul.mubr.f32.gmra.mrb[4].mxu1 %v297_v2  ;;  %v231_v1 = vld [vmem:[%s1775_s7 + $0x1b0] sm:$0xff]  ;;  %v218_v2 = vld [vmem:[%s1775_s7 + $0x148] sm:$0xff] }
  0x50   : > { %600 = vmatprep.mubr.f32.mxu0 %v187_v3  ;;  %790 = vmatprep.mubr.f32.mxu1 %v301_v4  ;;  %v235_v3 = vld [vmem:[%s1775_s7 + $0x1d0] sm:$0xff]  ;;  %v221_v4 = vld [vmem:[%s1775_s7 + $0x160] sm:$0xff] }
  0x53   : > { %601 = vmatmul.mubr.f32.gmra.mrb[6].mxu0 %v186_v5  ;;  %791 = vmatmul.mubr.f32.gmra.mrb[6].mxu1 %v300_v6  ;;  %v234_v5 = vld [vmem:[%s1775_s7 + $0x1c8] sm:$0xff]  ;;  %v224_v6 = vld [vmem:[%s1775_s7 + $0x178] sm:$0xff] }
  0x54   : > { %605 = vmatprep.mubr.f32.mxu0 %v190_v7  ;;  %795 = vmatprep.mubr.f32.mxu1 %v304_v8  ;;  %v238_v7 = vld [vmem:[%s1775_s7 + $0x1e8] sm:$0xff]  ;;  %v227_v8 = vld [vmem:[%s1775_s7 + $0x190] sm:$0xff] }
  0x57   : > { %606 = vmatmul.mubr.f32.gmra.mrb[8].mxu0 %v189_v9  ;;  %796 = vmatmul.mubr.f32.gmra.mrb[8].mxu1 %v303_v10  ;;  %v237_v9 = vld [vmem:[%s1775_s7 + $0x1e0] sm:$0xff]  ;;  %v230_v10 = vld [vmem:[%s1775_s7 + $0x1a8] sm:$0xff] }
  0x58   : > { %610 = vmatprep.mubr.f32.mxu0 %v193_v11  ;;  %800 = vmatprep.mubr.f32.mxu1 %v307_v12  ;;  %v241_v11 = vld [vmem:[%s1775_s7 + $0x200] sm:$0xff] }
  0x59   : > { %v233_v12 = vld [vmem:[%s1775_s7 + $0x1c0] sm:$0xff] }
  0x5b   : > { %611 = vmatmul.mubr.f32.gmra.mrb[10].mxu0 %v192_v13  ;;  %801 = vmatmul.mubr.f32.gmra.mrb[10].mxu1 %v306_v14  ;;  %v240_v13 = vld [vmem:[%s1775_s7 + $0x1f8] sm:$0xff] }
  0x5c   : > { %615 = vmatprep.mubr.f32.mxu0 %v196_v15  ;;  %805 = vmatprep.mubr.f32.mxu1 %v310_v16  ;;  %v236_v14 = vld [vmem:[%s1775_s7 + $0x1d8] sm:$0xff]  ;;  %v239_v16 = vld [vmem:[%s1775_s7 + $0x1f0] sm:$0xff] }
  0x5d   : > { %v244_v15 = vld [vmem:[%s1775_s7 + $0x218] sm:$0xff] }
  0x5f   : > { %616 = vmatmul.mubr.f32.gmra.mrb[12].mxu0 %v195_v17  ;;  %806 = vmatmul.mubr.f32.gmra.mrb[12].mxu1 %v309_v18  ;;  %v243_v17 = vld [vmem:[%s1775_s7 + $0x210] sm:$0xff]  ;;  %v242_v18 = vld [vmem:[%s1775_s7 + $0x208] sm:$0xff] }
  0x60   : > { %620 = vmatprep.mubr.f32.mxu0 %v199_v19  ;;  %810 = vmatprep.mubr.f32.mxu1 %v313_v20  ;;  %v247_v19 = vld [vmem:[%s1775_s7 + $0x230] sm:$0xff]  ;;  %v245_v20 = vld [vmem:[%s1775_s7 + $0x220] sm:$0xff] }
  0x63   : > { %621 = vmatmul.mubr.f32.gmra.mrb[14].mxu0 %v198_v21  ;;  %811 = vmatmul.mubr.f32.gmra.mrb[14].mxu1 %v312_v22  ;;  %v246_v21 = vld [vmem:[%s1775_s7 + $0x228] sm:$0xff]  ;;  %v248_v22 = vld [vmem:[%s1775_s7 + $0x238] sm:$0xff] }
  0x64   : > { %625 = vmatprep.mubr.f32.mxu0 %v202_v23  ;;  %815 = vmatprep.mubr.f32.mxu1 %v316_v24  ;;  %v250_v23 = vld [vmem:[%s1775_s7 + $0x248] sm:$0xff]  ;;  %v251_v24 = vld [vmem:[%s1775_s7 + $0x250] sm:$0xff] }
  0x67   : > { %626 = vmatmul.mubr.f32.gmra.mrb[16].mxu0 %v201_v25  ;;  %816 = vmatmul.mubr.f32.gmra.mrb[16].mxu1 %v315_v26  ;;  %v249_v25 = vld [vmem:[%s1775_s7 + $0x240] sm:$0xff]  ;;  %v254_v26 = vld [vmem:[%s1775_s7 + $0x268] sm:$0xff] }
  0x68   : > { %630 = vmatprep.mubr.f32.mxu0 %v205_v27  ;;  %820 = vmatprep.mubr.f32.mxu1 %v319_v28  ;;  %v253_v27 = vld [vmem:[%s1775_s7 + $0x260] sm:$0xff] }
  0x69   : > { %v257_v28 = vld [vmem:[%s1775_s7 + $0x280] sm:$0xff] }
  0x6b   : > { %631 = vmatmul.mubr.f32.gmra.mrb[18].mxu0 %v204_v29  ;;  %821 = vmatmul.mubr.f32.gmra.mrb[18].mxu1 %v318_v30  ;;  %v252_v29 = vld [vmem:[%s1775_s7 + $0x258] sm:$0xff] }
  0x6c   : > { %635 = vmatprep.mubr.f32.mxu0 %v208_v31  ;;  %825 = vmatprep.mubr.f32.mxu1 %v322_v32  ;;  %v260_v30 = vld [vmem:[%s1775_s7 + $0x298] sm:$0xff]  ;;  %v263_v32 = vld [vmem:[%s1775_s7 + $0x2b0] sm:$0xff] }
  0x6d   : > { %v256_v31 = vld [vmem:[%s1775_s7 + $0x278] sm:$0xff] }
  0x6f   : > { %636 = vmatmul.mubr.f32.gmra.mrb[20].mxu0 %v207_v33  ;;  %826 = vmatmul.mubr.f32.gmra.mrb[20].mxu1 %v321_v34  ;;  %v255_v33 = vld [vmem:[%s1775_s7 + $0x270] sm:$0xff]  ;;  %v266_v34 = vld [vmem:[%s1775_s7 + $0x2c8] sm:$0xff] }
  0x70   : > { %640 = vmatprep.mubr.f32.mxu0 %v211_v35  ;;  %830 = vmatprep.mubr.f32.mxu1 %v325_v36  ;;  %v259_v35 = vld [vmem:[%s1775_s7 + $0x290] sm:$0xff]  ;;  %v269_v36 = vld [vmem:[%s1775_s7 + $0x2e0] sm:$0xff] }
  0x73   : > { %641 = vmatmul.mubr.f32.gmra.mrb[22].mxu0 %v210_v37  ;;  %831 = vmatmul.mubr.f32.gmra.mrb[22].mxu1 %v324_v38  ;;  %v258_v37 = vld [vmem:[%s1775_s7 + $0x288] sm:$0xff]  ;;  %v272_v38 = vld [vmem:[%s1775_s7 + $0x2f8] sm:$0xff] }
  0x74   : > { %645 = vmatprep.mubr.f32.mxu0 %v214_v39  ;;  %1529 = vmatprep.mubr.msk.f32.mxu1 %vm370_vm0, %v179_v40  ;;  %v262_v39 = vld [vmem:[%s1775_s7 + $0x2a8] sm:$0xff]  ;;  %v275_v40 = vld [vmem:[%s1775_s7 + $0x310] sm:$0xff] }
  0x77   : > { %646 = vmatmul.mubr.f32.gmra.mrb[24].mxu0 %v213_v41  ;;  %1530 = vmatmul.mubr.msk.f32.vlgmr.msra.gmra.mrb[24].mxu1 %vm370_vm0, %v182_v42  ;;  %v261_v41 = vld [vmem:[%s1775_s7 + $0x2a0] sm:$0xff]  ;;  %v278_v42 = vld [vmem:[%s1775_s7 + $0x328] sm:$0xff] }
  0x78   : > { %650 = vmatprep.mubr.f32.mxu0 %v217_v43  ;;  %1532 = vmatprep.mubr.msk.f32.mxu1 %vm370_vm0, %v185_v44  ;;  %v265_v43 = vld [vmem:[%s1775_s7 + $0x2c0] sm:$0xff] }
  0x79   : > { %v281_v44 = vld [vmem:[%s1775_s7 + $0x340] sm:$0xff] }
  0x7b   : > { %651 = vmatmul.mubr.f32.gmra.mrb[26].mxu0 %v216_v45  ;;  %1533 = vmatmul.mubr.msk.f32.gmra.mrb[26].mxu1 %vm370_vm0, %v188_v46  ;;  %v264_v45 = vld [vmem:[%s1775_s7 + $0x2b8] sm:$0xff] }
  0x7c   : > { %655 = vmatprep.mubr.f32.mxu0 %v220_v47  ;;  %1535 = vmatprep.mubr.msk.f32.mxu1 %vm370_vm0, %v191_v48  ;;  %v284_v46 = vld [vmem:[%s1775_s7 + $0x358] sm:$0xff]  ;;  %v287_v48 = vld [vmem:[%s1775_s7 + $0x370] sm:$0xff] }
  0x7d   : > { %v268_v47 = vld [vmem:[%s1775_s7 + $0x2d8] sm:$0xff] }
  0x7f   : > { %656 = vmatmul.mubr.f32.gmra.mrb[28].mxu0 %v219_v49  ;;  %1536 = vmatmul.mubr.msk.f32.gmra.mrb[28].mxu1 %vm370_vm0, %v194_v50  ;;  %v267_v49 = vld [vmem:[%s1775_s7 + $0x2d0] sm:$0xff]  ;;  %v290_v50 = vld [vmem:[%s1775_s7 + $0x388] sm:$0xff] }
  0x80   : > { %660 = vmatprep.mubr.f32.mxu0 %v223_v51  ;;  %1538 = vmatprep.mubr.msk.f32.mxu1 %vm370_vm0, %v197_v52  ;;  %v271_v51 = vld [vmem:[%s1775_s7 + $0x2f0] sm:$0xff]  ;;  %v293_v52 = vld [vmem:[%s1775_s7 + $0x3a0] sm:$0xff] }
  0x83   : > { %661 = vmatmul.mubr.f32.gmra.mrb[30].mxu0 %v222_v53  ;;  %1539 = vmatmul.mubr.msk.f32.gmra.mrb[30].mxu1 %vm370_vm0, %v200_v54  ;;  %v270_v53 = vld [vmem:[%s1775_s7 + $0x2e8] sm:$0xff]  ;;  %v296_v54 = vld [vmem:[%s1775_s7 + $0x3b8] sm:$0xff] }
  0x84   : > { %665 = vmatprep.mubr.f32.mxu0 %v226_v55  ;;  %1541 = vmatprep.mubr.msk.f32.mxu1 %vm370_vm0, %v203_v56  ;;  %v274_v55 = vld [vmem:[%s1775_s7 + $0x308] sm:$0xff]  ;;  %v299_v56 = vld [vmem:[%s1775_s7 + $0x3d0] sm:$0xff] }
  0x87   : > { %666 = vmatmul.mubr.f32.gmra.mrb[32].mxu0 %v225_v57  ;;  %1542 = vmatmul.mubr.msk.f32.gmra.mrb[32].mxu1 %vm370_vm0, %v206_v58  ;;  %v273_v57 = vld [vmem:[%s1775_s7 + $0x300] sm:$0xff]  ;;  %v302_v58 = vld [vmem:[%s1775_s7 + $0x3e8] sm:$0xff] }
  0x88   : > { %670 = vmatprep.mubr.f32.mxu0 %v229_v59  ;;  %1544 = vmatprep.mubr.msk.f32.mxu1 %vm370_vm0, %v209_v60  ;;  %v277_v59 = vld [vmem:[%s1775_s7 + $0x320] sm:$0xff] }
  0x89   : > { %v305_v60 = vld [vmem:[%s1775_s7 + $0x400] sm:$0xff] }
  0x8b   : > { %671 = vmatmul.mubr.f32.gmra.mrb[34].mxu0 %v228_v61  ;;  %1545 = vmatmul.mubr.msk.f32.gmra.mrb[34].mxu1 %vm370_vm0, %v212_v62  ;;  %v276_v61 = vld [vmem:[%s1775_s7 + $0x318] sm:$0xff] }
  0x8c   : > { %675 = vmatprep.mubr.f32.mxu0 %v232_v63  ;;  %1547 = vmatprep.mubr.msk.f32.mxu1 %vm370_vm0, %v215_v0  ;;  %v308_v62 = vld [vmem:[%s1775_s7 + $0x418] sm:$0xff]  ;;  %v311_v0 = vld [vmem:[%s1775_s7 + $0x430] sm:$0xff] }
  0x8d   : > { %v280_v63 = vld [vmem:[%s1775_s7 + $0x338] sm:$0xff] }
  0x8f   : > { %676 = vmatmul.mubr.f32.gmra.mrb[36].mxu0 %v231_v1  ;;  %1548 = vmatmul.mubr.msk.f32.gmra.mrb[36].mxu1 %vm370_vm0, %v218_v2  ;;  %v279_v1 = vld [vmem:[%s1775_s7 + $0x330] sm:$0xff]  ;;  %v314_v2 = vld [vmem:[%s1775_s7 + $0x448] sm:$0xff] }
  0x90   : > { %680 = vmatprep.mubr.f32.mxu0 %v235_v3  ;;  %1550 = vmatprep.mubr.msk.f32.mxu1 %vm370_vm0, %v221_v4  ;;  %v283_v3 = vld [vmem:[%s1775_s7 + $0x350] sm:$0xff]  ;;  %v317_v4 = vld [vmem:[%s1775_s7 + $0x460] sm:$0xff] }
  0x93   : > { %681 = vmatmul.mubr.f32.gmra.mrb[38].mxu0 %v234_v5  ;;  %1551 = vmatmul.mubr.msk.f32.gmra.mrb[38].mxu1 %vm370_vm0, %v224_v6  ;;  %v282_v5 = vld [vmem:[%s1775_s7 + $0x348] sm:$0xff]  ;;  %v320_v6 = vld [vmem:[%s1775_s7 + $0x478] sm:$0xff] }
  0x94   : > { %685 = vmatprep.mubr.f32.mxu0 %v238_v7  ;;  %1553 = vmatprep.mubr.msk.f32.mxu1 %vm370_vm0, %v227_v8  ;;  %v286_v7 = vld [vmem:[%s1775_s7 + $0x368] sm:$0xff]  ;;  %v323_v8 = vld [vmem:[%s1775_s7 + $0x490] sm:$0xff] }
  0x97   : > { %686 = vmatmul.mubr.f32.gmra.mrb[40].mxu0 %v237_v9  ;;  %1554 = vmatmul.mubr.msk.f32.gmra.mrb[40].mxu1 %vm370_vm0, %v230_v10  ;;  %v285_v9 = vld [vmem:[%s1775_s7 + $0x360] sm:$0xff]  ;;  %v326_v10 = vld [vmem:[%s1775_s7 + $0x4a8] sm:$0xff] }
  0x98   : > { %690 = vmatprep.mubr.f32.mxu0 %v241_v11  ;;  %1556 = vmatprep.mubr.msk.f32.mxu1 %vm370_vm0, %v233_v12  ;;  %v289_v11 = vld [vmem:[%s1775_s7 + $0x380] sm:$0xff]  ;;  %v288_v12 = vld [vmem:[%s1775_s7 + $0x378] sm:$0xff] }
  0x9b   : > { %691 = vmatmul.mubr.f32.gmra.mrb[42].mxu0 %v240_v13  ;;  %1557 = vmatmul.mubr.msk.f32.gmra.mrb[42].mxu1 %vm370_vm0, %v236_v14 }
  0x9c   : > { %695 = vmatprep.mubr.f32.mxu0 %v244_v15  ;;  %1559 = vmatprep.mubr.msk.f32.mxu1 %vm370_vm0, %v239_v16 }
  0x9f   : > { %696 = vmatmul.mubr.f32.gmra.mrb[44].mxu0 %v243_v17  ;;  %1560 = vmatmul.mubr.msk.f32.gmra.mrb[44].mxu1 %vm370_vm0, %v242_v18 }
  0xa0   : > { %700 = vmatprep.mubr.f32.mxu0 %v247_v19  ;;  %1562 = vmatprep.mubr.msk.f32.mxu1 %vm370_vm0, %v245_v20 }
  0xa3   : > { %701 = vmatmul.mubr.f32.gmra.mrb[46].mxu0 %v246_v21  ;;  %1563 = vmatmul.mubr.msk.f32.gmra.mrb[46].mxu1 %vm370_vm0, %v248_v22 }
  0xa4   : > { %705 = vmatprep.mubr.f32.mxu0 %v250_v23  ;;  %1565 = vmatprep.mubr.msk.f32.mxu1 %vm370_vm0, %v251_v24 }
  0xa7   : > { %706 = vmatmul.mubr.f32.gmra.mrb[48].mxu0 %v249_v25  ;;  %1566 = vmatmul.mubr.msk.f32.gmra.mrb[48].mxu1 %vm370_vm0, %v254_v26 }
  0xa8   : > { %710 = vmatprep.mubr.f32.mxu0 %v253_v27  ;;  %1568 = vmatprep.mubr.msk.f32.mxu1 %vm370_vm0, %v257_v28 }
  0xab   : > { %711 = vmatmul.mubr.f32.gmra.mrb[50].mxu0 %v252_v29  ;;  %1569 = vmatmul.mubr.msk.f32.gmra.mrb[50].mxu1 %vm370_vm0, %v260_v30 }
  0xac   : > { %715 = vmatprep.mubr.f32.mxu0 %v256_v31  ;;  %1571 = vmatprep.mubr.msk.f32.mxu1 %vm370_vm0, %v263_v32 }
  0xaf   : > { %716 = vmatmul.mubr.f32.gmra.mrb[52].mxu0 %v255_v33  ;;  %1572 = vmatmul.mubr.msk.f32.gmra.mrb[52].mxu1 %vm370_vm0, %v266_v34 }
  0xb0   : > { %720 = vmatprep.mubr.f32.mxu0 %v259_v35  ;;  %1574 = vmatprep.mubr.msk.f32.mxu1 %vm370_vm0, %v269_v36 }
  0xb3   : > { %721 = vmatmul.mubr.f32.gmra.mrb[54].mxu0 %v258_v37  ;;  %1575 = vmatmul.mubr.msk.f32.gmra.mrb[54].mxu1 %vm370_vm0, %v272_v38 }
  0xb4   : > { %725 = vmatprep.mubr.f32.mxu0 %v262_v39  ;;  %1577 = vmatprep.mubr.msk.f32.mxu1 %vm370_vm0, %v275_v40 }
  0xb7   : > { %726 = vmatmul.mubr.f32.gmra.mrb[56].mxu0 %v261_v41  ;;  %1578 = vmatmul.mubr.msk.f32.gmra.mrb[56].mxu1 %vm370_vm0, %v278_v42 }
  0xb8   : > { %730 = vmatprep.mubr.f32.mxu0 %v265_v43  ;;  %1580 = vmatprep.mubr.msk.f32.mxu1 %vm370_vm0, %v281_v44 }
  0xbb   : > { %731 = vmatmul.mubr.f32.gmra.mrb[58].mxu0 %v264_v45  ;;  %1581 = vmatmul.mubr.msk.f32.gmra.mrb[58].mxu1 %vm370_vm0, %v284_v46 }
  0xbc   : > { %735 = vmatprep.mubr.f32.mxu0 %v268_v47  ;;  %1583 = vmatprep.mubr.msk.f32.mxu1 %vm370_vm0, %v287_v48 }
  0xbf   : > { %736 = vmatmul.mubr.f32.gmra.mrb[60].mxu0 %v267_v49  ;;  %1584 = vmatmul.mubr.msk.f32.gmra.mrb[60].mxu1 %vm370_vm0, %v290_v50 }
  0xc0   : > { %740 = vmatprep.mubr.f32.mxu0 %v271_v51  ;;  %1586 = vmatprep.mubr.msk.f32.mxu1 %vm370_vm0, %v293_v52 }
  0xc3   : > { %741 = vmatmul.mubr.f32.gmra.mrb[62].mxu0 %v270_v53  ;;  %1587 = vmatmul.mubr.msk.f32.gmra.mrb[62].mxu1 %vm370_vm0, %v296_v54 }
  0xc4   : > { %745 = vmatprep.mubr.f32.mxu0 %v274_v55  ;;  %1589 = vmatprep.mubr.msk.f32.mxu1 %vm370_vm0, %v299_v56 }
  0xc7   : > { %746 = vmatmul.mubr.f32.gmra.mrb[64].mxu0 %v273_v57  ;;  %1590 = vmatmul.mubr.msk.f32.gmra.mrb[64].mxu1 %vm370_vm0, %v302_v58 }
  0xc8   : > { %750 = vmatprep.mubr.f32.mxu0 %v277_v59  ;;  %1592 = vmatprep.mubr.msk.f32.mxu1 %vm370_vm0, %v305_v60  ;;  %v2124_v59 = vld [vmem:[%s2328_s2] ss:$0 sm:$0xff] }
  0xcb   : > { %751 = vmatmul.mubr.f32.gmra.mrb[66].mxu0 %v276_v61  ;;  %1593 = vmatmul.mubr.msk.f32.gmra.mrb[66].mxu1 %vm370_vm0, %v308_v62 }
  0xcc   : > { %755 = vmatprep.mubr.f32.mxu0 %v280_v63  ;;  %1595 = vmatprep.mubr.msk.f32.mxu1 %vm370_vm0, %v311_v0 }
  0xcf   : > { %756 = vmatmul.mubr.f32.gmra.mrb[68].mxu0 %v279_v1  ;;  %1596 = vmatmul.mubr.msk.f32.gmra.mrb[68].mxu1 %vm370_vm0, %v314_v2 }
  0xd0   : > { %760 = vmatprep.mubr.f32.mxu0 %v283_v3  ;;  %1598 = vmatprep.mubr.msk.f32.mxu1 %vm370_vm0, %v317_v4 }
  0xd3   : > { %761 = vmatmul.mubr.f32.gmra.mrb[70].mxu0 %v282_v5  ;;  %1599 = vmatmul.mubr.msk.f32.gmra.mrb[70].mxu1 %vm370_vm0, %v320_v6 }
  0xd4   : > { %765 = vmatprep.mubr.f32.mxu0 %v286_v7  ;;  %1601 = vmatprep.mubr.msk.f32.mxu1 %vm370_vm0, %v323_v8 }
  0xd7   : > { %766 = vmatmul.mubr.f32.gmra.mrb[72].mxu0 %v285_v9  ;;  %1602 = vmatmul.mubr.msk.f32.gmra.mrb[72].mxu1 %vm370_vm0, %v326_v10 }
  0xd8   : > { %770 = vmatprep.mubr.f32.mxu0 %v289_v11 }
  0xdb   : > { %771 = vmatmul.mubr.f32.gmra.mrb[74].mxu0 %v288_v12 }
 0x11a   : > { %v587_v13 = vpop.f32.mrb[0].mxu0  ;;  %v2087_v14 = vpop.f32.mrb[0].mxu1 }
 0x11b   : > { %v589_v15 = vpop.f32.mrb[1].mxu0  ;;  %v779_v16 = vpop.f32.mrb[1].mxu1  ;;  %v588_v63 = vadd.f32 %v2124_v59, %v587_v13 }
 0x11e   : > { %v592_v17 = vpop.f32.mrb[2].mxu0  ;;  %v2089_v18 = vpop.f32.mrb[2].mxu1 }
 0x11f   : > { %v594_v19 = vpop.f32.mrb[3].mxu0  ;;  %v784_v20 = vpop.f32.mrb[3].mxu1  ;;  %v593_v62 = vadd.f32 %v2124_v59, %v592_v17 }
 0x122   : > { %v597_v21 = vpop.f32.mrb[4].mxu0  ;;  %v2091_v22 = vpop.f32.mrb[4].mxu1 }
 0x123   : > { %v599_v23 = vpop.f32.mrb[5].mxu0  ;;  %v789_v24 = vpop.f32.mrb[5].mxu1  ;;  %v598_v8 = vadd.f32 %v2124_v59, %v597_v21 }
 0x126   : > { %v602_v25 = vpop.f32.mrb[6].mxu0  ;;  %v2093_v26 = vpop.f32.mrb[6].mxu1 }
 0x127   : > { %v604_v27 = vpop.f32.mrb[7].mxu0  ;;  %v794_v28 = vpop.f32.mrb[7].mxu1  ;;  %v603_v6 = vadd.f32 %v2124_v59, %v602_v25 }
 0x12a   : > { %v607_v29 = vpop.f32.mrb[8].mxu0  ;;  %v2095_v30 = vpop.f32.mrb[8].mxu1 }
 0x12b   : > { %v609_v31 = vpop.f32.mrb[9].mxu0  ;;  %v799_v32 = vpop.f32.mrb[9].mxu1  ;;  %v608_v23 = vadd.f32 %v2124_v59, %v607_v29 }
 0x12e   : > { %v612_v33 = vpop.f32.mrb[10].mxu0  ;;  %v2097_v34 = vpop.f32.mrb[10].mxu1 }
 0x12f   : > { %v614_v35 = vpop.f32.mrb[11].mxu0  ;;  %v804_v36 = vpop.f32.mrb[11].mxu1  ;;  %v613_v20 = vadd.f32 %v2124_v59, %v612_v33 }
 0x132   : > { %v2099_v37 = vpop.f32.mrb[12].mxu0  ;;  %v2101_v38 = vpop.f32.mrb[12].mxu1 }
 0x133   : > { %v619_v39 = vpop.f32.mrb[13].mxu0  ;;  %v809_v40 = vpop.f32.mrb[13].mxu1 }
 0x134   : > { %v618_v40 = vadd.f32 %v2124_v59, %v2099_v37 }
 0x136   : > { %v622_v41 = vpop.f32.mrb[14].mxu0  ;;  %v2103_v42 = vpop.f32.mrb[14].mxu1 }
 0x137   : > { %v624_v43 = vpop.f32.mrb[15].mxu0  ;;  %v814_v44 = vpop.f32.mrb[15].mxu1  ;;  %v623_v39 = vadd.f32 %v2124_v59, %v622_v41 }
 0x13a   : > { %v2105_v45 = vpop.f32.mrb[16].mxu0  ;;  %v2107_v46 = vpop.f32.mrb[16].mxu1 }
 0x13b   : > { %v629_v47 = vpop.f32.mrb[17].mxu0  ;;  %v819_v48 = vpop.f32.mrb[17].mxu1 }
 0x13e   : > { %v2109_v49 = vpop.f32.mrb[18].mxu0  ;;  %v2111_v50 = vpop.f32.mrb[18].mxu1 }
 0x13f   : > { %v634_v51 = vpop.f32.mrb[19].mxu0  ;;  %v824_v52 = vpop.f32.mrb[19].mxu1 }
 0x142   : > { %v2113_v53 = vpop.f32.mrb[20].mxu0  ;;  %v2115_v54 = vpop.f32.mrb[20].mxu1 }
 0x143   : > { %v639_v55 = vpop.f32.mrb[21].mxu0  ;;  %v829_v56 = vpop.f32.mrb[21].mxu1 }
 0x146   : > { %v2117_v57 = vpop.f32.mrb[22].mxu0  ;;  %v2119_v58 = vpop.f32.mrb[22].mxu1 }
 0x147   : > { %v644_v60 = vpop.f32.mrb[23].mxu0  ;;  %v834_v61 = vpop.f32.mrb[23].mxu1 }
 0x148   : > { %v633_v60 = vadd.f32 %v2124_v59, %v2109_v49  ;;  %v628_v61 = vadd.f32 %v2124_v59, %v2105_v45 }
 0x14a   : > { %v2128_v0 = vpop.f32.mrb[24].mxu0  ;;  %v1531_v1 = vpop.f32.mrb[24].mxu1 }
 0x14b   : > { %v908_v2 = vadd.f32 %v1531_v1, %v593_v62  ;;  %v649_v3 = vpop.f32.mrb[25].mxu0  ;;  %v902_v4 = vpop.f32.mrb[25].mxu1 }
 0x14c   : > { %v903_v5 = vadd.f32 %v902_v4, %v588_v63 }
 0x14d   : > { %vm1152_vm1 = vcmp.ge.f32.partialorder %v908_v2, 0.0  ;;  %v1202_v7 = vmul.f32 0.01, %v908_v2 }
 0x14e   : > { %vm1151_vm2 = vcmp.ge.f32.partialorder %v903_v5, 0.0  ;;  %v1201_v9 = vmul.f32 0.01, %v903_v5  ;;  %v2138_v10 = vpop.f32.mrb[26].mxu0  ;;  %v1534_v11 = vpop.f32.mrb[26].mxu1 }
 0x14f   : > { %v1252_v12 = vsel %vm1152_vm1, %v908_v2, %v1202_v7  ;;  %v918_v13 = vadd.f32 %v1534_v11, %v603_v6  ;;  %v654_v15 = vpop.f32.mrb[27].mxu0  ;;  %v912_v16 = vpop.f32.mrb[27].mxu1  ;;  %v643_v7 = vadd.f32 %v2124_v59, %v2117_v57 }
 0x150   : > { %1302 = vst.msk [vmem:[%s2135_s22 + $0x8] sm:$0xff] %vm370_vm0, %v1252_v12  ;;  %v1251_v17 = vsel %vm1151_vm2, %v903_v5, %v1201_v9  ;;  %v913_v19 = vadd.f32 %v912_v16, %v598_v8  ;;  %v638_v8 = vadd.f32 %v2124_v59, %v2113_v53 }
 0x151   : > { %1301 = vst.msk [vmem:[%s2135_s22] sm:$0xff] %vm370_vm0, %v1251_v17  ;;  %vm1154_vm3 = vcmp.ge.f32.partialorder %v918_v13, 0.0  ;;  %v1204_v21 = vmul.f32 0.01, %v918_v13 }
 0x152   : > { %vm1153_vm4 = vcmp.ge.f32.partialorder %v913_v19, 0.0  ;;  %v1203_v24 = vmul.f32 0.01, %v913_v19  ;;  %v2146_v25 = vpop.f32.mrb[28].mxu0  ;;  %v1537_v27 = vpop.f32.mrb[28].mxu1 }
 0x153   : > { %v1254_v28 = vsel %vm1154_vm3, %v918_v13, %v1204_v21  ;;  %v928_v31 = vadd.f32 %v1537_v27, %v613_v20  ;;  %v659_v32 = vpop.f32.mrb[29].mxu0  ;;  %v922_v35 = vpop.f32.mrb[29].mxu1  ;;  %v653_v20 = vadd.f32 %v2124_v59, %v2138_v10  ;;  %v648_v21 = vadd.f32 %v2124_v59, %v2128_v0 }
 0x154   : > { %1304 = vst.msk [vmem:[%s2135_s22 + $0x18] sm:$0xff] %vm370_vm0, %v1254_v28  ;;  %v1253_v33 = vsel %vm1153_vm4, %v913_v19, %v1203_v24  ;;  %v923_v36 = vadd.f32 %v922_v35, %v608_v23 }
 0x155   : > { %1303 = vst.msk [vmem:[%s2135_s22 + $0x10] sm:$0xff] %vm370_vm0, %v1253_v33  ;;  %vm1156_vm5 = vcmp.ge.f32.partialorder %v928_v31, 0.0  ;;  %v1206_v29 = vmul.f32 0.01, %v928_v31 }
 0x156   : > { %vm1155_vm6 = vcmp.ge.f32.partialorder %v923_v36, 0.0  ;;  %v1205_v43 = vmul.f32 0.01, %v923_v36  ;;  %v662_v44 = vpop.f32.mrb[30].mxu0  ;;  %v1540_v47 = vpop.f32.mrb[30].mxu1 }
 0x157   : > { %v1256_v48 = vsel %vm1156_vm5, %v928_v31, %v1206_v29  ;;  %v938_v51 = vadd.f32 %v1540_v47, %v623_v39  ;;  %v664_v52 = vpop.f32.mrb[31].mxu0  ;;  %v932_v55 = vpop.f32.mrb[31].mxu1  ;;  %v658_v39 = vadd.f32 %v2124_v59, %v2146_v25 }
 0x158   : > { %1306 = vst.msk [vmem:[%s2135_s22 + $0x28] sm:$0xff] %vm370_vm0, %v1256_v48  ;;  %v1255_v41 = vsel %vm1155_vm6, %v923_v36, %v1205_v43  ;;  %v933_v56 = vadd.f32 %v932_v55, %v618_v40  ;;  %v663_v36 = vadd.f32 %v2124_v59, %v662_v44 }
 0x159   : > { %1305 = vst.msk [vmem:[%s2135_s22 + $0x20] sm:$0xff] %vm370_vm0, %v1255_v41  ;;  %vm1158_vm7 = vcmp.ge.f32.partialorder %v938_v51, 0.0  ;;  %v1208_v37 = vmul.f32 0.01, %v938_v51 }
 0x15a   : > { %vm1157_vm8 = vcmp.ge.f32.partialorder %v933_v56, 0.0  ;;  %v1207_v62 = vmul.f32 0.01, %v933_v56  ;;  %v667_v63 = vpop.f32.mrb[32].mxu0  ;;  %v1543_v1 = vpop.f32.mrb[32].mxu1 }
 0x15b   : > { %v1258_v2 = vsel %vm1158_vm7, %v938_v51, %v1208_v37  ;;  %v948_v3 = vadd.f32 %v1543_v1, %v633_v60  ;;  %v669_v4 = vpop.f32.mrb[33].mxu0  ;;  %v942_v5 = vpop.f32.mrb[33].mxu1 }
 0x15c   : > { %1308 = vst.msk [vmem:[%s2135_s22 + $0x38] sm:$0xff] %vm370_vm0, %v1258_v2  ;;  %v1257_v49 = vsel %vm1157_vm8, %v933_v56, %v1207_v62  ;;  %v943_v6 = vadd.f32 %v942_v5, %v628_v61  ;;  %v668_v56 = vadd.f32 %v2124_v59, %v667_v63 }
 0x15d   : > { %1307 = vst.msk [vmem:[%s2135_s22 + $0x30] sm:$0xff] %vm370_vm0, %v1257_v49  ;;  %vm1160_vm9 = vcmp.ge.f32.partialorder %v948_v3, 0.0  ;;  %v1210_v45 = vmul.f32 0.01, %v948_v3 }
 0x15e   : > { %vm1159_vm10 = vcmp.ge.f32.partialorder %v943_v6, 0.0  ;;  %v1209_v9 = vmul.f32 0.01, %v943_v6  ;;  %v672_v11 = vpop.f32.mrb[34].mxu0  ;;  %v1546_v12 = vpop.f32.mrb[34].mxu1 }
 0x15f   : > { %v1260_v13 = vsel %vm1160_vm9, %v948_v3, %v1210_v45  ;;  %v958_v15 = vadd.f32 %v1546_v12, %v643_v7  ;;  %v674_v16 = vpop.f32.mrb[35].mxu0  ;;  %v952_v17 = vpop.f32.mrb[35].mxu1  ;;  %v673_v41 = vadd.f32 %v2124_v59, %v672_v11 }
 0x160   : > { %1310 = vst.msk [vmem:[%s2135_s22 + $0x48] sm:$0xff] %vm370_vm0, %v1260_v13  ;;  %v1259_v57 = vsel %vm1159_vm10, %v943_v6, %v1209_v9  ;;  %v953_v19 = vadd.f32 %v952_v17, %v638_v8 }
 0x161   : > { %1309 = vst.msk [vmem:[%s2135_s22 + $0x40] sm:$0xff] %vm370_vm0, %v1259_v57  ;;  %vm1162_vm11 = vcmp.ge.f32.partialorder %v958_v15, 0.0  ;;  %v1212_v53 = vmul.f32 0.01, %v958_v15 }
 0x162   : > { %vm1161_vm12 = vcmp.ge.f32.partialorder %v953_v19, 0.0  ;;  %v1211_v23 = vmul.f32 0.01, %v953_v19  ;;  %v677_v24 = vpop.f32.mrb[36].mxu0  ;;  %v1549_v27 = vpop.f32.mrb[36].mxu1 }
 0x163   : > { %v1262_v28 = vsel %vm1162_vm11, %v958_v15, %v1212_v53  ;;  %v968_v31 = vadd.f32 %v1549_v27, %v653_v20  ;;  %v679_v32 = vpop.f32.mrb[37].mxu0  ;;  %v962_v35 = vpop.f32.mrb[37].mxu1  ;;  %v678_v6 = vadd.f32 %v2124_v59, %v677_v24 }
 0x164   : > { %1312 = vst.msk [vmem:[%s2135_s22 + $0x58] sm:$0xff] %vm370_vm0, %v1262_v28  ;;  %v1261_v10 = vsel %vm1161_vm12, %v953_v19, %v1211_v23  ;;  %v963_v33 = vadd.f32 %v962_v35, %v648_v21 }
 0x165   : > { %1311 = vst.msk [vmem:[%s2135_s22 + $0x50] sm:$0xff] %vm370_vm0, %v1261_v10  ;;  %vm1164_vm13 = vcmp.ge.f32.partialorder %v968_v31, 0.0  ;;  %v1214_v0 = vmul.f32 0.01, %v968_v31 }
 0x166   : > { %vm1163_vm14 = vcmp.ge.f32.partialorder %v963_v33, 0.0  ;;  %v1213_v29 = vmul.f32 0.01, %v963_v33  ;;  %v682_v40 = vpop.f32.mrb[38].mxu0  ;;  %v1552_v43 = vpop.f32.mrb[38].mxu1 }
 0x167   : > { %v1264_v47 = vsel %vm1164_vm13, %v968_v31, %v1214_v0  ;;  %v978_v48 = vadd.f32 %v1552_v43, %v663_v36  ;;  %v684_v51 = vpop.f32.mrb[39].mxu0  ;;  %v972_v52 = vpop.f32.mrb[39].mxu1  ;;  %v683_v49 = vadd.f32 %v2124_v59, %v682_v40 }
 0x168   : > { %1314 = vst.msk [vmem:[%s2135_s22 + $0x68] sm:$0xff] %vm370_vm0, %v1264_v47  ;;  %v1263_v44 = vsel %vm1163_vm14, %v963_v33, %v1213_v29  ;;  %v973_v55 = vadd.f32 %v972_v52, %v658_v39 }
 0x169   : > { %1313 = vst.msk [vmem:[%s2135_s22 + $0x60] sm:$0xff] %vm370_vm0, %v1263_v44  ;;  %vm1166_vm15 = vcmp.ge.f32.partialorder %v978_v48, 0.0  ;;  %v1216_v25 = vmul.f32 0.01, %v978_v48 }
 0x16a   : > { %vm1165_vm1 = vcmp.ge.f32.partialorder %v973_v55, 0.0  ;;  %v1215_v60 = vmul.f32 0.01, %v973_v55  ;;  %v687_v37 = vpop.f32.mrb[40].mxu0  ;;  %v1555_v61 = vpop.f32.mrb[40].mxu1 }
 0x16b   : > { %v1266_v62 = vsel %vm1166_vm15, %v978_v48, %v1216_v25  ;;  %v988_v1 = vadd.f32 %v1555_v61, %v673_v41  ;;  %v689_v2 = vpop.f32.mrb[41].mxu0  ;;  %v982_v3 = vpop.f32.mrb[41].mxu1  ;;  %v688_v19 = vadd.f32 %v2124_v59, %v687_v37 }
 0x16c   : > { %1316 = vst.msk [vmem:[%s2135_s22 + $0x78] sm:$0xff] %vm370_vm0, %v1266_v62  ;;  %v1265_v4 = vsel %vm1165_vm1, %v973_v55, %v1215_v60  ;;  %v983_v5 = vadd.f32 %v982_v3, %v668_v56 }
 0x16d   : > { %1315 = vst.msk [vmem:[%s2135_s22 + $0x70] sm:$0xff] %vm370_vm0, %v1265_v4  ;;  %vm1168_vm2 = vcmp.ge.f32.partialorder %v988_v1, 0.0  ;;  %v1218_v63 = vmul.f32 0.01, %v988_v1 }
 0x16e   : > { %vm1167_vm3 = vcmp.ge.f32.partialorder %v983_v5, 0.0  ;;  %v1217_v7 = vmul.f32 0.01, %v983_v5  ;;  %v692_v45 = vpop.f32.mrb[42].mxu0  ;;  %v1558_v8 = vpop.f32.mrb[42].mxu1 }
 0x16f   : > { %v1268_v9 = vsel %vm1168_vm2, %v988_v1, %v1218_v63  ;;  %v998_v11 = vadd.f32 %v1558_v8, %v683_v49  ;;  %v694_v12 = vpop.f32.mrb[43].mxu0  ;;  %v992_v13 = vpop.f32.mrb[43].mxu1  ;;  %v693_v17 = vadd.f32 %v2124_v59, %v692_v45 }
 0x170   : > { %1318 = vst.msk [vmem:[%s2135_s22 + $0x88] sm:$0xff] %vm370_vm0, %v1268_v9  ;;  %v1267_v15 = vsel %vm1167_vm3, %v983_v5, %v1217_v7  ;;  %v993_v16 = vadd.f32 %v992_v13, %v678_v6 }
 0x171   : > { %1317 = vst.msk [vmem:[%s2135_s22 + $0x80] sm:$0xff] %vm370_vm0, %v1267_v15  ;;  %vm1170_vm4 = vcmp.ge.f32.partialorder %v998_v11, 0.0  ;;  %v1220_v57 = vmul.f32 0.01, %v998_v11 }
 0x172   : > { %vm1169_vm5 = vcmp.ge.f32.partialorder %v993_v16, 0.0  ;;  %v1219_v20 = vmul.f32 0.01, %v993_v16  ;;  %v697_v53 = vpop.f32.mrb[44].mxu0  ;;  %v1561_v21 = vpop.f32.mrb[44].mxu1 }
 0x173   : > { %v1270_v23 = vsel %vm1170_vm4, %v998_v11, %v1220_v57  ;;  %v1008_v24 = vadd.f32 %v1561_v21, %v693_v17  ;;  %v699_v27 = vpop.f32.mrb[45].mxu0  ;;  %v1002_v28 = vpop.f32.mrb[45].mxu1  ;;  %v698_v10 = vadd.f32 %v2124_v59, %v697_v53 }
 0x174   : > { %1320 = vst.msk [vmem:[%s2135_s22 + $0x98] sm:$0xff] %vm370_vm0, %v1270_v23  ;;  %v1269_v31 = vsel %vm1169_vm5, %v993_v16, %v1219_v20  ;;  %v1003_v32 = vadd.f32 %v1002_v28, %v688_v19 }
 0x175   : > { %1319 = vst.msk [vmem:[%s2135_s22 + $0x90] sm:$0xff] %vm370_vm0, %v1269_v31  ;;  %vm1172_vm6 = vcmp.ge.f32.partialorder %v1008_v24, 0.0  ;;  %v1222_v35 = vmul.f32 0.01, %v1008_v24 }
 0x176   : > { %vm1171_vm7 = vcmp.ge.f32.partialorder %v1003_v32, 0.0  ;;  %v1221_v33 = vmul.f32 0.01, %v1003_v32  ;;  %v702_v36 = vpop.f32.mrb[46].mxu0  ;;  %v1564_v0 = vpop.f32.mrb[46].mxu1 }
 0x177   : > { %v1272_v39 = vsel %vm1172_vm6, %v1008_v24, %v1222_v35  ;;  %v703_v29 = vadd.f32 %v2124_v59, %v702_v36  ;;  %v704_v40 = vpop.f32.mrb[47].mxu0  ;;  %v1012_v43 = vpop.f32.mrb[47].mxu1 }
 0x178   : > { %1322 = vst.msk [vmem:[%s2135_s22 + $0xa8] sm:$0xff] %vm370_vm0, %v1272_v39  ;;  %v1271_v47 = vsel %vm1171_vm7, %v1003_v32, %v1221_v33  ;;  %v1013_v48 = vadd.f32 %v1012_v43, %v698_v10 }
 0x179   : > { %1321 = vst.msk [vmem:[%s2135_s22 + $0xa0] sm:$0xff] %vm370_vm0, %v1271_v47  ;;  %v1018_v51 = vadd.f32 %v1564_v0, %v703_v29 }
 0x17a   : > { %vm1173_vm8 = vcmp.ge.f32.partialorder %v1013_v48, 0.0  ;;  %v1223_v52 = vmul.f32 0.01, %v1013_v48  ;;  %v707_v44 = vpop.f32.mrb[48].mxu0  ;;  %v1567_v55 = vpop.f32.mrb[48].mxu1 }
 0x17b   : > { %vm1174_vm9 = vcmp.ge.f32.partialorder %v1018_v51, 0.0  ;;  %v1224_v41 = vmul.f32 0.01, %v1018_v51  ;;  %v708_v25 = vadd.f32 %v2124_v59, %v707_v44  ;;  %v709_v56 = vpop.f32.mrb[49].mxu0  ;;  %v1022_v60 = vpop.f32.mrb[49].mxu1 }
 0x17c   : > { %v1273_v37 = vsel %vm1173_vm8, %v1013_v48, %v1223_v52  ;;  %v783_v56 = vadd.f32 %v2124_v59, %v2089_v18 }
 0x17d   : > { %v1274_v61 = vsel %vm1174_vm9, %v1018_v51, %v1224_v41  ;;  %1323 = vst.msk [vmem:[%s2135_s22 + $0xb0] sm:$0xff] %vm370_vm0, %v1273_v37  ;;  %v1023_v62 = vadd.f32 %v1022_v60, %v708_v25 }
 0x17e   : > { %1324 = vst.msk [vmem:[%s2135_s22 + $0xb8] sm:$0xff] %vm370_vm0, %v1274_v61  ;;  %v712_v1 = vpop.f32.mrb[50].mxu0  ;;  %v1570_v2 = vpop.f32.mrb[50].mxu1  ;;  %v778_v61 = vadd.f32 %v2124_v59, %v2087_v14  ;;  %v788_v14 = vadd.f32 %v2124_v59, %v2091_v22 }
 0x17f   : > { %vm1175_vm10 = vcmp.ge.f32.partialorder %v1023_v62, 0.0  ;;  %v1225_v3 = vmul.f32 0.01, %v1023_v62  ;;  %v713_v4 = vadd.f32 %v2124_v59, %v712_v1  ;;  %v714_v5 = vpop.f32.mrb[51].mxu0  ;;  %v1032_v49 = vpop.f32.mrb[51].mxu1 }
 0x181   : > { %v1275_v63 = vsel %vm1175_vm10, %v1023_v62, %v1225_v3  ;;  %v1028_v6 = vadd.f32 %v1567_v55, %v713_v4 }
 0x182   : > { %1325 = vst.msk [vmem:[%s2135_s22 + $0xc0] sm:$0xff] %vm370_vm0, %v1275_v63  ;;  %v717_v7 = vpop.f32.mrb[52].mxu0  ;;  %v1573_v45 = vpop.f32.mrb[52].mxu1 }
 0x183   : > { %vm1176_vm11 = vcmp.ge.f32.partialorder %v1028_v6, 0.0  ;;  %v1226_v8 = vmul.f32 0.01, %v1028_v6  ;;  %v718_v9 = vadd.f32 %v2124_v59, %v717_v7  ;;  %v719_v11 = vpop.f32.mrb[53].mxu0  ;;  %v1042_v12 = vpop.f32.mrb[53].mxu1 }
 0x185   : > { %v1276_v13 = vsel %vm1176_vm11, %v1028_v6, %v1226_v8  ;;  %v1033_v15 = vadd.f32 %v1032_v49, %v718_v9 }
 0x186   : > { %1326 = vst.msk [vmem:[%s2135_s22 + $0xc8] sm:$0xff] %vm370_vm0, %v1276_v13  ;;  %v722_v16 = vpop.f32.mrb[54].mxu0  ;;  %v1576_v17 = vpop.f32.mrb[54].mxu1 }
 0x187   : > { %vm1177_vm12 = vcmp.ge.f32.partialorder %v1033_v15, 0.0  ;;  %v1227_v57 = vmul.f32 0.01, %v1033_v15  ;;  %v723_v19 = vadd.f32 %v2124_v59, %v722_v16  ;;  %v724_v20 = vpop.f32.mrb[55].mxu0  ;;  %v1052_v53 = vpop.f32.mrb[55].mxu1 }
 0x189   : > { %v1277_v21 = vsel %vm1177_vm12, %v1033_v15, %v1227_v57  ;;  %v1038_v23 = vadd.f32 %v1570_v2, %v723_v19  ;;  %v803_v19 = vadd.f32 %v2124_v59, %v2097_v34 }
 0x18a   : > { %1327 = vst.msk [vmem:[%s2135_s22 + $0xd0] sm:$0xff] %vm370_vm0, %v1277_v21  ;;  %v727_v24 = vpop.f32.mrb[56].mxu0  ;;  %v2228_v27 = vpop.f32.mrb[56].mxu1 }
 0x18b   : > { %vm1178_vm13 = vcmp.ge.f32.partialorder %v1038_v23, 0.0  ;;  %v1228_v28 = vmul.f32 0.01, %v1038_v23  ;;  %v728_v31 = vadd.f32 %v2124_v59, %v727_v24  ;;  %v729_v32 = vpop.f32.mrb[57].mxu0  ;;  %v1062_v35 = vpop.f32.mrb[57].mxu1  ;;  %v798_v24 = vadd.f32 %v2124_v59, %v2095_v30 }
 0x18d   : > { %v1278_v10 = vsel %vm1178_vm13, %v1038_v23, %v1228_v28  ;;  %v1043_v33 = vadd.f32 %v1042_v12, %v728_v31 }
 0x18e   : > { %1328 = vst.msk [vmem:[%s2135_s22 + $0xd8] sm:$0xff] %vm370_vm0, %v1278_v10  ;;  %v732_v36 = vpop.f32.mrb[58].mxu0  ;;  %v2233_v0 = vpop.f32.mrb[58].mxu1 }
 0x18f   : > { %vm1179_vm14 = vcmp.ge.f32.partialorder %v1043_v33, 0.0  ;;  %v1229_v39 = vmul.f32 0.01, %v1043_v33  ;;  %v733_v29 = vadd.f32 %v2124_v59, %v732_v36  ;;  %v734_v40 = vpop.f32.mrb[59].mxu0  ;;  %v2236_v43 = vpop.f32.mrb[59].mxu1 }
 0x190   : > { %v813_v40 = vadd.f32 %v2124_v59, %v2103_v42 }
 0x191   : > { %v1279_v47 = vsel %vm1179_vm14, %v1043_v33, %v1229_v39  ;;  %v1048_v48 = vadd.f32 %v1573_v45, %v733_v29  ;;  %v793_v45 = vadd.f32 %v2124_v59, %v2093_v26  ;;  %v808_v29 = vadd.f32 %v2124_v59, %v2101_v38 }
 0x192   : > { %1329 = vst.msk [vmem:[%s2135_s22 + $0xe0] sm:$0xff] %vm370_vm0, %v1279_v47  ;;  %v737_v51 = vpop.f32.mrb[60].mxu0  ;;  %v2240_v52 = vpop.f32.mrb[60].mxu1 }
 0x193   : > { %vm1180_vm15 = vcmp.ge.f32.partialorder %v1048_v48, 0.0  ;;  %v1230_v44 = vmul.f32 0.01, %v1048_v48  ;;  %v738_v55 = vadd.f32 %v2124_v59, %v737_v51  ;;  %v739_v41 = vpop.f32.mrb[61].mxu0  ;;  %v2243_v25 = vpop.f32.mrb[61].mxu1 }
 0x195   : > { %v1280_v60 = vsel %vm1180_vm15, %v1048_v48, %v1230_v44  ;;  %v1053_v37 = vadd.f32 %v1052_v53, %v738_v55  ;;  %v818_v48 = vadd.f32 %v2124_v59, %v2107_v46 }
 0x196   : > { %1330 = vst.msk [vmem:[%s2135_s22 + $0xe8] sm:$0xff] %vm370_vm0, %v1280_v60  ;;  %v742_v62 = vpop.f32.mrb[62].mxu0  ;;  %v1588_v1 = vpop.f32.mrb[62].mxu1 }
 0x197   : > { %vm1181_vm1 = vcmp.ge.f32.partialorder %v1053_v37, 0.0  ;;  %v1231_v2 = vmul.f32 0.01, %v1053_v37  ;;  %v743_v3 = vadd.f32 %v2124_v59, %v742_v62  ;;  %v1098_v4 = vadd.f32 %v1588_v1, %v783_v56  ;;  %v744_v5 = vpop.f32.mrb[63].mxu0  ;;  %v1092_v49 = vpop.f32.mrb[63].mxu1 }
 0x198   : > { %v1093_v63 = vadd.f32 %v1092_v49, %v778_v61 }
 0x199   : > { %v1281_v6 = vsel %vm1181_vm1, %v1053_v37, %v1231_v2  ;;  %v1058_v18 = vadd.f32 %v1576_v17, %v743_v3  ;;  %vm1190_vm2 = vcmp.ge.f32.partialorder %v1098_v4, 0.0  ;;  %v1240_v7 = vmul.f32 0.01, %v1098_v4 }
 0x19a   : > { %1331 = vst.msk [vmem:[%s2135_s22 + $0xf0] sm:$0xff] %vm370_vm0, %v1281_v6  ;;  %vm1189_vm3 = vcmp.ge.f32.partialorder %v1093_v63, 0.0  ;;  %v1239_v8 = vmul.f32 0.01, %v1093_v63  ;;  %v747_v9 = vpop.f32.mrb[64].mxu0  ;;  %v1591_v11 = vpop.f32.mrb[64].mxu1  ;;  %v823_v3 = vadd.f32 %v2124_v59, %v2111_v50 }
 0x19b   : > { %vm1182_vm4 = vcmp.ge.f32.partialorder %v1058_v18, 0.0  ;;  %v1232_v12 = vmul.f32 0.01, %v1058_v18  ;;  %v1290_v13 = vsel %vm1190_vm2, %v1098_v4, %v1240_v7  ;;  %v748_v15 = vadd.f32 %v2124_v59, %v747_v9  ;;  %v749_v16 = vpop.f32.mrb[65].mxu0  ;;  %v1102_v17 = vpop.f32.mrb[65].mxu1 }
 0x19c   : > { %1340 = vst.msk [vmem:[%s2135_s22 + $0x138] sm:$0xff] %vm370_vm0, %v1290_v13  ;;  %v1289_v22 = vsel %vm1189_vm3, %v1093_v63, %v1239_v8  ;;  %v1108_v57 = vadd.f32 %v1591_v11, %v793_v45  ;;  %v1103_v26 = vadd.f32 %v1102_v17, %v788_v14  ;;  %v833_v9 = vadd.f32 %v2124_v59, %v2119_v58 }
 0x19d   : > { %v1282_v20 = vsel %vm1182_vm4, %v1058_v18, %v1232_v12  ;;  %1339 = vst.msk [vmem:[%s2135_s22 + $0x130] sm:$0xff] %vm370_vm0, %v1289_v22  ;;  %v1063_v53 = vadd.f32 %v1062_v35, %v748_v15  ;;  %v828_v16 = vadd.f32 %v2124_v59, %v2115_v54 }
 0x19e   : > { %1332 = vst.msk [vmem:[%s2135_s22 + $0xf8] sm:$0xff] %vm370_vm0, %v1282_v20  ;;  %vm1192_vm5 = vcmp.ge.f32.partialorder %v1108_v57, 0.0  ;;  %v1242_v21 = vmul.f32 0.01, %v1108_v57  ;;  %vm1191_vm6 = vcmp.ge.f32.partialorder %v1103_v26, 0.0  ;;  %v752_v31 = vpop.f32.mrb[66].mxu0 }
 0x19f   : > { %v1241_v23 = vmul.f32 0.01, %v1103_v26  ;;  %vm1183_vm7 = vcmp.ge.f32.partialorder %v1063_v53, 0.0  ;;  %v1233_v28 = vmul.f32 0.01, %v1063_v53  ;;  %v1594_v34 = vpop.f32.mrb[66].mxu1  ;;  %v753_v35 = vadd.f32 %v2124_v59, %v752_v31 }
 0x1a0   : > { %v1292_v32 = vsel %vm1192_vm5, %v1108_v57, %v1242_v21  ;;  %v1118_v33 = vadd.f32 %v1594_v34, %v803_v19  ;;  %v754_v36 = vpop.f32.mrb[67].mxu0  ;;  %v1112_v39 = vpop.f32.mrb[67].mxu1 }
 0x1a1   : > { %v1291_v10 = vsel %vm1191_vm6, %v1103_v26, %v1241_v23  ;;  %v1283_v47 = vsel %vm1183_vm7, %v1063_v53, %v1233_v28  ;;  %1342 = vst.msk [vmem:[%s2135_s22 + $0x148] sm:$0xff] %vm370_vm0, %v1292_v32  ;;  %v1113_v30 = vadd.f32 %v1112_v39, %v798_v24  ;;  %v1068_v51 = vadd.f32 %v2228_v27, %v753_v35 }
 0x1a2   : > { %1341 = vst.msk [vmem:[%s2135_s22 + $0x140] sm:$0xff] %vm370_vm0, %v1291_v10  ;;  %1333 = vst.msk [vmem:[%s2135_s22 + $0x100] sm:$0xff] %vm370_vm0, %v1283_v47  ;;  %vm1194_vm8 = vcmp.ge.f32.partialorder %v1118_v33, 0.0  ;;  %v1244_v44 = vmul.f32 0.01, %v1118_v33  ;;  %v757_v38 = vpop.f32.mrb[68].mxu0 }
 0x1a3   : > { %v1597_v55 = vpop.f32.mrb[68].mxu1  ;;  %vm1193_vm9 = vcmp.ge.f32.partialorder %v1113_v30, 0.0  ;;  %v1243_v42 = vmul.f32 0.01, %v1113_v30  ;;  %v758_v41 = vadd.f32 %v2124_v59, %v757_v38  ;;  %v759_v60 = vpop.f32.mrb[69].mxu0  ;;  %vm1184_vm10 = vcmp.ge.f32.partialorder %v1068_v51, 0.0 }
 0x1a4   : > { %v1128_v56 = vadd.f32 %v1597_v55, %v813_v40  ;;  %v1122_v37 = vpop.f32.mrb[69].mxu1  ;;  %v1234_v46 = vmul.f32 0.01, %v1068_v51  ;;  %v1294_v61 = vsel %vm1194_vm8, %v1118_v33, %v1244_v44 }
 0x1a5   : > { %v1123_v62 = vadd.f32 %v1122_v37, %v808_v29  ;;  %1344 = vst.msk [vmem:[%s2135_s22 + $0x158] sm:$0xff] %vm370_vm0, %v1294_v61  ;;  %v1293_v27 = vsel %vm1193_vm9, %v1113_v30, %v1243_v42  ;;  %v1073_v1 = vadd.f32 %v2236_v43, %v758_v41 }
 0x1a6   : > { %vm1196_vm11 = vcmp.ge.f32.partialorder %v1128_v56, 0.0  ;;  %v1246_v2 = vmul.f32 0.01, %v1128_v56  ;;  %v1284_v4 = vsel %vm1184_vm10, %v1068_v51, %v1234_v46  ;;  %1343 = vst.msk [vmem:[%s2135_s22 + $0x150] sm:$0xff] %vm370_vm0, %v1293_v27  ;;  %v762_v49 = vpop.f32.mrb[70].mxu0  ;;  %v1600_v63 = vpop.f32.mrb[70].mxu1 }
 0x1a7   : > { %vm1195_vm12 = vcmp.ge.f32.partialorder %v1123_v62, 0.0  ;;  %v1245_v5 = vmul.f32 0.01, %v1123_v62  ;;  %1334 = vst.msk [vmem:[%s2135_s22 + $0x108] sm:$0xff] %vm370_vm0, %v1284_v4  ;;  %vm1185_vm13 = vcmp.ge.f32.partialorder %v1073_v1, 0.0  ;;  %v763_v18 = vadd.f32 %v2124_v59, %v762_v49  ;;  %v764_v7 = vpop.f32.mrb[71].mxu0 }
 0x1a8   : > { %v1235_v6 = vmul.f32 0.01, %v1073_v1  ;;  %v1296_v43 = vsel %vm1196_vm11, %v1128_v56, %v1246_v2  ;;  %v1132_v14 = vpop.f32.mrb[71].mxu1  ;;  %v1138_v45 = vadd.f32 %v1600_v63, %v823_v3 }
 0x1a9   : > { %1346 = vst.msk [vmem:[%s2135_s22 + $0x168] sm:$0xff] %vm370_vm0, %v1296_v43  ;;  %v1295_v50 = vsel %vm1195_vm12, %v1123_v62, %v1245_v5  ;;  %v1133_v8 = vadd.f32 %v1132_v14, %v818_v48  ;;  %v1078_v12 = vadd.f32 %v2233_v0, %v763_v18 }
 0x1aa   : > { %v1285_v11 = vsel %vm1185_vm13, %v1073_v1, %v1235_v6  ;;  %1345 = vst.msk [vmem:[%s2135_s22 + $0x160] sm:$0xff] %vm370_vm0, %v1295_v50  ;;  %vm1198_vm14 = vcmp.ge.f32.partialorder %v1138_v45, 0.0  ;;  %v1248_v13 = vmul.f32 0.01, %v1138_v45  ;;  %v767_v58 = vpop.f32.mrb[72].mxu0  ;;  %v1603_v22 = vpop.f32.mrb[72].mxu1 }
 0x1ab   : > { %1335 = vst.msk [vmem:[%s2135_s22 + $0x110] sm:$0xff] %vm370_vm0, %v1285_v11  ;;  %vm1197_vm15 = vcmp.ge.f32.partialorder %v1133_v8, 0.0  ;;  %v1247_v15 = vmul.f32 0.01, %v1133_v8  ;;  %vm1186_vm1 = vcmp.ge.f32.partialorder %v1078_v12, 0.0  ;;  %v768_v0 = vadd.f32 %v2124_v59, %v767_v58  ;;  %v769_v20 = vpop.f32.mrb[73].mxu0 }
 0x1ac   : > { %v1236_v17 = vmul.f32 0.01, %v1078_v12  ;;  %v1298_v57 = vsel %vm1198_vm14, %v1138_v45, %v1248_v13  ;;  %v1148_v19 = vadd.f32 %v1603_v22, %v833_v9  ;;  %v1142_v53 = vpop.f32.mrb[73].mxu1 }
 0x1ad   : > { %v1297_v26 = vsel %vm1197_vm15, %v1133_v8, %v1247_v15  ;;  %1348 = vst.msk [vmem:[%s2135_s22 + $0x178] sm:$0xff] %vm370_vm0, %v1298_v57  ;;  %v1143_v23 = vadd.f32 %v1142_v53, %v828_v16  ;;  %v1083_v54 = vadd.f32 %v2243_v25, %v768_v0 }
 0x1ae   : > { %v1286_v21 = vsel %vm1186_vm1, %v1078_v12, %v1236_v17  ;;  %1347 = vst.msk [vmem:[%s2135_s22 + $0x170] sm:$0xff] %vm370_vm0, %v1297_v26  ;;  %vm1200_vm2 = vcmp.ge.f32.partialorder %v1148_v19, 0.0  ;;  %v1250_v24 = vmul.f32 0.01, %v1148_v19  ;;  %v772_v28 = vpop.f32.mrb[74].mxu0 }
 0x1af   : > { %1336 = vst.msk [vmem:[%s2135_s22 + $0x118] sm:$0xff] %vm370_vm0, %v1286_v21  ;;  %vm1199_vm3 = vcmp.ge.f32.partialorder %v1143_v23, 0.0  ;;  %v1249_v31 = vmul.f32 0.01, %v1143_v23  ;;  %v773_v34 = vadd.f32 %v2124_v59, %v772_v28  ;;  %v774_v32 = vpop.f32.mrb[75].mxu0  ;;  %vm1187_vm4 = vcmp.ge.f32.partialorder %v1083_v54, 0.0 }
 0x1b0   : > { %v1237_v10 = vmul.f32 0.01, %v1083_v54  ;;  %v1300_v35 = vsel %vm1200_vm2, %v1148_v19, %v1250_v24 }
 0x1b1   : > { %1350 = vst.msk [vmem:[%s2135_s22 + $0x188] sm:$0xff] %vm370_vm0, %v1300_v35  ;;  %v1299_v33 = vsel %vm1199_vm3, %v1143_v23, %v1249_v31  ;;  %v1088_v36 = vadd.f32 %v2240_v52, %v773_v34 }
 0x1b2   : > { %v1287_v39 = vsel %vm1187_vm4, %v1083_v54, %v1237_v10  ;;  %1349 = vst.msk [vmem:[%s2135_s22 + $0x180] sm:$0xff] %vm370_vm0, %v1299_v33 }
 0x1b3   : > { %1337 = vst.msk [vmem:[%s2135_s22 + $0x120] sm:$0xff] %vm370_vm0, %v1287_v39  ;;  %vm1188_vm5 = vcmp.ge.f32.partialorder %v1088_v36, 0.0  ;;  %v1238_v25 = vmul.f32 0.01, %v1088_v36 }
 0x1b5   : > { %v1288_v29 = vsel %vm1188_vm5, %v1088_v36, %v1238_v25 }
 0x1b6   : > { %1338 = vst.msk [vmem:[%s2135_s22 + $0x128] sm:$0xff] %vm370_vm0, %v1288_v29 }
 0x1b7 PF: > { %s13_s12 = sadd.s32 1, %s1708_s12  }
 0x1b8   : > { %p10_p4 = scmp.ge.s32.totalorder %s13_s12, 4  }
 0x1ba   :  { %12 = sbr.rel (!%p10_p4) target bundleno = 1 (0x1), region = 62 }

// kernel: _forward_arrays.14
= control target key start
LH: loop header
LB: loop body
LE: loop exit
PB: predicated region body
PF: predicated region fallthrough
CT: control target
= control target key end

     0   :  { %s1685_s26 = smov 0   ;;  %s2017_s0 = inlined_call_operand.vmem [shape: f32[2,12800], index: 0, kind: input, shape index: {}]   ;;  %s2018_s1 = inlined_call_operand.vmem [shape: f32[12800,128], index: 1, kind: input, shape index: {}]   ;;  %s2019_s2 = inlined_call_operand.vmem [shape: f32[1,128], index: 2, kind: input, shape index: {}]   ;;  %s2020_s3 = inlined_call_operand.vmem [shape: f32[128,128], index: 3, kind: input, shape index: {}]   ;;  %s2021_s4 = inlined_call_operand.vmem [shape: f32[1,128], index: 4, kind: input, shape index: {}]   ;;  %s2022_s5 = inlined_call_operand.vmem [shape: f32[128,1], index: 5, kind: input, shape index: {}]   ;;  %s2023_s6 = inlined_call_operand.<no memory space> [shape: f32[1,1], index: 6, kind: input, shape index: {}]   ;;  %s2024_s7 = inlined_call_operand.vmem [shape: f32[2,1], index: 7, kind: output, shape index: {}]  }
   0x1   :  { %v12_v0 = vstv %s2023_s6 }
   0x2   :  { %13 = vst [vmem:[#allocation3] sm:$0x1] %v12_v0 }
   0x3 LB: > { %s1691_s27 = sadd.s32 4294967295, %s1635_s26   ;;  %p1116_p0 = scmp.ge.s32.totalorder %s1635_s26, 1  ;;  %s1635_s26 = sphi %s1685_s26, %s19_s26  }
   0x4   : > { %p246_p1 = scmp.lt.s32.totalorder %s1635_s26, 11 }
   0x6   : > { %p247_p2 = pnand %p1116_p0, %p246_p1 }
   0x7   : > { %s278_s6 = smul.u32 (!%p247_p2), 10, %s1691_s27  ;;  %p1119_p5 = scmp.ne.s32.totalorder (!%p247_p2), %s1691_s27, 0 }
   0x8   : > { %250 = sbr.rel (%p247_p2) target bundleno = 789 (0x315), region = 48 }
   0x9   : > { %s284_s28 = smul.u32 (!%p247_p2), 160, %s1691_s27  ;;  %p279_p3 = scmp.lt.s32.totalorder (!%p247_p2), %s278_s6, 99 }
   0xb   : > { %p285_p4 = scmp.lt.s32.totalorder (!%p247_p2), %s284_s28, 1599 }
   0xf   : > { %s2026_s6 = smov (!%p279_p3, %s278_s6), 99  ;;  %s2028_s28 = smov (!%p285_p4, %s284_s28), 1599 }
  0x10   : > { %s1117_s29 = sshll.u32 %s2026_s6, 1  ;;  %s1118_s10 = sshll.u32 %s2028_s28, 3  ;;  %v1637_v1 = vmov (!%p1119_p5), 0.0  }
  0x11   : > { %s1700_s9 = scalar_lea.vmem %s2017_s0, %s1117_s29  ;;  %s1705_s13 = scalar_lea.vmem %s2018_s1, %s1118_s10  ;;  %294 = vst [vmem:[#allocation2] sm:$0x3] (!%p1119_p5), %v1637_v1 }
  0x12   : > { %293 = sbr.rel (%p1119_p5) target bundleno = 25 (0x19), region = 52 }
  0x19 PF: > { %v315_v2 = vld [vmem:[%s1705_s13 + $0x80] sm:$0xff]  ;;  %v316_v3 = vld [vmem:[%s1705_s13 + $0x88] sm:$0xff]  ;;  %v317_v13 = vld [vmem:[%s1705_s13 + $0x90] sm:$0xff]  ;;  %v1638_v49 = vmov 1983009808   ;;  %v466_v51 = vlaneseq  ;;  %p1121_p6 = scmp.ne.s32.totalorder %s1691_s27, 9 }
  0x1a   : > { %v347_v4 = vld [vmem:[%s1705_s13 + $0x180] sm:$0xff]  ;;  %v1406_v5 = vpack.c.bf16 %v316_v3, %v315_v2  ;;  %v348_v6 = vld [vmem:[%s1705_s13 + $0x188] sm:$0xff]  ;;  %v318_v15 = vld [vmem:[%s1705_s13 + $0x98] sm:$0xff]  ;;  %v464_v50 = vunpack.c.l.s4 %v1638_v49  ;;  %vm1640_vm0 = vmmov (!%p1121_p6), 0   ;;  %vm1071_vm3 = vcmask (!%p1121_p6), 1024  }
  0x1b   : > { %v299_v7 = vld [vmem:[%s1705_s13] sm:$0xff]  ;;  %v300_v8 = vld [vmem:[%s1705_s13 + $0x8] sm:$0xff]  ;;  %v1438_v9 = vpack.c.bf16 %v348_v6, %v347_v4  ;;  %v349_v16 = vld [vmem:[%s1705_s13 + $0x190] sm:$0xff]  ;;  %v1410_v18 = vpack.c.bf16 %v318_v15, %v317_v13  ;;  %v467_v2 = vshrl.u32 %v466_v51, 7 }
  0x1c   : > { %v1408_v10 = vpack.c.bf16 %v300_v8, %v299_v7  ;;  %v331_v11 = vld [vmem:[%s1705_s13 + $0x100] sm:$0xff]  ;;  %v332_v12 = vld [vmem:[%s1705_s13 + $0x108] sm:$0xff]  ;;  %1407 = vmatprep.subr.bf16.mxu0 %v1406_v5  ;;  %v350_v17 = vld [vmem:[%s1705_s13 + $0x198] sm:$0xff]  ;;  %v465_v1 = vunpack.c.0.s8 %v464_v50 }
  0x1d   : > { %v1440_v14 = vpack.c.bf16 %v332_v12, %v331_v11  ;;  %1439 = vmatprep.subr.bf16.mxu1 %v1438_v9  ;;  %v1442_v19 = vpack.c.bf16 %v350_v17, %v349_v16  ;;  %v301_v20 = vld [vmem:[%s1705_s13 + $0x10] sm:$0xff]  ;;  %v302_v21 = vld [vmem:[%s1705_s13 + $0x18] sm:$0xff]  ;;  %v319_v25 = vld [vmem:[%s1705_s13 + $0xa0] sm:$0xff] }
  0x1e   : > { %1409 = vmatpush3.bf16.msra.mxu0 %v1408_v10  ;;  %v333_v22 = vld [vmem:[%s1705_s13 + $0x110] sm:$0xff]  ;;  %v1412_v23 = vpack.c.bf16 %v302_v21, %v301_v20  ;;  %v334_v24 = vld [vmem:[%s1705_s13 + $0x118] sm:$0xff]  ;;  %v320_v26 = vld [vmem:[%s1705_s13 + $0xa8] sm:$0xff]  ;;  %v1758_v15 = vsub.s32 %v465_v1, %v467_v2 }
  0x1f   : > { %1441 = vmatpush3.bf16.msra.mxu1 %v1440_v14  ;;  %1411 = vmatprep.subr.bf16.mxu0 %v1410_v18  ;;  %v1444_v27 = vpack.c.bf16 %v334_v24, %v333_v22  ;;  %v1414_v28 = vpack.c.bf16 %v320_v26, %v319_v25  ;;  %v351_v29 = vld [vmem:[%s1705_s13 + $0x1a0] sm:$0xff]  ;;  %v352_v30 = vld [vmem:[%s1705_s13 + $0x1a8] sm:$0xff]  ;;  %v321_v37 = vld [vmem:[%s1705_s13 + $0xb0] sm:$0xff] }
  0x20   : > { %1443 = vmatprep.subr.bf16.mxu1 %v1442_v19  ;;  %v303_v31 = vld [vmem:[%s1705_s13 + $0x20] sm:$0xff]  ;;  %v1446_v32 = vpack.c.bf16 %v352_v30, %v351_v29  ;;  %v304_v33 = vld [vmem:[%s1705_s13 + $0x28] sm:$0xff]  ;;  %v322_v38 = vld [vmem:[%s1705_s13 + $0xb8] sm:$0xff] }
  0x21   : > { %v335_v34 = vld [vmem:[%s1705_s13 + $0x120] sm:$0xff]  ;;  %v336_v35 = vld [vmem:[%s1705_s13 + $0x128] sm:$0xff]  ;;  %v1416_v36 = vpack.c.bf16 %v304_v33, %v303_v31  ;;  %v353_v39 = vld [vmem:[%s1705_s13 + $0x1b0] sm:$0xff]  ;;  %v1418_v41 = vpack.c.bf16 %v322_v38, %v321_v37 }
  0x22   : > { %1413 = vmatpush3.bf16.msra.mxu0 %v1412_v23  ;;  %v1448_v40 = vpack.c.bf16 %v336_v35, %v335_v34  ;;  %v354_v42 = vld [vmem:[%s1705_s13 + $0x1b8] sm:$0xff]  ;;  %v305_v43 = vld [vmem:[%s1705_s13 + $0x30] sm:$0xff]  ;;  %v323_v48 = vld [vmem:[%s1705_s13 + $0xc0] sm:$0xff] }
  0x23   : > { %1445 = vmatpush3.bf16.msra.mxu1 %v1444_v27  ;;  %1415 = vmatprep.subr.bf16.mxu0 %v1414_v28  ;;  %v306_v44 = vld [vmem:[%s1705_s13 + $0x38] sm:$0xff]  ;;  %v1450_v45 = vpack.c.bf16 %v354_v42, %v353_v39  ;;  %v337_v46 = vld [vmem:[%s1705_s13 + $0x130] sm:$0xff]  ;;  %v324_v52 = vld [vmem:[%s1705_s13 + $0xc8] sm:$0xff] }
  0x24   : > { %1447 = vmatprep.subr.bf16.mxu1 %v1446_v32  ;;  %v338_v47 = vld [vmem:[%s1705_s13 + $0x138] sm:$0xff]  ;;  %v355_v53 = vld [vmem:[%s1705_s13 + $0x1c0] sm:$0xff]  ;;  %v356_v54 = vld [vmem:[%s1705_s13 + $0x1c8] sm:$0xff]  ;;  %v1420_v55 = vpack.c.bf16 %v306_v44, %v305_v43  ;;  %v1422_v57 = vpack.c.bf16 %v324_v52, %v323_v48 }
  0x25   : > { %v1452_v56 = vpack.c.bf16 %v338_v47, %v337_v46  ;;  %v307_v58 = vld [vmem:[%s1705_s13 + $0x40] sm:$0xff]  ;;  %v308_v59 = vld [vmem:[%s1705_s13 + $0x48] sm:$0xff]  ;;  %v1454_v61 = vpack.c.bf16 %v356_v54, %v355_v53  ;;  %v325_v63 = vld [vmem:[%s1705_s13 + $0xd0] sm:$0xff] }
  0x26   : > { %1417 = vmatpush3.bf16.msra.mxu0 %v1416_v36  ;;  %v339_v60 = vld [vmem:[%s1705_s13 + $0x140] sm:$0xff]  ;;  %v340_v62 = vld [vmem:[%s1705_s13 + $0x148] sm:$0xff]  ;;  %v326_v0 = vld [vmem:[%s1705_s13 + $0xd8] sm:$0xff]  ;;  %v1424_v5 = vpack.c.bf16 %v308_v59, %v307_v58 }
  0x27   : > { %1449 = vmatpush3.bf16.msra.mxu1 %v1448_v40  ;;  %1419 = vmatprep.subr.bf16.mxu0 %v1418_v41  ;;  %v357_v3 = vld [vmem:[%s1705_s13 + $0x1d0] sm:$0xff]  ;;  %v358_v4 = vld [vmem:[%s1705_s13 + $0x1d8] sm:$0xff]  ;;  %v1456_v6 = vpack.c.bf16 %v340_v62, %v339_v60  ;;  %v1426_v7 = vpack.c.bf16 %v326_v0, %v325_v63  ;;  %v327_v13 = vld [vmem:[%s1705_s13 + $0xe0] sm:$0xff] }
  0x28   : > { %1451 = vmatprep.subr.bf16.mxu1 %v1450_v45  ;;  %v309_v8 = vld [vmem:[%s1705_s13 + $0x50] sm:$0xff]  ;;  %v310_v9 = vld [vmem:[%s1705_s13 + $0x58] sm:$0xff]  ;;  %v1458_v11 = vpack.c.bf16 %v358_v4, %v357_v3  ;;  %v328_v14 = vld [vmem:[%s1705_s13 + $0xe8] sm:$0xff] }
  0x29   : > { %v341_v10 = vld [vmem:[%s1705_s13 + $0x150] sm:$0xff]  ;;  %v342_v12 = vld [vmem:[%s1705_s13 + $0x158] sm:$0xff]  ;;  %v359_v16 = vld [vmem:[%s1705_s13 + $0x1e0] sm:$0xff]  ;;  %v1428_v18 = vpack.c.bf16 %v310_v9, %v309_v8  ;;  %v1430_v21 = vpack.c.bf16 %v328_v14, %v327_v13 }
  0x2a   : > { %1421 = vmatpush3.bf16.msra.mxu0 %v1420_v55  ;;  %v360_v17 = vld [vmem:[%s1705_s13 + $0x1e8] sm:$0xff]  ;;  %v311_v19 = vld [vmem:[%s1705_s13 + $0x60] sm:$0xff]  ;;  %v1460_v20 = vpack.c.bf16 %v342_v12, %v341_v10  ;;  %v329_v27 = vld [vmem:[%s1705_s13 + $0xf0] sm:$0xff] }
  0x2b   : > { %1453 = vmatpush3.bf16.msra.mxu1 %v1452_v56  ;;  %1423 = vmatprep.subr.bf16.mxu0 %v1422_v57  ;;  %v312_v22 = vld [vmem:[%s1705_s13 + $0x68] sm:$0xff]  ;;  %v343_v23 = vld [vmem:[%s1705_s13 + $0x160] sm:$0xff]  ;;  %v1462_v25 = vpack.c.bf16 %v360_v17, %v359_v16  ;;  %v330_v28 = vld [vmem:[%s1705_s13 + $0xf8] sm:$0xff] }
  0x2c   : > { %1455 = vmatprep.subr.bf16.mxu1 %v1454_v61  ;;  %v296_v24 = vld [vmem:[%s1700_s9] sm:$0xff]  ;;  %v344_v26 = vld [vmem:[%s1705_s13 + $0x168] sm:$0xff]  ;;  %v361_v31 = vld [vmem:[%s1705_s13 + $0x1f0] sm:$0xff]  ;;  %v1432_v33 = vpack.c.bf16 %v312_v22, %v311_v19  ;;  %v1434_v37 = vpack.c.bf16 %v330_v28, %v329_v27 }
  0x2d   : > { %v469_v29 = vrot.slane %v296_v24, %v1758_v15  ;;  %v462_v30 = vcombine.high %v296_v24, %v296_v24  ;;  %v362_v32 = vld [vmem:[%s1705_s13 + $0x1f8] sm:$0xff]  ;;  %v1464_v36 = vpack.c.bf16 %v344_v26, %v343_v23  ;;  %v313_v38 = vld [vmem:[%s1705_s13 + $0x70] sm:$0xff]  ;;  %v379_v44 = vld [vmem:[%s1705_s13 + $0x280] sm:$0xff] }
  0x2e   : > { %1425 = vmatpush3.bf16.msra.mxu0 %v1424_v5  ;;  %v314_v39 = vld [vmem:[%s1705_s13 + $0x78] sm:$0xff]  ;;  %v345_v40 = vld [vmem:[%s1705_s13 + $0x170] sm:$0xff]  ;;  %v1466_v41 = vpack.c.bf16 %v362_v32, %v361_v31  ;;  %v380_v45 = vld [vmem:[%s1705_s13 + $0x288] sm:$0xff] }
  0x2f   : > { %1457 = vmatpush3.bf16.msra.mxu1 %v1456_v6  ;;  %1427 = vmatprep.subr.bf16.mxu0 %v1426_v7  ;;  %v477_v34 = vcombine.high %v469_v29, %v469_v29  ;;  %v476_v35 = vrot.slane %v462_v30, %v1758_v15  ;;  %v346_v42 = vld [vmem:[%s1705_s13 + $0x178] sm:$0xff]  ;;  %v411_v46 = vld [vmem:[%s1705_s13 + $0x380] sm:$0xff]  ;;  %v412_v47 = vld [vmem:[%s1705_s13 + $0x388] sm:$0xff]  ;;  %v1436_v48 = vpack.c.bf16 %v314_v39, %v313_v38 }
  0x30   : > { %1459 = vmatprep.subr.bf16.mxu1 %v1458_v11  ;;  %v1468_v49 = vpack.c.bf16 %v346_v42, %v345_v40  ;;  %v1470_v50 = vpack.c.bf16 %v380_v45, %v379_v44  ;;  %v363_v51 = vld [vmem:[%s1705_s13 + $0x200] sm:$0xff]  ;;  %v364_v52 = vld [vmem:[%s1705_s13 + $0x208] sm:$0xff]  ;;  %v1502_v54 = vpack.c.bf16 %v412_v47, %v411_v46  ;;  %v381_v56 = vld [vmem:[%s1705_s13 + $0x290] sm:$0xff] }
  0x31   : > { %578 = vmatprep.mubr.f32.mxu0 %v477_v34  ;;  %v478_v43 = vcombine.high %v476_v35, %v476_v35  ;;  %v395_v53 = vld [vmem:[%s1705_s13 + $0x300] sm:$0xff]  ;;  %v396_v55 = vld [vmem:[%s1705_s13 + $0x308] sm:$0xff]  ;;  %v382_v57 = vld [vmem:[%s1705_s13 + $0x298] sm:$0xff]  ;;  %v1472_v60 = vpack.c.bf16 %v364_v52, %v363_v51 }
  0x32   : > { %1429 = vmatpush3.bf16.msra.mxu0 %v1428_v18  ;;  %v413_v58 = vld [vmem:[%s1705_s13 + $0x390] sm:$0xff]  ;;  %v414_v59 = vld [vmem:[%s1705_s13 + $0x398] sm:$0xff]  ;;  %v1504_v61 = vpack.c.bf16 %v396_v55, %v395_v53  ;;  %v1474_v62 = vpack.c.bf16 %v382_v57, %v381_v56  ;;  %v383_v4 = vld [vmem:[%s1705_s13 + $0x2a0] sm:$0xff] }
  0x33   : > { %1461 = vmatpush3.bf16.msra.mxu1 %v1460_v20  ;;  %1431 = vmatprep.subr.bf16.mxu0 %v1430_v21  ;;  %v365_v63 = vld [vmem:[%s1705_s13 + $0x210] sm:$0xff]  ;;  %v366_v0 = vld [vmem:[%s1705_s13 + $0x218] sm:$0xff]  ;;  %v1506_v2 = vpack.c.bf16 %v414_v59, %v413_v58  ;;  %v384_v5 = vld [vmem:[%s1705_s13 + $0x2a8] sm:$0xff] }
  0x34   : > { %1463 = vmatprep.subr.bf16.mxu1 %v1462_v25  ;;  %648 = vmatprep.mubr.f32.mxu1 %v478_v43  ;;  %v397_v1 = vld [vmem:[%s1705_s13 + $0x310] sm:$0xff]  ;;  %v398_v3 = vld [vmem:[%s1705_s13 + $0x318] sm:$0xff]  ;;  %v415_v6 = vld [vmem:[%s1705_s13 + $0x3a0] sm:$0xff]  ;;  %v1476_v8 = vpack.c.bf16 %v366_v0, %v365_v63  ;;  %v1478_v10 = vpack.c.bf16 %v384_v5, %v383_v4 }
  0x35   : > { %v416_v7 = vld [vmem:[%s1705_s13 + $0x3a8] sm:$0xff]  ;;  %v1508_v9 = vpack.c.bf16 %v398_v3, %v397_v1  ;;  %v367_v11 = vld [vmem:[%s1705_s13 + $0x220] sm:$0xff]  ;;  %v385_v17 = vld [vmem:[%s1705_s13 + $0x2b0] sm:$0xff] }
  0x36   : > { %1433 = vmatpush3.bf16.msra.mxu0 %v1432_v33  ;;  %v368_v12 = vld [vmem:[%s1705_s13 + $0x228] sm:$0xff]  ;;  %v399_v13 = vld [vmem:[%s1705_s13 + $0x320] sm:$0xff]  ;;  %v1510_v14 = vpack.c.bf16 %v416_v7, %v415_v6  ;;  %v386_v18 = vld [vmem:[%s1705_s13 + $0x2b8] sm:$0xff] }
  0x37   : > { %1465 = vmatpush3.bf16.msra.mxu1 %v1464_v36  ;;  %1435 = vmatprep.subr.bf16.mxu0 %v1434_v37  ;;  %v400_v16 = vld [vmem:[%s1705_s13 + $0x328] sm:$0xff]  ;;  %v417_v19 = vld [vmem:[%s1705_s13 + $0x3b0] sm:$0xff]  ;;  %v418_v20 = vld [vmem:[%s1705_s13 + $0x3b8] sm:$0xff]  ;;  %v1480_v21 = vpack.c.bf16 %v368_v12, %v367_v11  ;;  %v1482_v24 = vpack.c.bf16 %v386_v18, %v385_v17 }
  0x38   : > { %1467 = vmatprep.subr.bf16.mxu1 %v1466_v41  ;;  %v369_v22 = vld [vmem:[%s1705_s13 + $0x230] sm:$0xff]  ;;  %v1512_v23 = vpack.c.bf16 %v400_v16, %v399_v13  ;;  %v370_v25 = vld [vmem:[%s1705_s13 + $0x238] sm:$0xff]  ;;  %v1514_v28 = vpack.c.bf16 %v418_v20, %v417_v19  ;;  %v388_v30 = vld [vmem:[%s1705_s13 + $0x2c8] sm:$0xff] }
  0x39   : > { %v401_v26 = vld [vmem:[%s1705_s13 + $0x330] sm:$0xff]  ;;  %v402_v27 = vld [vmem:[%s1705_s13 + $0x338] sm:$0xff]  ;;  %v297_v31 = vld [vmem:[%s1700_s9 + $0x8] sm:$0xff]  ;;  %v1484_v36 = vpack.c.bf16 %v370_v25, %v369_v22 }
  0x3a   : > { %1437 = vmatpush3.bf16.msra.mxu0 %v1436_v48  ;;  %v419_v32 = vld [vmem:[%s1705_s13 + $0x3c0] sm:$0xff]  ;;  %v420_v33 = vld [vmem:[%s1705_s13 + $0x3c8] sm:$0xff]  ;;  %v1815_v34 = vrot.slane %v297_v31, %v1758_v15  ;;  %v1516_v37 = vpack.c.bf16 %v402_v27, %v401_v26  ;;  %v389_v46 = vld [vmem:[%s1705_s13 + $0x2d0] sm:$0xff] }
  0x3b   : > { %1469 = vmatpush3.bf16.msra.mxu1 %v1468_v49  ;;  %1471 = vmatprep.subr.bf16.mxu0 %v1470_v50  ;;  %v371_v39 = vld [vmem:[%s1705_s13 + $0x240] sm:$0xff]  ;;  %v372_v40 = vld [vmem:[%s1705_s13 + $0x248] sm:$0xff]  ;;  %v1518_v44 = vpack.c.bf16 %v420_v33, %v419_v32  ;;  %v390_v47 = vld [vmem:[%s1705_s13 + $0x2d8] sm:$0xff] }
  0x3c   : > { %1503 = vmatprep.subr.bf16.mxu1 %v1502_v54  ;;  %v403_v41 = vld [vmem:[%s1705_s13 + $0x340] sm:$0xff]  ;;  %v494_v42 = vcombine.high %v1815_v34, %v1815_v34  ;;  %v404_v45 = vld [vmem:[%s1705_s13 + $0x348] sm:$0xff]  ;;  %v421_v48 = vld [vmem:[%s1705_s13 + $0x3d0] sm:$0xff]  ;;  %v1490_v52 = vpack.c.bf16 %v390_v47, %v389_v46 }
  0x3d   : > { %579 = vmatmul.mubr.f32.vlgmr.msra.gmra.mrb[0].mxu0 %v469_v29  ;;  %v387_v29 = vld [vmem:[%s1705_s13 + $0x2c0] sm:$0xff]  ;;  %v422_v49 = vld [vmem:[%s1705_s13 + $0x3d8] sm:$0xff]  ;;  %v1520_v51 = vpack.c.bf16 %v404_v45, %v403_v41  ;;  %v373_v53 = vld [vmem:[%s1705_s13 + $0x250] sm:$0xff] }
  0x3e   : > { %649 = vmatmul.mubr.f32.vlgmr.msra.gmra.mrb[0].mxu1 %v476_v35  ;;  %1473 = vmatpush3.bf16.msra.mxu0 %v1472_v60  ;;  %v479_v35 = vcombine.high %v297_v31, %v297_v31  ;;  %v1486_v38 = vpack.c.bf16 %v388_v30, %v387_v29  ;;  %v374_v54 = vld [vmem:[%s1705_s13 + $0x258] sm:$0xff]  ;;  %v405_v55 = vld [vmem:[%s1705_s13 + $0x350] sm:$0xff]  ;;  %v1522_v56 = vpack.c.bf16 %v422_v49, %v421_v48  ;;  %v391_v58 = vld [vmem:[%s1705_s13 + $0x2e0] sm:$0xff] }
  0x3f   : > { %1505 = vmatpush3.bf16.msra.mxu1 %v1504_v61  ;;  %1475 = vmatprep.subr.bf16.mxu0 %v1474_v62  ;;  %v406_v57 = vld [vmem:[%s1705_s13 + $0x358] sm:$0xff]  ;;  %v392_v59 = vld [vmem:[%s1705_s13 + $0x2e8] sm:$0xff]  ;;  %v423_v60 = vld [vmem:[%s1705_s13 + $0x3e0] sm:$0xff]  ;;  %v1492_v62 = vpack.c.bf16 %v374_v54, %v373_v53 }
  0x40   : > { %1507 = vmatprep.subr.bf16.mxu1 %v1506_v2  ;;  %v1823_v43 = vrot.slane %v479_v35, %v1758_v15  ;;  %718 = vmatprep.mubr.f32.mxu0 %v494_v42  ;;  %v1488_v15 = vpack.c.bf16 %v372_v40, %v371_v39  ;;  %v424_v61 = vld [vmem:[%s1705_s13 + $0x3e8] sm:$0xff]  ;;  %v1524_v63 = vpack.c.bf16 %v406_v57, %v405_v55  ;;  %v375_v1 = vld [vmem:[%s1705_s13 + $0x260] sm:$0xff]  ;;  %v393_v6 = vld [vmem:[%s1705_s13 + $0x2f0] sm:$0xff] }
  0x41   : > { %v1494_v0 = vpack.c.bf16 %v392_v59, %v391_v58  ;;  %v376_v2 = vld [vmem:[%s1705_s13 + $0x268] sm:$0xff]  ;;  %v407_v3 = vld [vmem:[%s1705_s13 + $0x360] sm:$0xff]  ;;  %v1526_v4 = vpack.c.bf16 %v424_v61, %v423_v60  ;;  %v394_v7 = vld [vmem:[%s1705_s13 + $0x2f8] sm:$0xff] }
  0x42   : > { %1477 = vmatpush3.bf16.msra.mxu0 %v1476_v8  ;;  %v495_v50 = vcombine.high %v1823_v43, %v1823_v43  ;;  %v408_v5 = vld [vmem:[%s1705_s13 + $0x368] sm:$0xff]  ;;  %v425_v8 = vld [vmem:[%s1705_s13 + $0x3f0] sm:$0xff]  ;;  %v1498_v12 = vpack.c.bf16 %v394_v7, %v393_v6  ;;  %v410_v18 = vld [vmem:[%s1705_s13 + $0x378] sm:$0xff] }
  0x43   : > { %1509 = vmatpush3.bf16.msra.mxu1 %v1508_v9  ;;  %1479 = vmatprep.subr.bf16.mxu0 %v1478_v10  ;;  %v426_v9 = vld [vmem:[%s1705_s13 + $0x3f8] sm:$0xff]  ;;  %v1496_v10 = vpack.c.bf16 %v376_v2, %v375_v1  ;;  %v1528_v11 = vpack.c.bf16 %v408_v5, %v407_v3  ;;  %v377_v13 = vld [vmem:[%s1705_s13 + $0x270] sm:$0xff]  ;;  %v443_v19 = vld [vmem:[%s1705_s13 + $0x480] sm:$0xff] }
  0x44   : > { %1511 = vmatprep.subr.bf16.mxu1 %v1510_v14  ;;  %788 = vmatprep.mubr.f32.mxu1 %v495_v50  ;;  %v378_v14 = vld [vmem:[%s1705_s13 + $0x278] sm:$0xff]  ;;  %v409_v16 = vld [vmem:[%s1705_s13 + $0x370] sm:$0xff]  ;;  %v1530_v17 = vpack.c.bf16 %v426_v9, %v425_v8  ;;  %v444_v20 = vld [vmem:[%s1705_s13 + $0x488] sm:$0xff] }
  0x45   : > { %v1532_v22 = vpack.c.bf16 %v410_v18, %v409_v16  ;;  %v428_v25 = vld [vmem:[%s1705_s13 + $0x408] sm:$0xff]  ;;  %v445_v26 = vld [vmem:[%s1705_s13 + $0x490] sm:$0xff]  ;;  %v446_v27 = vld [vmem:[%s1705_s13 + $0x498] sm:$0xff] }
  0x46   : > { %1481 = vmatpush3.bf16.msra.mxu0 %v1480_v21  ;;  %v1500_v21 = vpack.c.bf16 %v378_v14, %v377_v13  ;;  %v1538_v30 = vpack.c.bf16 %v446_v27, %v445_v26  ;;  %v429_v31 = vld [vmem:[%s1705_s13 + $0x410] sm:$0xff]  ;;  %v430_v32 = vld [vmem:[%s1705_s13 + $0x418] sm:$0xff]  ;;  %v447_v35 = vld [vmem:[%s1705_s13 + $0x4a0] sm:$0xff] }
  0x47   : > { %1513 = vmatpush3.bf16.msra.mxu1 %v1512_v23  ;;  %1483 = vmatprep.subr.bf16.mxu0 %v1482_v24  ;;  %v1534_v23 = vpack.c.bf16 %v444_v20, %v443_v19  ;;  %v427_v24 = vld [vmem:[%s1705_s13 + $0x400] sm:$0xff]  ;;  %v432_v40 = vld [vmem:[%s1705_s13 + $0x428] sm:$0xff]  ;;  %v449_v41 = vld [vmem:[%s1705_s13 + $0x4b0] sm:$0xff] }
  0x48   : > { %1515 = vmatprep.subr.bf16.mxu1 %v1514_v28  ;;  %v1859_v28 = vld.sshfl [vmem:[%s1700_s9 + $0x10] sm:$0x33 pattern:$0x76325410]  ;;  %v1536_v29 = vpack.c.bf16 %v428_v25, %v427_v24  ;;  %v431_v39 = vld [vmem:[%s1705_s13 + $0x420] sm:$0xff]  ;;  %v450_v42 = vld [vmem:[%s1705_s13 + $0x4b8] sm:$0xff] }
  0x49   : > { %v503_v33 = vcombine.high %v1859_v28, %v1859_v28  ;;  %v433_v45 = vld [vmem:[%s1705_s13 + $0x430] sm:$0xff]  ;;  %v451_v46 = vld [vmem:[%s1705_s13 + $0x4c0] sm:$0xff]  ;;  %v452_v47 = vld [vmem:[%s1705_s13 + $0x4c8] sm:$0xff] }
  0x4a   : > { %1485 = vmatpush3.bf16.msra.mxu0 %v1484_v36  ;;  %v448_v36 = vld [vmem:[%s1705_s13 + $0x4a8] sm:$0xff]  ;;  %v1550_v49 = vpack.c.bf16 %v452_v47, %v451_v46  ;;  %v435_v50 = vld [vmem:[%s1705_s13 + $0x440] sm:$0xff]  ;;  %v437_v55 = vld [vmem:[%s1705_s13 + $0x450] sm:$0xff] }
  0x4b   : > { %1517 = vmatpush3.bf16.msra.mxu1 %v1516_v37  ;;  %1487 = vmatprep.subr.bf16.mxu0 %v1486_v38  ;;  %v1540_v37 = vpack.c.bf16 %v430_v32, %v429_v31  ;;  %v1542_v38 = vpack.c.bf16 %v448_v36, %v447_v35  ;;  %v455_v57 = vld [vmem:[%s1705_s13 + $0x4e0] sm:$0xff]  ;;  %v456_v58 = vld [vmem:[%s1705_s13 + $0x4e8] sm:$0xff]  ;;  %v441_v3 = vld [vmem:[%s1705_s13 + $0x470] sm:$0xff]  ;;  %v1639_v31 = vmov (!%p1121_p6), 0.0|0.0   ;;  %v1641_v35 = vmov (!%p1121_p6), 0.0  }
  0x4c   : > { %1519 = vmatprep.subr.bf16.mxu1 %v1518_v44  ;;  %v1546_v44 = vpack.c.bf16 %v450_v42, %v449_v41  ;;  %v1558_v60 = vpack.c.bf16 %v456_v58, %v455_v57  ;;  %v439_v61 = vld [vmem:[%s1705_s13 + $0x460] sm:$0xff]  ;;  %v980_v41 = vld [vmem:[%s2022_s5 + $0x10] sm:$0xff] (!%p1121_p6) }
  0x4d   : > { %v295_v25 = vld [vmem:[#allocation2] sm:$0x3] }
  0x4e   : > { %1489 = vmatpush3.bf16.msra.mxu0 %v1488_v15  ;;  %v436_v15 = vld [vmem:[%s1705_s13 + $0x448] sm:$0xff]  ;;  %v982_v47 = vld [vmem:[%s2022_s5 + $0x20] sm:$0xff] (!%p1121_p6) }
  0x4f   : > { %1521 = vmatpush3.bf16.msra.mxu1 %v1520_v51  ;;  %1491 = vmatprep.subr.bf16.mxu0 %v1490_v52  ;;  %v453_v51 = vld [vmem:[%s1705_s13 + $0x4d0] sm:$0xff]  ;;  %v454_v52 = vld [vmem:[%s1705_s13 + $0x4d8] sm:$0xff]  ;;  %v1552_v53 = vpack.c.bf16 %v436_v15, %v435_v50  ;;  %v890_v50 = vld [vmem:[%s2020_s3 + $0x40] sm:$0xff] (!%p1121_p6) }
  0x50   : > { %1523 = vmatprep.subr.bf16.mxu1 %v1522_v56  ;;  %v1554_v54 = vpack.c.bf16 %v454_v52, %v453_v51  ;;  %v438_v56 = vld [vmem:[%s1705_s13 + $0x458] sm:$0xff]  ;;  %v891_v15 = vld [vmem:[%s2020_s3 + $0x48] sm:$0xff] (!%p1121_p6)  ;;  %v984_v52 = vld [vmem:[%s2022_s5 + $0x30] sm:$0xff] (!%p1121_p6) }
  0x51   : > { %v1556_v59 = vpack.c.bf16 %v438_v56, %v437_v55  ;;  %v892_v55 = vld [vmem:[%s2020_s3 + $0x50] sm:$0xff] (!%p1121_p6)  ;;  %v893_v56 = vld [vmem:[%s2020_s3 + $0x58] sm:$0xff] (!%p1121_p6)  ;;  %v986_v58 = vld [vmem:[%s2022_s5 + $0x40] sm:$0xff] (!%p1121_p6) }
  0x52   : > { %1493 = vmatpush3.bf16.msra.mxu0 %v1492_v62  ;;  %v440_v62 = vld [vmem:[%s1705_s13 + $0x468] sm:$0xff] }
  0x53   : > { %1525 = vmatpush3.bf16.msra.mxu1 %v1524_v63  ;;  %1495 = vmatprep.subr.bf16.mxu0 %v1494_v0  ;;  %v457_v63 = vld [vmem:[%s1705_s13 + $0x4f0] sm:$0xff]  ;;  %v458_v0 = vld [vmem:[%s1705_s13 + $0x4f8] sm:$0xff]  ;;  %v1560_v1 = vpack.c.bf16 %v440_v62, %v439_v61  ;;  %v894_v61 = vld [vmem:[%s2020_s3 + $0x60] sm:$0xff] (!%p1121_p6) }
  0x54   : > { %1527 = vmatprep.subr.bf16.mxu1 %v1526_v4  ;;  %v1562_v2 = vpack.c.bf16 %v458_v0, %v457_v63  ;;  %v442_v4 = vld [vmem:[%s1705_s13 + $0x478] sm:$0xff]  ;;  %v895_v62 = vld [vmem:[%s2020_s3 + $0x68] sm:$0xff] (!%p1121_p6)  ;;  %v1122_v0 = vld [vmem:[%s2019_s2] ss:$0 sm:$0xff] (!%p1121_p6) }
  0x55   : > { %v1564_v5 = vpack.c.bf16 %v442_v4, %v441_v3  ;;  %v989_v3 = vld [vmem:[%s2022_s5 + $0x58] sm:$0xff] (!%p1121_p6)  ;;  %v1585_v4 = vpack.c.bf16 (!%p1121_p6), %v895_v62, %v894_v61 }
  0x56   : > { %1497 = vmatpush3.bf16.msra.mxu0 %v1496_v10 }
  0x57   : > { %1529 = vmatpush3.bf16.msra.mxu1 %v1528_v11  ;;  %1499 = vmatprep.subr.bf16.mxu0 %v1498_v12 }
  0x58   : > { %1531 = vmatprep.subr.bf16.mxu1 %v1530_v17 }
  0x5a   : > { %1501 = vmatpush3.bf16.msra.mxu0 %v1500_v21 }
  0x5b   : > { %1533 = vmatpush3.bf16.msra.mxu1 %v1532_v22  ;;  %1535 = vmatprep.subr.bf16.mxu0 %v1534_v23 }
  0x5c   : > { %1590 = vmatprep.subr.bf16.mxu1 (!%p1121_p6), %v1639_v31 }
  0x5d   : > { %719 = vmatmul.mubr.f32.vlgmr.msra.gmra.mrb[2].mxu0 %v1815_v34  ;;  %v1544_v34 = vpack.c.bf16 %v432_v40, %v431_v39  ;;  %v978_v39 = vld [vmem:[%s2022_s5] sm:$0xff] (!%p1121_p6)  ;;  %v979_v40 = vld [vmem:[%s2022_s5 + $0x8] sm:$0xff] (!%p1121_p6) }
  0x5e   : > { %1537 = vmatpush3.bf16.msra.mxu0 %v1536_v29  ;;  %789 = vmatmul.mubr.f32.vlgmr.msra.gmra.mrb[2].mxu1 %v1823_v43  ;;  %v434_v43 = vld [vmem:[%s1705_s13 + $0x438] sm:$0xff]  ;;  %v883_v29 = vld [vmem:[%s2020_s3 + $0x8] sm:$0xff] (!%p1121_p6) }
  0x5f   : > { %1539 = vmatprep.subr.bf16.mxu0 %v1538_v30  ;;  %858 = vmatprep.mubr.f32.mxu0 %v503_v33  ;;  %v1548_v48 = vpack.c.bf16 %v434_v43, %v433_v45  ;;  %v884_v30 = vld [vmem:[%s2020_s3 + $0x10] sm:$0xff] (!%p1121_p6)  ;;  %v885_v33 = vld [vmem:[%s2020_s3 + $0x18] sm:$0xff] (!%p1121_p6) }
  0x60   : > { %1403 = vmatprep.mubr.msk.f32.mxu1 (!%p1121_p6), %vm1640_vm0, %v1641_v35  ;;  %v1570_v36 = vpack.c.bf16 (!%p1121_p6), %v885_v33, %v884_v30  ;;  %v888_v45 = vld [vmem:[%s2020_s3 + $0x30] sm:$0xff] (!%p1121_p6)  ;;  %v889_v43 = vld [vmem:[%s2020_s3 + $0x38] sm:$0xff] (!%p1121_p6) }
  0x62   : > { %1541 = vmatpush3.bf16.msra.mxu0 %v1540_v37  ;;  %v886_v37 = vld [vmem:[%s2020_s3 + $0x20] sm:$0xff] (!%p1121_p6) }
  0x63   : > { %1543 = vmatprep.subr.bf16.mxu0 %v1542_v38  ;;  %v887_v38 = vld [vmem:[%s2020_s3 + $0x28] sm:$0xff] (!%p1121_p6) }
  0x64   : > { %v1573_v42 = vpack.c.bf16 (!%p1121_p6), %v887_v38, %v886_v37 }
  0x66   : > { %1545 = vmatpush3.bf16.msra.mxu0 %v1544_v34  ;;  %v1591_v34 = vpack.c.bf16 (!%p1121_p6), %v979_v40, %v978_v39 }
  0x67   : > { %1547 = vmatprep.subr.bf16.mxu0 %v1546_v44  ;;  %v981_v44 = vld [vmem:[%s2022_s5 + $0x18] sm:$0xff] (!%p1121_p6) }
  0x68   : > { %1592 = vmatpush3.bf16.msra.mxu1 (!%p1121_p6), %v1591_v34  ;;  %v1594_v46 = vpack.c.bf16 (!%p1121_p6), %v981_v44, %v980_v41 }
  0x69   : > { %1593 = vmatprep.subr.bf16.mxu1 (!%p1121_p6), %v1639_v31 }
  0x6a   : > { %1549 = vmatpush3.bf16.msra.mxu0 %v1548_v48  ;;  %v983_v48 = vld [vmem:[%s2022_s5 + $0x28] sm:$0xff] (!%p1121_p6) }
  0x6b   : > { %1551 = vmatprep.subr.bf16.mxu0 %v1550_v49  ;;  %v1576_v49 = vpack.c.bf16 (!%p1121_p6), %v889_v43, %v888_v45  ;;  %v1597_v51 = vpack.c.bf16 (!%p1121_p6), %v983_v48, %v982_v47 }
  0x6c   : > { %1595 = vmatpush3.bf16.msra.mxu1 (!%p1121_p6), %v1594_v46 }
  0x6d   : > { %1596 = vmatprep.subr.bf16.mxu1 (!%p1121_p6), %v1639_v31 }
  0x6e   : > { %1553 = vmatpush3.bf16.msra.mxu0 %v1552_v53  ;;  %v985_v53 = vld [vmem:[%s2022_s5 + $0x38] sm:$0xff] (!%p1121_p6) }
  0x6f   : > { %1555 = vmatprep.subr.bf16.mxu0 %v1554_v54  ;;  %v1579_v54 = vpack.c.bf16 (!%p1121_p6), %v891_v15, %v890_v50  ;;  %v1600_v57 = vpack.c.bf16 (!%p1121_p6), %v985_v53, %v984_v52 }
  0x70   : > { %1598 = vmatpush3.bf16.msra.mxu1 (!%p1121_p6), %v1597_v51 }
  0x71   : > { %1599 = vmatprep.subr.bf16.mxu1 (!%p1121_p6), %v1639_v31 }
  0x72   : > { %1557 = vmatpush3.bf16.msra.mxu0 %v1556_v59  ;;  %v987_v59 = vld [vmem:[%s2022_s5 + $0x48] sm:$0xff] (!%p1121_p6) }
  0x73   : > { %1559 = vmatprep.subr.bf16.mxu0 %v1558_v60  ;;  %v1582_v60 = vpack.c.bf16 (!%p1121_p6), %v893_v56, %v892_v55 }
  0x74   : > { %1601 = vmatpush3.bf16.msra.mxu1 (!%p1121_p6), %v1600_v57 }
  0x75   : > { %1602 = vmatprep.subr.bf16.mxu1 (!%p1121_p6), %v1639_v31 }
  0x76   : > { %1561 = vmatpush3.bf16.msra.mxu0 %v1560_v1  ;;  %v1603_v1 = vpack.c.bf16 (!%p1121_p6), %v987_v59, %v986_v58 }
  0x77   : > { %1563 = vmatprep.subr.bf16.mxu0 %v1562_v2  ;;  %v988_v2 = vld [vmem:[%s2022_s5 + $0x50] sm:$0xff] (!%p1121_p6) }
  0x78   : > { %1604 = vmatpush3.bf16.msra.mxu1 (!%p1121_p6), %v1603_v1 }
  0x79   : > { %1605 = vmatprep.subr.bf16.mxu1 (!%p1121_p6), %v1639_v31 }
  0x7a   : > { %1565 = vmatpush3.bf16.msra.mxu0 %v1564_v5 }
  0x7b   : > { %1566 = vmatprep.subr.bf16.mxu0 (!%p1121_p6), %v1639_v31 }
  0x7d   : > { %859 = vmatmul.mubr.f32.vlgmr.msra.gmra.mrb[4].mxu0 %v1859_v28  ;;  %v882_v28 = vld [vmem:[%s2020_s3] sm:$0xff] (!%p1121_p6) }
  0x7e   : > { %v1567_v32 = vpack.c.bf16 (!%p1121_p6), %v883_v29, %v882_v28  ;;  %1368 = vmatprep.mubr.msk.f32.mxu0 (!%p1121_p6), %vm1640_vm0, %v1641_v35 }
  0x80   : > { %1568 = vmatpush3.bf16.msra.mxu0 (!%p1121_p6), %v1567_v32 }
  0x81   : > { %1569 = vmatprep.subr.bf16.mxu0 (!%p1121_p6), %v1639_v31 }
  0x84   : > { %1571 = vmatpush3.bf16.msra.mxu0 (!%p1121_p6), %v1570_v36 }
  0x85   : > { %1572 = vmatprep.subr.bf16.mxu0 (!%p1121_p6), %v1639_v31 }
  0x88   : > { %1574 = vmatpush3.bf16.msra.mxu0 (!%p1121_p6), %v1573_v42 }
  0x89   : > { %1575 = vmatprep.subr.bf16.mxu0 (!%p1121_p6), %v1639_v31 }
  0x8c   : > { %1577 = vmatpush3.bf16.msra.mxu0 (!%p1121_p6), %v1576_v49 }
  0x8d   : > { %1578 = vmatprep.subr.bf16.mxu0 (!%p1121_p6), %v1639_v31 }
  0x90   : > { %1580 = vmatpush3.bf16.msra.mxu0 (!%p1121_p6), %v1579_v54 }
  0x91   : > { %1581 = vmatprep.subr.bf16.mxu0 (!%p1121_p6), %v1639_v31 }
  0x94   : > { %1583 = vmatpush3.bf16.msra.mxu0 (!%p1121_p6), %v1582_v60 }
  0x95   : > { %1584 = vmatprep.subr.bf16.mxu0 (!%p1121_p6), %v1639_v31 }
  0x98   : > { %1586 = vmatpush3.bf16.msra.mxu0 (!%p1121_p6), %v1585_v4 }
  0x99   : > { %1587 = vmatprep.subr.bf16.mxu0 (!%p1121_p6), %v1639_v31 }
 0x110   : > { %v1159_v6 = vpop.f32.mrb[0].mxu0 }
 0x111   : > { %v1194_v7 = vpop.f32.mrb[0].mxu1  ;;  %v1160_v8 = vpop.f32.mrb[1].mxu0 }
 0x112   : > { %v1161_v9 = vadd.f32 %v1160_v8, %v1159_v6  ;;  %v1195_v10 = vpop.f32.mrb[1].mxu1  ;;  %v896_v6 = vld [vmem:[%s2020_s3 + $0x70] sm:$0xff] (!%p1121_p6)  ;;  %v1606_v8 = vpack.c.bf16 (!%p1121_p6), %v989_v3, %v988_v2 }
 0x113   : > { %v1196_v11 = vadd.f32 %v1195_v10, %v1194_v7  ;;  %v897_v7 = vld [vmem:[%s2020_s3 + $0x78] sm:$0xff] (!%p1121_p6)  ;;  %v991_v10 = vld [vmem:[%s2022_s5 + $0x68] sm:$0xff] (!%p1121_p6) }
 0x114   : > { %1607 = vmatpush3.bf16.msra.mxu1 (!%p1121_p6), %v1606_v8 }
 0x115   : > { %v651_v12 = vadd.f32 %v1196_v11, %v1161_v9  ;;  %v990_v9 = vld [vmem:[%s2022_s5 + $0x60] sm:$0xff] (!%p1121_p6)  ;;  %v1588_v11 = vpack.c.bf16 (!%p1121_p6), %v897_v7, %v896_v6  ;;  %1608 = vmatprep.subr.bf16.mxu1 (!%p1121_p6), %v1639_v31 }
 0x117   : > { %1589 = vmatpush3.bf16.msra.mxu0 (!%p1121_p6), %v1588_v11 }
 0x130   : > { %v1229_v13 = vpop.f32.mrb[2].mxu0 }
 0x131   : > { %v1230_v14 = vpop.f32.mrb[3].mxu0  ;;  %v1264_v16 = vpop.f32.mrb[2].mxu1 }
 0x132   : > { %v1231_v17 = vadd.f32 %v1230_v14, %v1229_v13  ;;  %v1265_v18 = vpop.f32.mrb[3].mxu1  ;;  %v1609_v13 = vpack.c.bf16 (!%p1121_p6), %v991_v10, %v990_v9 }
 0x133   : > { %v1266_v19 = vadd.f32 %v1265_v18, %v1264_v16  ;;  %v992_v16 = vld [vmem:[%s2022_s5 + $0x70] sm:$0xff] (!%p1121_p6) }
 0x134   : > { %v721_v20 = vadd.f32 %v1231_v17, %v651_v12  ;;  %1610 = vmatpush3.bf16.msra.mxu1 (!%p1121_p6), %v1609_v13  ;;  %v993_v17 = vld [vmem:[%s2022_s5 + $0x78] sm:$0xff] (!%p1121_p6) }
 0x135   : > { %1611 = vmatprep.subr.bf16.mxu1 (!%p1121_p6), %v1639_v31  ;;  %v1612_v18 = vpack.c.bf16 (!%p1121_p6), %v993_v17, %v992_v16 }
 0x136   : > { %v791_v21 = vadd.f32 %v1266_v19, %v721_v20  ;;  %v1123_v19 = vld [vmem:[%s2021_s4] ss:$0 sm:$0xff] (!%p1121_p6) }
 0x138   : > { %1613 = vmatpush3.bf16.msra.mxu1 (!%p1121_p6), %v1612_v18 }
 0x150   : > { %v1299_v22 = vpop.f32.mrb[4].mxu0 }
 0x151   : > { %v1300_v23 = vpop.f32.mrb[5].mxu0 }
 0x152   : > { %v1301_v24 = vadd.f32 %v1300_v23, %v1299_v22  ;;  %869 = sbr.rel (%p1121_p6) target bundleno = 789 (0x315), region = 56 }
 0x154   : > { %v861_v26 = vadd.f32 %v1301_v24, %v791_v21 }
 0x156   : > { %v864_v27 = vadd.f32 %v861_v26, %v295_v25  ;;  %v1124_v25 = vld [vmem:[#allocation3] ss:$0 sm:$0xff] (!%p1121_p6) }
 0x158   : > { %865 = vst [vmem:[#allocation2] sm:$0x3] %v864_v27 }
 0x15f   : > { %v870_v63 = vld [vmem:[#allocation2] sm:$0x3] }
 0x160   : > { %v878_v5 = vadd.f32 %v1122_v0, %v870_v63 }
 0x162   : > { %v880_v12 = vmul.f32 0.01, %v878_v5  ;;  %vm879_vm1 = vcmp.ge.f32.partialorder %v878_v5, 0.0 }
 0x164   : > { %v881_v14 = vsel %vm879_vm1, %v878_v5, %v880_v12 }
 0x165   : > { %1369 = vmatmul.mubr.f32.vlgmr.msra.gmra.mrb[0].mxu0 %v881_v14 }
 0x238   : > { %v971_v20 = vpop.f32.mrb[0].mxu0 }
 0x239   : > { %v972_v21 = vadd.f32 %v1123_v19, %v971_v20  ;;  %v1370_v22 = vpop.f32.mrb[1].mxu0 }
 0x23b   : > { %v976_v23 = vmul.f32 0.01, %v972_v21  ;;  %vm975_vm2 = vcmp.ge.f32.partialorder %v972_v21, 0.0 }
 0x23d   : > { %v977_v24 = vsel %vm975_vm2, %v972_v21, %v976_v23 }
 0x23e   : > { %1404 = vmatmul.mubr.f32.vlgmr.msra.gmra.mrb[0].mxu1 %v977_v24 }
 0x311   : > { %v1067_v26 = vpop.f32.mrb[0].mxu1 }
 0x312   : > { %v1068_v27 = vadd.f32 %v1124_v25, %v1067_v26  ;;  %v1405_v28 = vpop.f32.mrb[1].mxu1 }
 0x314   : > { %1072 = vst.msk [vmem:[%s2024_s7] sm:$0x3] %vm1071_vm3, %v1068_v27 }
 0x315 PF: > { %s19_s26 = sadd.s32 1, %s1635_s26  }
 0x316   : > { %p16_p7 = scmp.ge.s32.totalorder %s19_s26, 12  }
 0x318   :  { %18 = sbr.rel (!%p16_p7) target bundleno = 3 (0x3), region = 85 }

</bundles_post_ra>
